<compile_context>
chip_gen: v6e
topology: v6e:2x2x1
jax: 0.10.0
libtpu: 0.0.40
codegen_flags: <defaults>
</compile_context>

<pallas_src>
import functools
import math

import jax
import jax.numpy as jnp
from jax import lax
from jax.experimental import pallas as pl
from jax.experimental.pallas import tpu as pltpu

LN_EPS = 1e-5        # PyTorch nn.LayerNorm default
NEG_INF = -1e30      # finite "-inf" for key-padding bias (avoids NaN rows for fully padded sequences)
VMEM_LIMIT = 48 * 1024 * 1024


# ----------------------------------------------------------------------------- optional single-buffering
_WEIGHT_PIPELINE = "unset"


def _weight_pipeline_mode():
    """Return pl.Buffered(1) if this Pallas build supports single-buffering grid-invariant
    inputs (halves resident weight VMEM — matters on v7x's 64 MiB), else None (default)."""
    global _WEIGHT_PIPELINE
    if _WEIGHT_PIPELINE == "unset":
        try:
            def _probe_kernel(x_ref, o_ref):
                o_ref[...] = x_ref[...] + 1.0

            probe = pl.pallas_call(
                _probe_kernel,
                out_shape=jax.ShapeDtypeStruct((8, 128), jnp.float32),
                grid=(2,),
                in_specs=[pl.BlockSpec((8, 128), lambda i: (0, 0),
                                       pipeline_mode=pl.Buffered(1))],
                out_specs=pl.BlockSpec((8, 128), lambda i: (0, 0)),
            )(jnp.zeros((8, 128), jnp.float32))
            jax.block_until_ready(probe)
            _WEIGHT_PIPELINE = pl.Buffered(1)
        except Exception:
            _WEIGHT_PIPELINE = None
    return _WEIGHT_PIPELINE if _WEIGHT_PIPELINE != "unset" else None


# ----------------------------------------------------------------------------- in-kernel helpers
def _erf(x):
    # Abramowitz & Stegun 7.1.26 polynomial (|abs err| < 1.5e-7): lax.erf has no Mosaic lowering.
    # Divide replaced by approx reciprocal -> runs on the otherwise-idle EUP slot between FFN matmuls.
    a1, a2, a3, a4, a5 = 0.254829592, -0.284496736, 1.421413741, -1.453152027, 1.061405429
    p = 0.3275911
    sgn = jnp.where(x >= 0.0, 1.0, -1.0)
    ax = jnp.abs(x)
    t = pl.reciprocal(1.0 + p * ax, approx=True)
    poly = ((((a5 * t + a4) * t + a3) * t + a2) * t + a1) * t
    return sgn * (1.0 - poly * jnp.exp(-ax * ax))


def _gelu_exact(x):
    # matches PyTorch F.gelu(approximate='none') = 0.5*x*(1+erf(x/sqrt(2))) (modulo erf polynomial)
    return 0.5 * x * (1.0 + _erf(x * 0.7071067811865476))


def _layernorm(z, gamma, beta):
    mu = jnp.mean(z, axis=-1, keepdims=True)
    var = jnp.mean(jnp.square(z - mu), axis=-1, keepdims=True)
    return (z - mu) * lax.rsqrt(var + LN_EPS) * gamma + beta


def _row_tile(m, target=512):
    """Largest row tile <= target that divides m and is a multiple of 8 (else full m)."""
    if m <= target:
        return m
    tm = target
    while tm >= 8:
        if m % tm == 0:
            return tm
        tm //= 2
    return m


# ----------------------------------------------------------------------------- attention block kernel
def _attn_block_kernel(x_ref, bias_ref, w_in_ref, b_in_ref, wo_ref, bo_ref,
                       g1_ref, b1_ref, o_ref,
                       q_s, k_s, v_s, *, n_heads, head_dim, scale):
    x = x_ref[0]                                   # (S, D) f32
    S, D = x.shape
    xb = x.astype(jnp.bfloat16)

    # Fused QKV projection: ONE (S,D)x(D,3D) MXU pass (full MXU width, one weight DMA).
    qkv = jnp.dot(xb, w_in_ref[...], preferred_element_type=jnp.float32) + b_in_ref[...]
    qkvb = qkv.astype(jnp.bfloat16)                # (S, 3D) bf16 — scratch feeds stay bf16

    # One-time head-major relayout (static offsets) so the dynamic head loop below only ever
    # does leading-axis indexing: lane-dense loads, no masked partial stores per head.
    for h in range(n_heads):                       # static, tiny: 3*H slices total
        lo = h * head_dim
        q_s[h] = qkvb[:, lo:lo + head_dim]
        k_s[h] = qkvb[:, D + lo:D + lo + head_dim]
        v_s[h] = qkvb[:, 2 * D + lo:2 * D + lo + head_dim]

    bias = bias_ref[0]                             # (1, S) key-padding bias, hoisted out of the head loop

    def head_body(h, acc):
        qh = q_s[h]                                # (S, hd) bf16, leading-axis dynamic index
        kh = k_s[h]
        vh = v_s[h]
        # q @ k^T without materializing a transpose: contract last dims
        s = lax.dot_general(qh, kh, (((1,), (1,)), ((), ())),
                            preferred_element_type=jnp.float32) * scale
        s = s + bias                               # (S, S) + (1, S)
        m = jnp.max(s, axis=-1, keepdims=True)
        p = jnp.exp(s - m)
        denom = jnp.sum(p, axis=-1, keepdims=True)
        p = p * pl.reciprocal(denom, approx=True)  # EUP slot
        ctx_h = jnp.dot(p.astype(jnp.bfloat16), vh, preferred_element_type=jnp.float32)  # (S, hd) f32
        # Output projection folded into the head loop: accumulate ctx_h @ Wo[h*hd:(h+1)*hd, :]
        # (sublane slice of Wo — clean; no (S, D) ctx buffer, no masked ctx stores).
        start = pl.multiple_of(h * head_dim, head_dim)
        wo_h = wo_ref[pl.ds(start, head_dim), :]
        return acc + jnp.dot(ctx_h.astype(jnp.bfloat16), wo_h,
                             preferred_element_type=jnp.float32)

    # fori_loop (not a static unroll) bounds per-head live ranges -> flat vreg/VMEM pressure.
    ao = lax.fori_loop(0, n_heads, head_body, jnp.zeros((S, D), jnp.float32)) + bo_ref[...]

    # post-norm residual: LayerNorm1(x + SelfAttn(x))
    o_ref[0] = _layernorm(x + ao, g1_ref[...], b1_ref[...])


def attention_block(x, bias, w_in, b_in, wo, bo, g1, b1, *, n_heads, scale):
    """x: (B, S, D) f32; bias: (B, 1, S) f32 key-padding bias.  Returns LN1(x + MHA(x))."""
    B, S, D = x.shape
    hd = D // n_heads
    wp = _weight_pipeline_mode()
    kern = functools.partial(_attn_block_kernel, n_heads=n_heads, head_dim=hd, scale=scale)

    x_spec = pl.BlockSpec((1, S, D), lambda b: (b, 0, 0))
    w2d = lambda shape: pl.BlockSpec(shape, lambda b: (0, 0), pipeline_mode=wp)  # grid-invariant weights
    v_spec = pl.BlockSpec((1, D), lambda b: (0, 0))

    return pl.pallas_call(
        kern,
        out_shape=jax.ShapeDtypeStruct((B, S, D), jnp.float32),
        grid=(B,),
        in_specs=[
            x_spec,
            pl.BlockSpec((1, 1, S), lambda b: (b, 0, 0)),
            w2d((D, 3 * D)),                       # fused in_proj weight (bf16)
            pl.BlockSpec((1, 3 * D), lambda b: (0, 0)),
            w2d((D, D)),                           # out_proj weight (bf16)
            v_spec,                                # out_proj bias
            v_spec, v_spec,                        # LN1 gamma/beta
        ],
        out_specs=x_spec,
        scratch_shapes=[pltpu.VMEM((n_heads, S, hd), jnp.bfloat16)] * 3,   # q, k, v (head-major, bf16)
        compiler_params=pltpu.CompilerParams(
            dimension_semantics=("parallel",),
            vmem_limit_bytes=VMEM_LIMIT,
        ),
    )(x, bias, w_in, b_in, wo, bo, g1, b1)


# ----------------------------------------------------------------------------- FFN block kernel
def _ffn_block_kernel(x_ref, w1_ref, b1_ref, w2_ref, b2_ref, g2_ref, be2_ref,
                      gf_ref, bf_ref, o_ref, *, apply_final_ln):
    x = x_ref[...]                                                        # (TM, D) f32
    hid = jnp.dot(x.astype(jnp.bfloat16), w1_ref[...],
                  preferred_element_type=jnp.float32) + b1_ref[...]       # (TM, F) f32
    hid = _gelu_exact(hid)                                                # VPU/EUP math, f32
    y = jnp.dot(hid.astype(jnp.bfloat16), w2_ref[...],
                preferred_element_type=jnp.float32) + b2_ref[...]         # (TM, D) f32
    # post-norm residual: LayerNorm2(x + FFN(x))
    z = _layernorm(x + y, g2_ref[...], be2_ref[...])
    if apply_final_ln:
        # model's final self.layer_norm fused into the last layer's FFN kernel (saves an HBM round trip)
        z = _layernorm(z, gf_ref[...], bf_ref[...])
    o_ref[...] = z


def ffn_block(x, w1, b1, w2, b2, g2, be2, gf, bf, *, apply_final_ln):
    """x: (M, D) f32. Returns [final_LN](LN2(x + linear2(gelu(linear1(x))))), tiled over rows."""
    M, D = x.shape
    F = w1.shape[1]
    TM = _row_tile(M, target=512)
    wp = _weight_pipeline_mode()
    kern = functools.partial(_ffn_block_kernel, apply_final_ln=apply_final_ln)
    return pl.pallas_call(
        kern,
        out_shape=jax.ShapeDtypeStruct((M, D), jnp.float32),
        grid=(M // TM,),
        in_specs=[
            pl.BlockSpec((TM, D), lambda i: (i, 0)),
            pl.BlockSpec((D, F), lambda i: (0, 0), pipeline_mode=wp),
            pl.BlockSpec((1, F), lambda i: (0, 0)),
            pl.BlockSpec((F, D), lambda i: (0, 0), pipeline_mode=wp),
            pl.BlockSpec((1, D), lambda i: (0, 0)),
            pl.BlockSpec((1, D), lambda i: (0, 0)),
            pl.BlockSpec((1, D), lambda i: (0, 0)),
            pl.BlockSpec((1, D), lambda i: (0, 0)),
            pl.BlockSpec((1, D), lambda i: (0, 0)),
        ],
        out_specs=pl.BlockSpec((TM, D), lambda i: (i, 0)),
        compiler_params=pltpu.CompilerParams(
            dimension_semantics=("parallel",),
            vmem_limit_bytes=VMEM_LIMIT,
        ),
    )(x, w1, b1, w2, b2, g2, be2, gf, bf)


# ----------------------------------------------------------------------------- params (pre-cast / pre-shaped ONCE)
def init_params(key, hidden, num_layers):
    """Weights are stored in the exact layout/dtype the kernels consume:
    bf16, (in, out) layout (transposed vs PyTorch nn.Linear's (out, in)), fused in_proj,
    biases / LN params as (1, N) f32 — so no per-forward casts, reshapes or slicing."""
    D = hidden
    F = 4 * D
    layers = []
    for _ in range(num_layers):
        key, k0, k1, k2, k3 = jax.random.split(key, 5)
        layers.append(
            dict(
                in_proj_w=(0.02 * jax.random.normal(k0, (D, 3 * D), jnp.float32)).astype(jnp.bfloat16),
                in_proj_b=jnp.zeros((1, 3 * D), jnp.float32),
                out_proj_w=(0.02 * jax.random.normal(k1, (D, D), jnp.float32)).astype(jnp.bfloat16),
                out_proj_b=jnp.zeros((1, D), jnp.float32),
                lin1_w=(0.02 * jax.random.normal(k2, (D, F), jnp.float32)).astype(jnp.bfloat16),
                lin1_b=jnp.zeros((1, F), jnp.float32),
                lin2_w=(0.02 * jax.random.normal(k3, (F, D), jnp.float32)).astype(jnp.bfloat16),
                lin2_b=jnp.zeros((1, D), jnp.float32),
                norm1_g=jnp.ones((1, D), jnp.float32),
                norm1_b=jnp.zeros((1, D), jnp.float32),
                norm2_g=jnp.ones((1, D), jnp.float32),
                norm2_b=jnp.zeros((1, D), jnp.float32),
            )
        )
    return dict(
        layers=layers,
        final_g=jnp.ones((1, D), jnp.float32),
        final_b=jnp.zeros((1, D), jnp.float32),
    )


# ----------------------------------------------------------------------------- model wrapper
def shallow_hubert_forward(x, params, attention_mask=None, *, n_heads):
    """x: (B, S, D) float32; attention_mask: (B, S) with 1 = attend, 0 = padded (or None)."""
    B, S, D = x.shape
    HD = D // n_heads
    scale = 1.0 / math.sqrt(HD)
    M = B * S
    n_layers = len(params["layers"])
    assert n_layers >= 1

    if attention_mask is not None:
        # key_padding_mask = ~attention_mask.bool(); masked keys get a large negative bias
        bias = jnp.where(attention_mask.astype(bool), 0.0, NEG_INF).astype(jnp.float32)
    else:
        bias = jnp.zeros((B, S), jnp.float32)
    bias = bias.reshape(B, 1, S)

    h = x.astype(jnp.float32)
    for li, lp in enumerate(params["layers"]):
        # --- fused self-attention block: LN1(x + out_proj(MHA(x))) ---
        h = attention_block(h, bias, lp["in_proj_w"], lp["in_proj_b"],
                            lp["out_proj_w"], lp["out_proj_b"],
                            lp["norm1_g"], lp["norm1_b"],
                            n_heads=n_heads, scale=scale)

        # --- fused feed-forward block: LN2(x + lin2(gelu(lin1(x)))), final LN fused into last layer ---
        h = ffn_block(h.reshape(M, D),
                      lp["lin1_w"], lp["lin1_b"], lp["lin2_w"], lp["lin2_b"],
                      lp["norm2_g"], lp["norm2_b"],
                      params["final_g"], params["final_b"],
                      apply_final_ln=(li == n_layers - 1)).reshape(B, S, D)
    return h


if __name__ == "__main__":
    # small shapes consistent with the module: hidden must be divisible by n_heads
    B, S, D, H, L = 2, 16, 64, 4, 2

    key = jax.random.PRNGKey(0)
    kx, kp = jax.random.split(key)
    x = jax.random.normal(kx, (B, S, D), jnp.float32)
    # deterministic padding mask: batch 1 has its last 4 tokens padded
    attention_mask = jnp.ones((B, S), jnp.int32).at[1, -4:].set(0)

    params = init_params(kp, D, L)

    _weight_pipeline_mode()   # probe Buffered(1) support once, outside the jitted trace

    fwd = jax.jit(functools.partial(shallow_hubert_forward, n_heads=H))
    out = fwd(x, params, attention_mask)
    out = jax.block_until_ready(out)

    assert out.shape == (B, S, D) and out.dtype == jnp.float32
    assert bool(jnp.all(jnp.isfinite(out)))
    print("KERNEL_OK")
</pallas_src>

<mosaic_0001>
module attributes {stable_mosaic.version = 11 : i64} {
  func.func @_probe_kernel(%arg0: i32, %arg1: memref<8x128xf32, #tpu.memory_space<vmem>>, %arg2: memref<8x128xf32, #tpu.memory_space<vmem>>) attributes {dimension_semantics = [#tpu.dimension_semantics<arbitrary>], iteration_bounds = array<i64: 2>, scalar_prefetch = 0 : i64, scratch_operands = 0 : i64, tpu.core_type = #tpu.core_type<tc>, window_params = [{pipeline_mode = #tpu.pipeline_mode<synchronous>, transform_indices = @transform_0, window_bounds = array<i64: 8, 128>}, {pipeline_mode = #tpu.pipeline_mode<synchronous>, transform_indices = @transform_1, window_bounds = array<i64: 8, 128>}]} {
    %c0 = arith.constant 0 : index
    %c0_0 = arith.constant 0 : index
    %0 = vector.load %arg1[%c0, %c0_0] : memref<8x128xf32, #tpu.memory_space<vmem>>, vector<8x128xf32>
    %cst = arith.constant 1.000000e+00 : f32
    %1 = vector.broadcast %cst : f32 to vector<8x128xf32>
    %2 = arith.addf %0, %1 : vector<8x128xf32>
    %c0_1 = arith.constant 0 : index
    %c0_2 = arith.constant 0 : index
    %3 = vector.load %arg2[%c0_1, %c0_2] : memref<8x128xf32, #tpu.memory_space<vmem>>, vector<8x128xf32>
    tpu.vector_store %arg2[%c0_1, %c0_2], %2 {strides = array<i32>} : memref<8x128xf32, #tpu.memory_space<vmem>>, vector<8x128xf32>,
    return
  }
  func.func @transform_0(%arg0: i32) -> (i32, i32) {
    %c0_i32 = arith.constant 0 : i32
    %c0_i32_0 = arith.constant 0 : i32
    %c0_i32_1 = arith.constant 0 : i32
    return %c0_i32, %c0_i32_0 : i32, i32
  }
  func.func @transform_1(%arg0: i32) -> (i32, i32) {
    %c0_i32 = arith.constant 0 : i32
    %c0_i32_0 = arith.constant 0 : i32
    %c0_i32_1 = arith.constant 0 : i32
    return %c0_i32, %c0_i32_0 : i32, i32
  }
}

module attributes {stable_mosaic.version = 11 : i64} {
  func.func @_ffn_block_kernel(%arg0: i32, %arg1: memref<32x64xf32, #tpu.memory_space<vmem>>, %arg2: memref<64x256xbf16, #tpu.memory_space<vmem>>, %arg3: memref<1x256xf32, #tpu.memory_space<vmem>>, %arg4: memref<256x64xbf16, #tpu.memory_space<vmem>>, %arg5: memref<1x64xf32, #tpu.memory_space<vmem>>, %arg6: memref<1x64xf32, #tpu.memory_space<vmem>>, %arg7: memref<1x64xf32, #tpu.memory_space<vmem>>, %arg8: memref<1x64xf32, #tpu.memory_space<vmem>>, %arg9: memref<1x64xf32, #tpu.memory_space<vmem>>, %arg10: memref<32x64xf32, #tpu.memory_space<vmem>>) attributes {dimension_semantics = [#tpu.dimension_semantics<parallel>], iteration_bounds = array<i64: 1>, scalar_prefetch = 0 : i64, scratch_operands = 0 : i64, tpu.core_type = #tpu.core_type<tc>, window_params = [{transform_indices = @transform_0, window_bounds = array<i64: 32, 64>}, {pipeline_mode = #tpu.pipeline_mode<synchronous>, transform_indices = @transform_1, window_bounds = array<i64: 64, 256>}, {pipeline_mode = #tpu.pipeline_mode<synchronous>, transform_indices = @transform_2, window_bounds = array<i64: 1, 256>}, {pipeline_mode = #tpu.pipeline_mode<synchronous>, transform_indices = @transform_3, window_bounds = array<i64: 256, 64>}, {pipeline_mode = #tpu.pipeline_mode<synchronous>, transform_indices = @transform_4, window_bounds = array<i64: 1, 64>}, {pipeline_mode = #tpu.pipeline_mode<synchronous>, transform_indices = @transform_5, window_bounds = array<i64: 1, 64>}, {pipeline_mode = #tpu.pipeline_mode<synchronous>, transform_indices = @transform_6, window_bounds = array<i64: 1, 64>}, {pipeline_mode = #tpu.pipeline_mode<synchronous>, transform_indices = @transform_7, window_bounds = array<i64: 1, 64>}, {pipeline_mode = #tpu.pipeline_mode<synchronous>, transform_indices = @transform_8, window_bounds = array<i64: 1, 64>}, {transform_indices = @transform_9, window_bounds = array<i64: 32, 64>}]} {
    %c0 = arith.constant 0 : index
    %c0_0 = arith.constant 0 : index
    %0 = vector.load %arg1[%c0, %c0_0] : memref<32x64xf32, #tpu.memory_space<vmem>>, vector<32x64xf32>
    %1 = arith.truncf %0 : vector<32x64xf32> to vector<32x64xbf16>
    %c0_1 = arith.constant 0 : index
    %c0_2 = arith.constant 0 : index
    %2 = vector.load %arg2[%c0_1, %c0_2] : memref<64x256xbf16, #tpu.memory_space<vmem>>, vector<64x256xbf16>
    %cst = arith.constant dense<0.000000e+00> : vector<32x256xf32>
    %3 = tpu.matmul %1, %2, %cst {dimension_numbers = #tpu.dot_dimension_numbers<[1], [0], [0], [1], [0, 0, 1, 1], [], []>} : vector<32x64xbf16>, vector<64x256xbf16>, vector<32x256xf32> -> vector<32x256xf32>
    %c0_3 = arith.constant 0 : index
    %c0_4 = arith.constant 0 : index
    %4 = vector.load %arg3[%c0_3, %c0_4] : memref<1x256xf32, #tpu.memory_space<vmem>>, vector<1x256xf32>
    %5 = vector.broadcast %4 : vector<1x256xf32> to vector<32x256xf32>
    %6 = arith.addf %3, %5 : vector<32x256xf32>
    %cst_5 = arith.constant 5.000000e-01 : f32
    %7 = vector.broadcast %cst_5 : f32 to vector<32x256xf32>
    %8 = arith.mulf %7, %6 : vector<32x256xf32>
    %cst_6 = arith.constant 0.707106769 : f32
    %9 = vector.broadcast %cst_6 : f32 to vector<32x256xf32>
    %10 = arith.mulf %6, %9 : vector<32x256xf32>
    %cst_7 = arith.constant 0.000000e+00 : f32
    %11 = vector.broadcast %cst_7 : f32 to vector<32x256xf32>
    %12 = arith.cmpf oge, %10, %11 : vector<32x256xf32>
    %cst_8 = arith.constant 1.000000e+00 : f32
    %cst_9 = arith.constant -1.000000e+00 : f32
    %13 = vector.broadcast %cst_8 : f32 to vector<32x256xf32>
    %14 = vector.broadcast %cst_9 : f32 to vector<32x256xf32>
    %15 = arith.select %12, %13, %14 : vector<32x256xi1>, vector<32x256xf32>
    %16 = math.absf %10 : vector<32x256xf32>
    %cst_10 = arith.constant 0.327591091 : f32
    %17 = vector.broadcast %cst_10 : f32 to vector<32x256xf32>
    %18 = arith.mulf %17, %16 : vector<32x256xf32>
    %cst_11 = arith.constant 1.000000e+00 : f32
    %19 = vector.broadcast %cst_11 : f32 to vector<32x256xf32>
    %20 = arith.addf %19, %18 : vector<32x256xf32>
    %21 = tpu.reciprocal %20 {approx = true} : vector<32x256xf32> -> vector<32x256xf32>
    %cst_12 = arith.constant 1.06140542 : f32
    %22 = vector.broadcast %cst_12 : f32 to vector<32x256xf32>
    %23 = arith.mulf %22, %21 : vector<32x256xf32>
    %cst_13 = arith.constant -1.45315206 : f32
    %24 = vector.broadcast %cst_13 : f32 to vector<32x256xf32>
    %25 = arith.addf %23, %24 : vector<32x256xf32>
    %26 = arith.mulf %25, %21 : vector<32x256xf32>
    %cst_14 = arith.constant 1.42141378 : f32
    %27 = vector.broadcast %cst_14 : f32 to vector<32x256xf32>
    %28 = arith.addf %26, %27 : vector<32x256xf32>
    %29 = arith.mulf %28, %21 : vector<32x256xf32>
    %cst_15 = arith.constant -0.284496725 : f32
    %30 = vector.broadcast %cst_15 : f32 to vector<32x256xf32>
    %31 = arith.addf %29, %30 : vector<32x256xf32>
    %32 = arith.mulf %31, %21 : vector<32x256xf32>
    %cst_16 = arith.constant 0.254829586 : f32
    %33 = vector.broadcast %cst_16 : f32 to vector<32x256xf32>
    %34 = arith.addf %32, %33 : vector<32x256xf32>
    %35 = arith.mulf %34, %21 : vector<32x256xf32>
    %cst_17 = arith.constant 0.000000e+00 : f32
    %36 = vector.broadcast %cst_17 : f32 to vector<32x256xf32>
    %37 = arith.subf %36, %16 : vector<32x256xf32>
    %38 = arith.mulf %37, %16 : vector<32x256xf32>
    %39 = math.exp %38 : vector<32x256xf32>
    %40 = arith.mulf %35, %39 : vector<32x256xf32>
    %cst_18 = arith.constant 1.000000e+00 : f32
    %41 = vector.broadcast %cst_18 : f32 to vector<32x256xf32>
    %42 = arith.subf %41, %40 : vector<32x256xf32>
    %43 = arith.mulf %15, %42 : vector<32x256xf32>
    %cst_19 = arith.constant 1.000000e+00 : f32
    %44 = vector.broadcast %cst_19 : f32 to vector<32x256xf32>
    %45 = arith.addf %44, %43 : vector<32x256xf32>
    %46 = arith.mulf %8, %45 : vector<32x256xf32>
    %47 = arith.truncf %46 : vector<32x256xf32> to vector<32x256xbf16>
    %c0_20 = arith.constant 0 : index
    %c0_21 = arith.constant 0 : index
    %48 = vector.load %arg4[%c0_20, %c0_21] : memref<256x64xbf16, #tpu.memory_space<vmem>>, vector<256x64xbf16>
    %cst_22 = arith.constant dense<0.000000e+00> : vector<32x64xf32>
    %49 = tpu.matmul %47, %48, %cst_22 {dimension_numbers = #tpu.dot_dimension_numbers<[1], [0], [0], [1], [0, 0, 1, 1], [], []>} : vector<32x256xbf16>, vector<256x64xbf16>, vector<32x64xf32> -> vector<32x64xf32>
    %c0_23 = arith.constant 0 : index
    %c0_24 = arith.constant 0 : index
    %50 = vector.load %arg5[%c0_23, %c0_24] : memref<1x64xf32, #tpu.memory_space<vmem>>, vector<1x64xf32>
    %51 = vector.broadcast %50 : vector<1x64xf32> to vector<32x64xf32>
    %52 = arith.addf %49, %51 : vector<32x64xf32>
    %53 = arith.addf %0, %52 : vector<32x64xf32>
    %c0_25 = arith.constant 0 : index
    %c0_26 = arith.constant 0 : index
    %54 = vector.load %arg6[%c0_25, %c0_26] : memref<1x64xf32, #tpu.memory_space<vmem>>, vector<1x64xf32>
    %c0_27 = arith.constant 0 : index
    %c0_28 = arith.constant 0 : index
    %55 = vector.load %arg7[%c0_27, %c0_28] : memref<1x64xf32, #tpu.memory_space<vmem>>, vector<1x64xf32>
    %cst_29 = arith.constant dense<0.000000e+00> : vector<32xf32>
    %56 = vector.multi_reduction <add>, %53, %cst_29 [1] : vector<32x64xf32> to vector<32xf32>
    %57 = vector.shape_cast %56 : vector<32xf32> to vector<32x1xf32>
    %cst_30 = arith.constant 6.400000e+01 : f32
    %58 = vector.broadcast %cst_30 : f32 to vector<32x1xf32>
    %59 = arith.divf %57, %58 : vector<32x1xf32>
    %60 = vector.broadcast %59 : vector<32x1xf32> to vector<32x64xf32>
    %61 = arith.subf %53, %60 : vector<32x64xf32>
    %62 = arith.mulf %61, %61 : vector<32x64xf32>
    %cst_31 = arith.constant dense<0.000000e+00> : vector<32xf32>
    %63 = vector.multi_reduction <add>, %62, %cst_31 [1] : vector<32x64xf32> to vector<32xf32>
    %64 = vector.shape_cast %63 : vector<32xf32> to vector<32x1xf32>
    %cst_32 = arith.constant 6.400000e+01 : f32
    %65 = vector.broadcast %cst_32 : f32 to vector<32x1xf32>
    %66 = arith.divf %64, %65 : vector<32x1xf32>
    %67 = vector.broadcast %59 : vector<32x1xf32> to vector<32x64xf32>
    %68 = arith.subf %53, %67 : vector<32x64xf32>
    %cst_33 = arith.constant 9.99999974E-6 : f32
    %69 = vector.broadcast %cst_33 : f32 to vector<32x1xf32>
    %70 = arith.addf %66, %69 : vector<32x1xf32>
    %71 = math.rsqrt %70 : vector<32x1xf32>
    %72 = vector.broadcast %71 : vector<32x1xf32> to vector<32x64xf32>
    %73 = arith.mulf %68, %72 : vector<32x64xf32>
    %74 = vector.broadcast %54 : vector<1x64xf32> to vector<32x64xf32>
    %75 = arith.mulf %73, %74 : vector<32x64xf32>
    %76 = vector.broadcast %55 : vector<1x64xf32> to vector<32x64xf32>
    %77 = arith.addf %75, %76 : vector<32x64xf32>
    %c0_34 = arith.constant 0 : index
    %c0_35 = arith.constant 0 : index
    %78 = vector.load %arg10[%c0_34, %c0_35] : memref<32x64xf32, #tpu.memory_space<vmem>>, vector<32x64xf32>
    tpu.vector_store %arg10[%c0_34, %c0_35], %77 {strides = array<i32>} : memref<32x64xf32, #tpu.memory_space<vmem>>, vector<32x64xf32>,
    return
  }
  func.func @transform_0(%arg0: i32) -> (i32, i32) {
    %c0_i32 = arith.constant 0 : i32
    %c0_i32_0 = arith.constant 0 : i32
    return %arg0, %c0_i32 : i32, i32
  }
  func.func @transform_1(%arg0: i32) -> (i32, i32) {
    %c0_i32 = arith.constant 0 : i32
    %c0_i32_0 = arith.constant 0 : i32
    %c0_i32_1 = arith.constant 0 : i32
    return %c0_i32, %c0_i32_0 : i32, i32
  }
  func.func @transform_2(%arg0: i32) -> (i32, i32) {
    %c0_i32 = arith.constant 0 : i32
    %c0_i32_0 = arith.constant 0 : i32
    %c0_i32_1 = arith.constant 0 : i32
    return %c0_i32, %c0_i32_0 : i32, i32
  }
  func.func @transform_3(%arg0: i32) -> (i32, i32) {
    %c0_i32 = arith.constant 0 : i32
    %c0_i32_0 = arith.constant 0 : i32
    %c0_i32_1 = arith.constant 0 : i32
    return %c0_i32, %c0_i32_0 : i32, i32
  }
  func.func @transform_4(%arg0: i32) -> (i32, i32) {
    %c0_i32 = arith.constant 0 : i32
    %c0_i32_0 = arith.constant 0 : i32
    %c0_i32_1 = arith.constant 0 : i32
    return %c0_i32, %c0_i32_0 : i32, i32
  }
  func.func @transform_5(%arg0: i32) -> (i32, i32) {
    %c0_i32 = arith.constant 0 : i32
    %c0_i32_0 = arith.constant 0 : i32
    %c0_i32_1 = arith.constant 0 : i32
    return %c0_i32, %c0_i32_0 : i32, i32
  }
  func.func @transform_6(%arg0: i32) -> (i32, i32) {
    %c0_i32 = arith.constant 0 : i32
    %c0_i32_0 = arith.constant 0 : i32
    %c0_i32_1 = arith.constant 0 : i32
    return %c0_i32, %c0_i32_0 : i32, i32
  }
  func.func @transform_7(%arg0: i32) -> (i32, i32) {
    %c0_i32 = arith.constant 0 : i32
    %c0_i32_0 = arith.constant 0 : i32
    %c0_i32_1 = arith.constant 0 : i32
    return %c0_i32, %c0_i32_0 : i32, i32
  }
  func.func @transform_8(%arg0: i32) -> (i32, i32) {
    %c0_i32 = arith.constant 0 : i32
    %c0_i32_0 = arith.constant 0 : i32
    %c0_i32_1 = arith.constant 0 : i32
    return %c0_i32, %c0_i32_0 : i32, i32
  }
  func.func @transform_9(%arg0: i32) -> (i32, i32) {
    %c0_i32 = arith.constant 0 : i32
    %c0_i32_0 = arith.constant 0 : i32
    return %arg0, %c0_i32 : i32, i32
  }
}

module attributes {stable_mosaic.version = 11 : i64} {
  func.func @_attn_block_kernel(%arg0: i32, %arg1: memref<1x16x64xf32, #tpu.memory_space<vmem>>, %arg2: memref<1x1x16xf32, #tpu.memory_space<vmem>>, %arg3: memref<64x192xbf16, #tpu.memory_space<vmem>>, %arg4: memref<1x192xf32, #tpu.memory_space<vmem>>, %arg5: memref<64x64xbf16, #tpu.memory_space<vmem>>, %arg6: memref<1x64xf32, #tpu.memory_space<vmem>>, %arg7: memref<1x64xf32, #tpu.memory_space<vmem>>, %arg8: memref<1x64xf32, #tpu.memory_space<vmem>>, %arg9: memref<1x16x64xf32, #tpu.memory_space<vmem>>, %arg10: memref<4x16x16xbf16, #tpu.memory_space<vmem>>, %arg11: memref<4x16x16xbf16, #tpu.memory_space<vmem>>, %arg12: memref<4x16x16xbf16, #tpu.memory_space<vmem>>) attributes {dimension_semantics = [#tpu.dimension_semantics<parallel>], iteration_bounds = array<i64: 2>, scalar_prefetch = 0 : i64, scratch_operands = 3 : i64, tpu.core_type = #tpu.core_type<tc>, window_params = [{transform_indices = @transform_0, window_bounds = array<i64: 1, 16, 64>}, {transform_indices = @transform_1, window_bounds = array<i64: 1, 1, 16>}, {pipeline_mode = #tpu.pipeline_mode<synchronous>, transform_indices = @transform_2, window_bounds = array<i64: 64, 192>}, {pipeline_mode = #tpu.pipeline_mode<synchronous>, transform_indices = @transform_3, window_bounds = array<i64: 1, 192>}, {pipeline_mode = #tpu.pipeline_mode<synchronous>, transform_indices = @transform_4, window_bounds = array<i64: 64, 64>}, {pipeline_mode = #tpu.pipeline_mode<synchronous>, transform_indices = @transform_5, window_bounds = array<i64: 1, 64>}, {pipeline_mode = #tpu.pipeline_mode<synchronous>, transform_indices = @transform_6, window_bounds = array<i64: 1, 64>}, {pipeline_mode = #tpu.pipeline_mode<synchronous>, transform_indices = @transform_7, window_bounds = array<i64: 1, 64>}, {transform_indices = @transform_8, window_bounds = array<i64: 1, 16, 64>}]} {
    %c0 = arith.constant 0 : index
    %c0_0 = arith.constant 0 : index
    %c0_1 = arith.constant 0 : index
    %0 = vector.load %arg1[%c0, %c0_0, %c0_1] : memref<1x16x64xf32, #tpu.memory_space<vmem>>, vector<1x16x64xf32>
    %1 = vector.shape_cast %0 : vector<1x16x64xf32> to vector<16x64xf32>
    %2 = arith.truncf %1 : vector<16x64xf32> to vector<16x64xbf16>
    %c0_2 = arith.constant 0 : index
    %c0_3 = arith.constant 0 : index
    %3 = vector.load %arg3[%c0_2, %c0_3] : memref<64x192xbf16, #tpu.memory_space<vmem>>, vector<64x192xbf16>
    %cst = arith.constant dense<0.000000e+00> : vector<16x192xf32>
    %4 = tpu.matmul %2, %3, %cst {dimension_numbers = #tpu.dot_dimension_numbers<[1], [0], [0], [1], [0, 0, 1, 1], [], []>} : vector<16x64xbf16>, vector<64x192xbf16>, vector<16x192xf32> -> vector<16x192xf32>
    %c0_4 = arith.constant 0 : index
    %c0_5 = arith.constant 0 : index
    %5 = vector.load %arg4[%c0_4, %c0_5] : memref<1x192xf32, #tpu.memory_space<vmem>>, vector<1x192xf32>
    %6 = vector.broadcast %5 : vector<1x192xf32> to vector<16x192xf32>
    %7 = arith.addf %4, %6 : vector<16x192xf32>
    %8 = arith.truncf %7 : vector<16x192xf32> to vector<16x192xbf16>
    %9 = vector.extract_strided_slice %8 {offsets = [0, 0], sizes = [16, 16], strides = [1, 1]} : vector<16x192xbf16> to vector<16x16xbf16>
    %c0_6 = arith.constant 0 : index
    %c0_7 = arith.constant 0 : index
    %c0_8 = arith.constant 0 : index
    %10 = vector.load %arg10[%c0_6, %c0_7, %c0_8] : memref<4x16x16xbf16, #tpu.memory_space<vmem>>, vector<1x16x16xbf16>
    %11 = vector.shape_cast %10 : vector<1x16x16xbf16> to vector<16x16xbf16>
    %12 = vector.shape_cast %9 : vector<16x16xbf16> to vector<1x16x16xbf16>
    tpu.vector_store %arg10[%c0_6, %c0_7, %c0_8], %12 {strides = array<i32>} : memref<4x16x16xbf16, #tpu.memory_space<vmem>>, vector<1x16x16xbf16>,
    %13 = vector.extract_strided_slice %8 {offsets = [0, 64], sizes = [16, 16], strides = [1, 1]} : vector<16x192xbf16> to vector<16x16xbf16>
    %c0_9 = arith.constant 0 : index
    %c0_10 = arith.constant 0 : index
    %c0_11 = arith.constant 0 : index
    %14 = vector.load %arg11[%c0_9, %c0_10, %c0_11] : memref<4x16x16xbf16, #tpu.memory_space<vmem>>, vector<1x16x16xbf16>
    %15 = vector.shape_cast %14 : vector<1x16x16xbf16> to vector<16x16xbf16>
    %16 = vector.shape_cast %13 : vector<16x16xbf16> to vector<1x16x16xbf16>
    tpu.vector_store %arg11[%c0_9, %c0_10, %c0_11], %16 {strides = array<i32>} : memref<4x16x16xbf16, #tpu.memory_space<vmem>>, vector<1x16x16xbf16>,
    %17 = vector.extract_strided_slice %8 {offsets = [0, 128], sizes = [16, 16], strides = [1, 1]} : vector<16x192xbf16> to vector<16x16xbf16>
    %c0_12 = arith.constant 0 : index
    %c0_13 = arith.constant 0 : index
    %c0_14 = arith.constant 0 : index
    %18 = vector.load %arg12[%c0_12, %c0_13, %c0_14] : memref<4x16x16xbf16, #tpu.memory_space<vmem>>, vector<1x16x16xbf16>
    %19 = vector.shape_cast %18 : vector<1x16x16xbf16> to vector<16x16xbf16>
    %20 = vector.shape_cast %17 : vector<16x16xbf16> to vector<1x16x16xbf16>
    tpu.vector_store %arg12[%c0_12, %c0_13, %c0_14], %20 {strides = array<i32>} : memref<4x16x16xbf16, #tpu.memory_space<vmem>>, vector<1x16x16xbf16>,
    %21 = vector.extract_strided_slice %8 {offsets = [0, 16], sizes = [16, 16], strides = [1, 1]} : vector<16x192xbf16> to vector<16x16xbf16>
    %c1 = arith.constant 1 : index
    %c0_15 = arith.constant 0 : index
    %c0_16 = arith.constant 0 : index
    %22 = vector.load %arg10[%c1, %c0_15, %c0_16] : memref<4x16x16xbf16, #tpu.memory_space<vmem>>, vector<1x16x16xbf16>
    %23 = vector.shape_cast %22 : vector<1x16x16xbf16> to vector<16x16xbf16>
    %24 = vector.shape_cast %21 : vector<16x16xbf16> to vector<1x16x16xbf16>
    tpu.vector_store %arg10[%c1, %c0_15, %c0_16], %24 {strides = array<i32>} : memref<4x16x16xbf16, #tpu.memory_space<vmem>>, vector<1x16x16xbf16>,
    %25 = vector.extract_strided_slice %8 {offsets = [0, 80], sizes = [16, 16], strides = [1, 1]} : vector<16x192xbf16> to vector<16x16xbf16>
    %c1_17 = arith.constant 1 : index
    %c0_18 = arith.constant 0 : index
    %c0_19 = arith.constant 0 : index
    %26 = vector.load %arg11[%c1_17, %c0_18, %c0_19] : memref<4x16x16xbf16, #tpu.memory_space<vmem>>, vector<1x16x16xbf16>
    %27 = vector.shape_cast %26 : vector<1x16x16xbf16> to vector<16x16xbf16>
    %28 = vector.shape_cast %25 : vector<16x16xbf16> to vector<1x16x16xbf16>
    tpu.vector_store %arg11[%c1_17, %c0_18, %c0_19], %28 {strides = array<i32>} : memref<4x16x16xbf16, #tpu.memory_space<vmem>>, vector<1x16x16xbf16>,
    %29 = vector.extract_strided_slice %8 {offsets = [0, 144], sizes = [16, 16], strides = [1, 1]} : vector<16x192xbf16> to vector<16x16xbf16>
    %c1_20 = arith.constant 1 : index
    %c0_21 = arith.constant 0 : index
    %c0_22 = arith.constant 0 : index
    %30 = vector.load %arg12[%c1_20, %c0_21, %c0_22] : memref<4x16x16xbf16, #tpu.memory_space<vmem>>, vector<1x16x16xbf16>
    %31 = vector.shape_cast %30 : vector<1x16x16xbf16> to vector<16x16xbf16>
    %32 = vector.shape_cast %29 : vector<16x16xbf16> to vector<1x16x16xbf16>
    tpu.vector_store %arg12[%c1_20, %c0_21, %c0_22], %32 {strides = array<i32>} : memref<4x16x16xbf16, #tpu.memory_space<vmem>>, vector<1x16x16xbf16>,
    %33 = vector.extract_strided_slice %8 {offsets = [0, 32], sizes = [16, 16], strides = [1, 1]} : vector<16x192xbf16> to vector<16x16xbf16>
    %c2 = arith.constant 2 : index
    %c0_23 = arith.constant 0 : index
    %c0_24 = arith.constant 0 : index
    %34 = vector.load %arg10[%c2, %c0_23, %c0_24] : memref<4x16x16xbf16, #tpu.memory_space<vmem>>, vector<1x16x16xbf16>
    %35 = vector.shape_cast %34 : vector<1x16x16xbf16> to vector<16x16xbf16>
    %36 = vector.shape_cast %33 : vector<16x16xbf16> to vector<1x16x16xbf16>
    tpu.vector_store %arg10[%c2, %c0_23, %c0_24], %36 {strides = array<i32>} : memref<4x16x16xbf16, #tpu.memory_space<vmem>>, vector<1x16x16xbf16>,
    %37 = vector.extract_strided_slice %8 {offsets = [0, 96], sizes = [16, 16], strides = [1, 1]} : vector<16x192xbf16> to vector<16x16xbf16>
    %c2_25 = arith.constant 2 : index
    %c0_26 = arith.constant 0 : index
    %c0_27 = arith.constant 0 : index
    %38 = vector.load %arg11[%c2_25, %c0_26, %c0_27] : memref<4x16x16xbf16, #tpu.memory_space<vmem>>, vector<1x16x16xbf16>
    %39 = vector.shape_cast %38 : vector<1x16x16xbf16> to vector<16x16xbf16>
    %40 = vector.shape_cast %37 : vector<16x16xbf16> to vector<1x16x16xbf16>
    tpu.vector_store %arg11[%c2_25, %c0_26, %c0_27], %40 {strides = array<i32>} : memref<4x16x16xbf16, #tpu.memory_space<vmem>>, vector<1x16x16xbf16>,
    %41 = vector.extract_strided_slice %8 {offsets = [0, 160], sizes = [16, 16], strides = [1, 1]} : vector<16x192xbf16> to vector<16x16xbf16>
    %c2_28 = arith.constant 2 : index
    %c0_29 = arith.constant 0 : index
    %c0_30 = arith.constant 0 : index
    %42 = vector.load %arg12[%c2_28, %c0_29, %c0_30] : memref<4x16x16xbf16, #tpu.memory_space<vmem>>, vector<1x16x16xbf16>
    %43 = vector.shape_cast %42 : vector<1x16x16xbf16> to vector<16x16xbf16>
    %44 = vector.shape_cast %41 : vector<16x16xbf16> to vector<1x16x16xbf16>
    tpu.vector_store %arg12[%c2_28, %c0_29, %c0_30], %44 {strides = array<i32>} : memref<4x16x16xbf16, #tpu.memory_space<vmem>>, vector<1x16x16xbf16>,
    %45 = vector.extract_strided_slice %8 {offsets = [0, 48], sizes = [16, 16], strides = [1, 1]} : vector<16x192xbf16> to vector<16x16xbf16>
    %c3 = arith.constant 3 : index
    %c0_31 = arith.constant 0 : index
    %c0_32 = arith.constant 0 : index
    %46 = vector.load %arg10[%c3, %c0_31, %c0_32] : memref<4x16x16xbf16, #tpu.memory_space<vmem>>, vector<1x16x16xbf16>
    %47 = vector.shape_cast %46 : vector<1x16x16xbf16> to vector<16x16xbf16>
    %48 = vector.shape_cast %45 : vector<16x16xbf16> to vector<1x16x16xbf16>
    tpu.vector_store %arg10[%c3, %c0_31, %c0_32], %48 {strides = array<i32>} : memref<4x16x16xbf16, #tpu.memory_space<vmem>>, vector<1x16x16xbf16>,
    %49 = vector.extract_strided_slice %8 {offsets = [0, 112], sizes = [16, 16], strides = [1, 1]} : vector<16x192xbf16> to vector<16x16xbf16>
    %c3_33 = arith.constant 3 : index
    %c0_34 = arith.constant 0 : index
    %c0_35 = arith.constant 0 : index
    %50 = vector.load %arg11[%c3_33, %c0_34, %c0_35] : memref<4x16x16xbf16, #tpu.memory_space<vmem>>, vector<1x16x16xbf16>
    %51 = vector.shape_cast %50 : vector<1x16x16xbf16> to vector<16x16xbf16>
    %52 = vector.shape_cast %49 : vector<16x16xbf16> to vector<1x16x16xbf16>
    tpu.vector_store %arg11[%c3_33, %c0_34, %c0_35], %52 {strides = array<i32>} : memref<4x16x16xbf16, #tpu.memory_space<vmem>>, vector<1x16x16xbf16>,
    %53 = vector.extract_strided_slice %8 {offsets = [0, 176], sizes = [16, 16], strides = [1, 1]} : vector<16x192xbf16> to vector<16x16xbf16>
    %c3_36 = arith.constant 3 : index
    %c0_37 = arith.constant 0 : index
    %c0_38 = arith.constant 0 : index
    %54 = vector.load %arg12[%c3_36, %c0_37, %c0_38] : memref<4x16x16xbf16, #tpu.memory_space<vmem>>, vector<1x16x16xbf16>
    %55 = vector.shape_cast %54 : vector<1x16x16xbf16> to vector<16x16xbf16>
    %56 = vector.shape_cast %53 : vector<16x16xbf16> to vector<1x16x16xbf16>
    tpu.vector_store %arg12[%c3_36, %c0_37, %c0_38], %56 {strides = array<i32>} : memref<4x16x16xbf16, #tpu.memory_space<vmem>>, vector<1x16x16xbf16>,
    %c0_39 = arith.constant 0 : index
    %c0_40 = arith.constant 0 : index
    %c0_41 = arith.constant 0 : index
    %57 = vector.load %arg2[%c0_39, %c0_40, %c0_41] : memref<1x1x16xf32, #tpu.memory_space<vmem>>, vector<1x1x16xf32>
    %58 = vector.shape_cast %57 : vector<1x1x16xf32> to vector<1x16xf32>
    %cst_42 = arith.constant 0.000000e+00 : f32
    %59 = vector.broadcast %cst_42 : f32 to vector<16x64xf32>
    %c0_i32 = arith.constant 0 : i32
    %c4_i32 = arith.constant 4 : i32
    %60 = arith.addi %c0_i32, %c4_i32 : i32
    %c1_i32 = arith.constant 1 : i32
    %61 = scf.for %arg13 = %c0_i32 to %60 step %c1_i32 iter_args(%arg14 = %59) -> (vector<16x64xf32>)  : i32 {
      %93 = arith.index_cast %arg13 : i32 to index
      %c0_58 = arith.constant 0 : index
      %c0_59 = arith.constant 0 : index
      %94 = vector.load %arg10[%93, %c0_58, %c0_59] : memref<4x16x16xbf16, #tpu.memory_space<vmem>>, vector<1x16x16xbf16>
      %95 = vector.shape_cast %94 : vector<1x16x16xbf16> to vector<16x16xbf16>
      %96 = arith.index_cast %arg13 : i32 to index
      %c0_60 = arith.constant 0 : index
      %c0_61 = arith.constant 0 : index
      %97 = vector.load %arg11[%96, %c0_60, %c0_61] : memref<4x16x16xbf16, #tpu.memory_space<vmem>>, vector<1x16x16xbf16>
      %98 = vector.shape_cast %97 : vector<1x16x16xbf16> to vector<16x16xbf16>
      %99 = arith.index_cast %arg13 : i32 to index
      %c0_62 = arith.constant 0 : index
      %c0_63 = arith.constant 0 : index
      %100 = vector.load %arg12[%99, %c0_62, %c0_63] : memref<4x16x16xbf16, #tpu.memory_space<vmem>>, vector<1x16x16xbf16>
      %101 = vector.shape_cast %100 : vector<1x16x16xbf16> to vector<16x16xbf16>
      %cst_64 = arith.constant dense<0.000000e+00> : vector<16x16xf32>
      %102 = tpu.matmul %95, %98, %cst_64 {dimension_numbers = #tpu.dot_dimension_numbers<[1], [1], [0], [0], [0, 0, 1, 0], [], []>} : vector<16x16xbf16>, vector<16x16xbf16>, vector<16x16xf32> -> vector<16x16xf32>
      %cst_65 = arith.constant 2.500000e-01 : f32
      %103 = vector.broadcast %cst_65 : f32 to vector<16x16xf32>
      %104 = arith.mulf %102, %103 : vector<16x16xf32>
      %105 = vector.broadcast %58 : vector<1x16xf32> to vector<16x16xf32>
      %106 = arith.addf %104, %105 : vector<16x16xf32>
      %cst_66 = arith.constant dense<0xFF800000> : vector<16xf32>
      %107 = vector.multi_reduction <maximumf>, %106, %cst_66 [1] : vector<16x16xf32> to vector<16xf32>
      %108 = vector.shape_cast %107 : vector<16xf32> to vector<16x1xf32>
      %109 = vector.broadcast %108 : vector<16x1xf32> to vector<16x16xf32>
      %110 = arith.subf %106, %109 : vector<16x16xf32>
      %111 = math.exp %110 : vector<16x16xf32>
      %cst_67 = arith.constant dense<0.000000e+00> : vector<16xf32>
      %112 = vector.multi_reduction <add>, %111, %cst_67 [1] : vector<16x16xf32> to vector<16xf32>
      %113 = vector.shape_cast %112 : vector<16xf32> to vector<16x1xf32>
      %114 = tpu.reciprocal %113 {approx = true} : vector<16x1xf32> -> vector<16x1xf32>
      %115 = vector.broadcast %114 : vector<16x1xf32> to vector<16x16xf32>
      %116 = arith.mulf %111, %115 : vector<16x16xf32>
      %117 = arith.truncf %116 : vector<16x16xf32> to vector<16x16xbf16>
      %cst_68 = arith.constant dense<0.000000e+00> : vector<16x16xf32>
      %118 = tpu.matmul %117, %101, %cst_68 {dimension_numbers = #tpu.dot_dimension_numbers<[1], [0], [0], [1], [0, 0, 1, 1], [], []>} : vector<16x16xbf16>, vector<16x16xbf16>, vector<16x16xf32> -> vector<16x16xf32>
      %c16_i32 = arith.constant 16 : i32
      %119 = arith.muli %arg13, %c16_i32 : i32
      %120 = tpu.assume_multiple %119, 16 : i32
      %121 = arith.index_cast %120 : i32 to index
      %c0_69 = arith.constant 0 : index
      %122 = vector.load %arg5[%121, %c0_69] : memref<64x64xbf16, #tpu.memory_space<vmem>>, vector<16x64xbf16>
      %123 = arith.truncf %118 : vector<16x16xf32> to vector<16x16xbf16>
      %cst_70 = arith.constant dense<0.000000e+00> : vector<16x64xf32>
      %124 = tpu.matmul %123, %122, %cst_70 {dimension_numbers = #tpu.dot_dimension_numbers<[1], [0], [0], [1], [0, 0, 1, 1], [], []>} : vector<16x16xbf16>, vector<16x64xbf16>, vector<16x64xf32> -> vector<16x64xf32>
      %125 = arith.addf %arg14, %124 : vector<16x64xf32>
      scf.yield %125 : vector<16x64xf32>
    }
    %c4_i32_43 = arith.constant 4 : i32
    %c0_44 = arith.constant 0 : index
    %c0_45 = arith.constant 0 : index
    %62 = vector.load %arg6[%c0_44, %c0_45] : memref<1x64xf32, #tpu.memory_space<vmem>>, vector<1x64xf32>
    %63 = vector.broadcast %62 : vector<1x64xf32> to vector<16x64xf32>
    %64 = arith.addf %61, %63 : vector<16x64xf32>
    %65 = arith.addf %1, %64 : vector<16x64xf32>
    %c0_46 = arith.constant 0 : index
    %c0_47 = arith.constant 0 : index
    %66 = vector.load %arg7[%c0_46, %c0_47] : memref<1x64xf32, #tpu.memory_space<vmem>>, vector<1x64xf32>
    %c0_48 = arith.constant 0 : index
    %c0_49 = arith.constant 0 : index
    %67 = vector.load %arg8[%c0_48, %c0_49] : memref<1x64xf32, #tpu.memory_space<vmem>>, vector<1x64xf32>
    %cst_50 = arith.constant dense<0.000000e+00> : vector<16xf32>
    %68 = vector.multi_reduction <add>, %65, %cst_50 [1] : vector<16x64xf32> to vector<16xf32>
    %69 = vector.shape_cast %68 : vector<16xf32> to vector<16x1xf32>
    %cst_51 = arith.constant 6.400000e+01 : f32
    %70 = vector.broadcast %cst_51 : f32 to vector<16x1xf32>
    %71 = arith.divf %69, %70 : vector<16x1xf32>
    %72 = vector.broadcast %71 : vector<16x1xf32> to vector<16x64xf32>
    %73 = arith.subf %65, %72 : vector<16x64xf32>
    %74 = arith.mulf %73, %73 : vector<16x64xf32>
    %cst_52 = arith.constant dense<0.000000e+00> : vector<16xf32>
    %75 = vector.multi_reduction <add>, %74, %cst_52 [1] : vector<16x64xf32> to vector<16xf32>
    %76 = vector.shape_cast %75 : vector<16xf32> to vector<16x1xf32>
    %cst_53 = arith.constant 6.400000e+01 : f32
    %77 = vector.broadcast %cst_53 : f32 to vector<16x1xf32>
    %78 = arith.divf %76, %77 : vector<16x1xf32>
    %79 = vector.broadcast %71 : vector<16x1xf32> to vector<16x64xf32>
    %80 = arith.subf %65, %79 : vector<16x64xf32>
    %cst_54 = arith.constant 9.99999974E-6 : f32
    %81 = vector.broadcast %cst_54 : f32 to vector<16x1xf32>
    %82 = arith.addf %78, %81 : vector<16x1xf32>
    %83 = math.rsqrt %82 : vector<16x1xf32>
    %84 = vector.broadcast %83 : vector<16x1xf32> to vector<16x64xf32>
    %85 = arith.mulf %80, %84 : vector<16x64xf32>
    %86 = vector.broadcast %66 : vector<1x64xf32> to vector<16x64xf32>
    %87 = arith.mulf %85, %86 : vector<16x64xf32>
    %88 = vector.broadcast %67 : vector<1x64xf32> to vector<16x64xf32>
    %89 = arith.addf %87, %88 : vector<16x64xf32>
    %c0_55 = arith.constant 0 : index
    %c0_56 = arith.constant 0 : index
    %c0_57 = arith.constant 0 : index
    %90 = vector.load %arg9[%c0_55, %c0_56, %c0_57] : memref<1x16x64xf32, #tpu.memory_space<vmem>>, vector<1x16x64xf32>
    %91 = vector.shape_cast %90 : vector<1x16x64xf32> to vector<16x64xf32>
    %92 = vector.shape_cast %89 : vector<16x64xf32> to vector<1x16x64xf32>
    tpu.vector_store %arg9[%c0_55, %c0_56, %c0_57], %92 {strides = array<i32>} : memref<1x16x64xf32, #tpu.memory_space<vmem>>, vector<1x16x64xf32>,
    return
  }
  func.func @transform_0(%arg0: i32) -> (i32, i32, i32) {
    %c0_i32 = arith.constant 0 : i32
    %c0_i32_0 = arith.constant 0 : i32
    %c0_i32_1 = arith.constant 0 : i32
    return %arg0, %c0_i32, %c0_i32_0 : i32, i32, i32
  }
  func.func @transform_1(%arg0: i32) -> (i32, i32, i32) {
    %c0_i32 = arith.constant 0 : i32
    %c0_i32_0 = arith.constant 0 : i32
    %c0_i32_1 = arith.constant 0 : i32
    return %arg0, %c0_i32, %c0_i32_0 : i32, i32, i32
  }
  func.func @transform_2(%arg0: i32) -> (i32, i32) {
    %c0_i32 = arith.constant 0 : i32
    %c0_i32_0 = arith.constant 0 : i32
    %c0_i32_1 = arith.constant 0 : i32
    return %c0_i32, %c0_i32_0 : i32, i32
  }
  func.func @transform_3(%arg0: i32) -> (i32, i32) {
    %c0_i32 = arith.constant 0 : i32
    %c0_i32_0 = arith.constant 0 : i32
    %c0_i32_1 = arith.constant 0 : i32
    return %c0_i32, %c0_i32_0 : i32, i32
  }
  func.func @transform_4(%arg0: i32) -> (i32, i32) {
    %c0_i32 = arith.constant 0 : i32
    %c0_i32_0 = arith.constant 0 : i32
    %c0_i32_1 = arith.constant 0 : i32
    return %c0_i32, %c0_i32_0 : i32, i32
  }
  func.func @transform_5(%arg0: i32) -> (i32, i32) {
    %c0_i32 = arith.constant 0 : i32
    %c0_i32_0 = arith.constant 0 : i32
    %c0_i32_1 = arith.constant 0 : i32
    return %c0_i32, %c0_i32_0 : i32, i32
  }
  func.func @transform_6(%arg0: i32) -> (i32, i32) {
    %c0_i32 = arith.constant 0 : i32
    %c0_i32_0 = arith.constant 0 : i32
    %c0_i32_1 = arith.constant 0 : i32
    return %c0_i32, %c0_i32_0 : i32, i32
  }
  func.func @transform_7(%arg0: i32) -> (i32, i32) {
    %c0_i32 = arith.constant 0 : i32
    %c0_i32_0 = arith.constant 0 : i32
    %c0_i32_1 = arith.constant 0 : i32
    return %c0_i32, %c0_i32_0 : i32, i32
  }
  func.func @transform_8(%arg0: i32) -> (i32, i32, i32) {
    %c0_i32 = arith.constant 0 : i32
    %c0_i32_0 = arith.constant 0 : i32
    %c0_i32_1 = arith.constant 0 : i32
    return %arg0, %c0_i32, %c0_i32_0 : i32, i32, i32
  }
}

module attributes {stable_mosaic.version = 11 : i64} {
  func.func @_attn_block_kernel(%arg0: i32, %arg1: memref<1x16x64xf32, #tpu.memory_space<vmem>>, %arg2: memref<1x1x16xf32, #tpu.memory_space<vmem>>, %arg3: memref<64x192xbf16, #tpu.memory_space<vmem>>, %arg4: memref<1x192xf32, #tpu.memory_space<vmem>>, %arg5: memref<64x64xbf16, #tpu.memory_space<vmem>>, %arg6: memref<1x64xf32, #tpu.memory_space<vmem>>, %arg7: memref<1x64xf32, #tpu.memory_space<vmem>>, %arg8: memref<1x64xf32, #tpu.memory_space<vmem>>, %arg9: memref<1x16x64xf32, #tpu.memory_space<vmem>>, %arg10: memref<4x16x16xbf16, #tpu.memory_space<vmem>>, %arg11: memref<4x16x16xbf16, #tpu.memory_space<vmem>>, %arg12: memref<4x16x16xbf16, #tpu.memory_space<vmem>>) attributes {dimension_semantics = [#tpu.dimension_semantics<parallel>], iteration_bounds = array<i64: 2>, scalar_prefetch = 0 : i64, scratch_operands = 3 : i64, tpu.core_type = #tpu.core_type<tc>, window_params = [{transform_indices = @transform_0, window_bounds = array<i64: 1, 16, 64>}, {transform_indices = @transform_1, window_bounds = array<i64: 1, 1, 16>}, {pipeline_mode = #tpu.pipeline_mode<synchronous>, transform_indices = @transform_2, window_bounds = array<i64: 64, 192>}, {pipeline_mode = #tpu.pipeline_mode<synchronous>, transform_indices = @transform_3, window_bounds = array<i64: 1, 192>}, {pipeline_mode = #tpu.pipeline_mode<synchronous>, transform_indices = @transform_4, window_bounds = array<i64: 64, 64>}, {pipeline_mode = #tpu.pipeline_mode<synchronous>, transform_indices = @transform_5, window_bounds = array<i64: 1, 64>}, {pipeline_mode = #tpu.pipeline_mode<synchronous>, transform_indices = @transform_6, window_bounds = array<i64: 1, 64>}, {pipeline_mode = #tpu.pipeline_mode<synchronous>, transform_indices = @transform_7, window_bounds = array<i64: 1, 64>}, {transform_indices = @transform_8, window_bounds = array<i64: 1, 16, 64>}]} {
    %c0 = arith.constant 0 : index
    %c0_0 = arith.constant 0 : index
    %c0_1 = arith.constant 0 : index
    %0 = vector.load %arg1[%c0, %c0_0, %c0_1] : memref<1x16x64xf32, #tpu.memory_space<vmem>>, vector<1x16x64xf32>
    %1 = vector.shape_cast %0 : vector<1x16x64xf32> to vector<16x64xf32>
    %2 = arith.truncf %1 : vector<16x64xf32> to vector<16x64xbf16>
    %c0_2 = arith.constant 0 : index
    %c0_3 = arith.constant 0 : index
    %3 = vector.load %arg3[%c0_2, %c0_3] : memref<64x192xbf16, #tpu.memory_space<vmem>>, vector<64x192xbf16>
    %cst = arith.constant dense<0.000000e+00> : vector<16x192xf32>
    %4 = tpu.matmul %2, %3, %cst {dimension_numbers = #tpu.dot_dimension_numbers<[1], [0], [0], [1], [0, 0, 1, 1], [], []>} : vector<16x64xbf16>, vector<64x192xbf16>, vector<16x192xf32> -> vector<16x192xf32>
    %c0_4 = arith.constant 0 : index
    %c0_5 = arith.constant 0 : index
    %5 = vector.load %arg4[%c0_4, %c0_5] : memref<1x192xf32, #tpu.memory_space<vmem>>, vector<1x192xf32>
    %6 = vector.broadcast %5 : vector<1x192xf32> to vector<16x192xf32>
    %7 = arith.addf %4, %6 : vector<16x192xf32>
    %8 = arith.truncf %7 : vector<16x192xf32> to vector<16x192xbf16>
    %9 = vector.extract_strided_slice %8 {offsets = [0, 0], sizes = [16, 16], strides = [1, 1]} : vector<16x192xbf16> to vector<16x16xbf16>
    %c0_6 = arith.constant 0 : index
    %c0_7 = arith.constant 0 : index
    %c0_8 = arith.constant 0 : index
    %10 = vector.load %arg10[%c0_6, %c0_7, %c0_8] : memref<4x16x16xbf16, #tpu.memory_space<vmem>>, vector<1x16x16xbf16>
    %11 = vector.shape_cast %10 : vector<1x16x16xbf16> to vector<16x16xbf16>
    %12 = vector.shape_cast %9 : vector<16x16xbf16> to vector<1x16x16xbf16>
    tpu.vector_store %arg10[%c0_6, %c0_7, %c0_8], %12 {strides = array<i32>} : memref<4x16x16xbf16, #tpu.memory_space<vmem>>, vector<1x16x16xbf16>,
    %13 = vector.extract_strided_slice %8 {offsets = [0, 64], sizes = [16, 16], strides = [1, 1]} : vector<16x192xbf16> to vector<16x16xbf16>
    %c0_9 = arith.constant 0 : index
    %c0_10 = arith.constant 0 : index
    %c0_11 = arith.constant 0 : index
    %14 = vector.load %arg11[%c0_9, %c0_10, %c0_11] : memref<4x16x16xbf16, #tpu.memory_space<vmem>>, vector<1x16x16xbf16>
    %15 = vector.shape_cast %14 : vector<1x16x16xbf16> to vector<16x16xbf16>
    %16 = vector.shape_cast %13 : vector<16x16xbf16> to vector<1x16x16xbf16>
    tpu.vector_store %arg11[%c0_9, %c0_10, %c0_11], %16 {strides = array<i32>} : memref<4x16x16xbf16, #tpu.memory_space<vmem>>, vector<1x16x16xbf16>,
    %17 = vector.extract_strided_slice %8 {offsets = [0, 128], sizes = [16, 16], strides = [1, 1]} : vector<16x192xbf16> to vector<16x16xbf16>
    %c0_12 = arith.constant 0 : index
    %c0_13 = arith.constant 0 : index
    %c0_14 = arith.constant 0 : index
    %18 = vector.load %arg12[%c0_12, %c0_13, %c0_14] : memref<4x16x16xbf16, #tpu.memory_space<vmem>>, vector<1x16x16xbf16>
    %19 = vector.shape_cast %18 : vector<1x16x16xbf16> to vector<16x16xbf16>
    %20 = vector.shape_cast %17 : vector<16x16xbf16> to vector<1x16x16xbf16>
    tpu.vector_store %arg12[%c0_12, %c0_13, %c0_14], %20 {strides = array<i32>} : memref<4x16x16xbf16, #tpu.memory_space<vmem>>, vector<1x16x16xbf16>,
    %21 = vector.extract_strided_slice %8 {offsets = [0, 16], sizes = [16, 16], strides = [1, 1]} : vector<16x192xbf16> to vector<16x16xbf16>
    %c1 = arith.constant 1 : index
    %c0_15 = arith.constant 0 : index
    %c0_16 = arith.constant 0 : index
    %22 = vector.load %arg10[%c1, %c0_15, %c0_16] : memref<4x16x16xbf16, #tpu.memory_space<vmem>>, vector<1x16x16xbf16>
    %23 = vector.shape_cast %22 : vector<1x16x16xbf16> to vector<16x16xbf16>
    %24 = vector.shape_cast %21 : vector<16x16xbf16> to vector<1x16x16xbf16>
    tpu.vector_store %arg10[%c1, %c0_15, %c0_16], %24 {strides = array<i32>} : memref<4x16x16xbf16, #tpu.memory_space<vmem>>, vector<1x16x16xbf16>,
    %25 = vector.extract_strided_slice %8 {offsets = [0, 80], sizes = [16, 16], strides = [1, 1]} : vector<16x192xbf16> to vector<16x16xbf16>
    %c1_17 = arith.constant 1 : index
    %c0_18 = arith.constant 0 : index
    %c0_19 = arith.constant 0 : index
    %26 = vector.load %arg11[%c1_17, %c0_18, %c0_19] : memref<4x16x16xbf16, #tpu.memory_space<vmem>>, vector<1x16x16xbf16>
    %27 = vector.shape_cast %26 : vector<1x16x16xbf16> to vector<16x16xbf16>
    %28 = vector.shape_cast %25 : vector<16x16xbf16> to vector<1x16x16xbf16>
    tpu.vector_store %arg11[%c1_17, %c0_18, %c0_19], %28 {strides = array<i32>} : memref<4x16x16xbf16, #tpu.memory_space<vmem>>, vector<1x16x16xbf16>,
    %29 = vector.extract_strided_slice %8 {offsets = [0, 144], sizes = [16, 16], strides = [1, 1]} : vector<16x192xbf16> to vector<16x16xbf16>
    %c1_20 = arith.constant 1 : index
    %c0_21 = arith.constant 0 : index
    %c0_22 = arith.constant 0 : index
    %30 = vector.load %arg12[%c1_20, %c0_21, %c0_22] : memref<4x16x16xbf16, #tpu.memory_space<vmem>>, vector<1x16x16xbf16>
    %31 = vector.shape_cast %30 : vector<1x16x16xbf16> to vector<16x16xbf16>
    %32 = vector.shape_cast %29 : vector<16x16xbf16> to vector<1x16x16xbf16>
    tpu.vector_store %arg12[%c1_20, %c0_21, %c0_22], %32 {strides = array<i32>} : memref<4x16x16xbf16, #tpu.memory_space<vmem>>, vector<1x16x16xbf16>,
    %33 = vector.extract_strided_slice %8 {offsets = [0, 32], sizes = [16, 16], strides = [1, 1]} : vector<16x192xbf16> to vector<16x16xbf16>
    %c2 = arith.constant 2 : index
    %c0_23 = arith.constant 0 : index
    %c0_24 = arith.constant 0 : index
    %34 = vector.load %arg10[%c2, %c0_23, %c0_24] : memref<4x16x16xbf16, #tpu.memory_space<vmem>>, vector<1x16x16xbf16>
    %35 = vector.shape_cast %34 : vector<1x16x16xbf16> to vector<16x16xbf16>
    %36 = vector.shape_cast %33 : vector<16x16xbf16> to vector<1x16x16xbf16>
    tpu.vector_store %arg10[%c2, %c0_23, %c0_24], %36 {strides = array<i32>} : memref<4x16x16xbf16, #tpu.memory_space<vmem>>, vector<1x16x16xbf16>,
    %37 = vector.extract_strided_slice %8 {offsets = [0, 96], sizes = [16, 16], strides = [1, 1]} : vector<16x192xbf16> to vector<16x16xbf16>
    %c2_25 = arith.constant 2 : index
    %c0_26 = arith.constant 0 : index
    %c0_27 = arith.constant 0 : index
    %38 = vector.load %arg11[%c2_25, %c0_26, %c0_27] : memref<4x16x16xbf16, #tpu.memory_space<vmem>>, vector<1x16x16xbf16>
    %39 = vector.shape_cast %38 : vector<1x16x16xbf16> to vector<16x16xbf16>
    %40 = vector.shape_cast %37 : vector<16x16xbf16> to vector<1x16x16xbf16>
    tpu.vector_store %arg11[%c2_25, %c0_26, %c0_27], %40 {strides = array<i32>} : memref<4x16x16xbf16, #tpu.memory_space<vmem>>, vector<1x16x16xbf16>,
    %41 = vector.extract_strided_slice %8 {offsets = [0, 160], sizes = [16, 16], strides = [1, 1]} : vector<16x192xbf16> to vector<16x16xbf16>
    %c2_28 = arith.constant 2 : index
    %c0_29 = arith.constant 0 : index
    %c0_30 = arith.constant 0 : index
    %42 = vector.load %arg12[%c2_28, %c0_29, %c0_30] : memref<4x16x16xbf16, #tpu.memory_space<vmem>>, vector<1x16x16xbf16>
    %43 = vector.shape_cast %42 : vector<1x16x16xbf16> to vector<16x16xbf16>
    %44 = vector.shape_cast %41 : vector<16x16xbf16> to vector<1x16x16xbf16>
    tpu.vector_store %arg12[%c2_28, %c0_29, %c0_30], %44 {strides = array<i32>} : memref<4x16x16xbf16, #tpu.memory_space<vmem>>, vector<1x16x16xbf16>,
    %45 = vector.extract_strided_slice %8 {offsets = [0, 48], sizes = [16, 16], strides = [1, 1]} : vector<16x192xbf16> to vector<16x16xbf16>
    %c3 = arith.constant 3 : index
    %c0_31 = arith.constant 0 : index
    %c0_32 = arith.constant 0 : index
    %46 = vector.load %arg10[%c3, %c0_31, %c0_32] : memref<4x16x16xbf16, #tpu.memory_space<vmem>>, vector<1x16x16xbf16>
    %47 = vector.shape_cast %46 : vector<1x16x16xbf16> to vector<16x16xbf16>
    %48 = vector.shape_cast %45 : vector<16x16xbf16> to vector<1x16x16xbf16>
    tpu.vector_store %arg10[%c3, %c0_31, %c0_32], %48 {strides = array<i32>} : memref<4x16x16xbf16, #tpu.memory_space<vmem>>, vector<1x16x16xbf16>,
    %49 = vector.extract_strided_slice %8 {offsets = [0, 112], sizes = [16, 16], strides = [1, 1]} : vector<16x192xbf16> to vector<16x16xbf16>
    %c3_33 = arith.constant 3 : index
    %c0_34 = arith.constant 0 : index
    %c0_35 = arith.constant 0 : index
    %50 = vector.load %arg11[%c3_33, %c0_34, %c0_35] : memref<4x16x16xbf16, #tpu.memory_space<vmem>>, vector<1x16x16xbf16>
    %51 = vector.shape_cast %50 : vector<1x16x16xbf16> to vector<16x16xbf16>
    %52 = vector.shape_cast %49 : vector<16x16xbf16> to vector<1x16x16xbf16>
    tpu.vector_store %arg11[%c3_33, %c0_34, %c0_35], %52 {strides = array<i32>} : memref<4x16x16xbf16, #tpu.memory_space<vmem>>, vector<1x16x16xbf16>,
    %53 = vector.extract_strided_slice %8 {offsets = [0, 176], sizes = [16, 16], strides = [1, 1]} : vector<16x192xbf16> to vector<16x16xbf16>
    %c3_36 = arith.constant 3 : index
    %c0_37 = arith.constant 0 : index
    %c0_38 = arith.constant 0 : index
    %54 = vector.load %arg12[%c3_36, %c0_37, %c0_38] : memref<4x16x16xbf16, #tpu.memory_space<vmem>>, vector<1x16x16xbf16>
    %55 = vector.shape_cast %54 : vector<1x16x16xbf16> to vector<16x16xbf16>
    %56 = vector.shape_cast %53 : vector<16x16xbf16> to vector<1x16x16xbf16>
    tpu.vector_store %arg12[%c3_36, %c0_37, %c0_38], %56 {strides = array<i32>} : memref<4x16x16xbf16, #tpu.memory_space<vmem>>, vector<1x16x16xbf16>,
    %c0_39 = arith.constant 0 : index
    %c0_40 = arith.constant 0 : index
    %c0_41 = arith.constant 0 : index
    %57 = vector.load %arg2[%c0_39, %c0_40, %c0_41] : memref<1x1x16xf32, #tpu.memory_space<vmem>>, vector<1x1x16xf32>
    %58 = vector.shape_cast %57 : vector<1x1x16xf32> to vector<1x16xf32>
    %cst_42 = arith.constant 0.000000e+00 : f32
    %59 = vector.broadcast %cst_42 : f32 to vector<16x64xf32>
    %c0_i32 = arith.constant 0 : i32
    %c4_i32 = arith.constant 4 : i32
    %60 = arith.addi %c0_i32, %c4_i32 : i32
    %c1_i32 = arith.constant 1 : i32
    %61 = scf.for %arg13 = %c0_i32 to %60 step %c1_i32 iter_args(%arg14 = %59) -> (vector<16x64xf32>)  : i32 {
      %93 = arith.index_cast %arg13 : i32 to index
      %c0_58 = arith.constant 0 : index
      %c0_59 = arith.constant 0 : index
      %94 = vector.load %arg10[%93, %c0_58, %c0_59] : memref<4x16x16xbf16, #tpu.memory_space<vmem>>, vector<1x16x16xbf16>
      %95 = vector.shape_cast %94 : vector<1x16x16xbf16> to vector<16x16xbf16>
      %96 = arith.index_cast %arg13 : i32 to index
      %c0_60 = arith.constant 0 : index
      %c0_61 = arith.constant 0 : index
      %97 = vector.load %arg11[%96, %c0_60, %c0_61] : memref<4x16x16xbf16, #tpu.memory_space<vmem>>, vector<1x16x16xbf16>
      %98 = vector.shape_cast %97 : vector<1x16x16xbf16> to vector<16x16xbf16>
      %99 = arith.index_cast %arg13 : i32 to index
      %c0_62 = arith.constant 0 : index
      %c0_63 = arith.constant 0 : index
      %100 = vector.load %arg12[%99, %c0_62, %c0_63] : memref<4x16x16xbf16, #tpu.memory_space<vmem>>, vector<1x16x16xbf16>
      %101 = vector.shape_cast %100 : vector<1x16x16xbf16> to vector<16x16xbf16>
      %cst_64 = arith.constant dense<0.000000e+00> : vector<16x16xf32>
      %102 = tpu.matmul %95, %98, %cst_64 {dimension_numbers = #tpu.dot_dimension_numbers<[1], [1], [0], [0], [0, 0, 1, 0], [], []>} : vector<16x16xbf16>, vector<16x16xbf16>, vector<16x16xf32> -> vector<16x16xf32>
      %cst_65 = arith.constant 2.500000e-01 : f32
      %103 = vector.broadcast %cst_65 : f32 to vector<16x16xf32>
      %104 = arith.mulf %102, %103 : vector<16x16xf32>
      %105 = vector.broadcast %58 : vector<1x16xf32> to vector<16x16xf32>
      %106 = arith.addf %104, %105 : vector<16x16xf32>
      %cst_66 = arith.constant dense<0xFF800000> : vector<16xf32>
      %107 = vector.multi_reduction <maximumf>, %106, %cst_66 [1] : vector<16x16xf32> to vector<16xf32>
      %108 = vector.shape_cast %107 : vector<16xf32> to vector<16x1xf32>
      %109 = vector.broadcast %108 : vector<16x1xf32> to vector<16x16xf32>
      %110 = arith.subf %106, %109 : vector<16x16xf32>
      %111 = math.exp %110 : vector<16x16xf32>
      %cst_67 = arith.constant dense<0.000000e+00> : vector<16xf32>
      %112 = vector.multi_reduction <add>, %111, %cst_67 [1] : vector<16x16xf32> to vector<16xf32>
      %113 = vector.shape_cast %112 : vector<16xf32> to vector<16x1xf32>
      %114 = tpu.reciprocal %113 {approx = true} : vector<16x1xf32> -> vector<16x1xf32>
      %115 = vector.broadcast %114 : vector<16x1xf32> to vector<16x16xf32>
      %116 = arith.mulf %111, %115 : vector<16x16xf32>
      %117 = arith.truncf %116 : vector<16x16xf32> to vector<16x16xbf16>
      %cst_68 = arith.constant dense<0.000000e+00> : vector<16x16xf32>
      %118 = tpu.matmul %117, %101, %cst_68 {dimension_numbers = #tpu.dot_dimension_numbers<[1], [0], [0], [1], [0, 0, 1, 1], [], []>} : vector<16x16xbf16>, vector<16x16xbf16>, vector<16x16xf32> -> vector<16x16xf32>
      %c16_i32 = arith.constant 16 : i32
      %119 = arith.muli %arg13, %c16_i32 : i32
      %120 = tpu.assume_multiple %119, 16 : i32
      %121 = arith.index_cast %120 : i32 to index
      %c0_69 = arith.constant 0 : index
      %122 = vector.load %arg5[%121, %c0_69] : memref<64x64xbf16, #tpu.memory_space<vmem>>, vector<16x64xbf16>
      %123 = arith.truncf %118 : vector<16x16xf32> to vector<16x16xbf16>
      %cst_70 = arith.constant dense<0.000000e+00> : vector<16x64xf32>
      %124 = tpu.matmul %123, %122, %cst_70 {dimension_numbers = #tpu.dot_dimension_numbers<[1], [0], [0], [1], [0, 0, 1, 1], [], []>} : vector<16x16xbf16>, vector<16x64xbf16>, vector<16x64xf32> -> vector<16x64xf32>
      %125 = arith.addf %arg14, %124 : vector<16x64xf32>
      scf.yield %125 : vector<16x64xf32>
    }
    %c4_i32_43 = arith.constant 4 : i32
    %c0_44 = arith.constant 0 : index
    %c0_45 = arith.constant 0 : index
    %62 = vector.load %arg6[%c0_44, %c0_45] : memref<1x64xf32, #tpu.memory_space<vmem>>, vector<1x64xf32>
    %63 = vector.broadcast %62 : vector<1x64xf32> to vector<16x64xf32>
    %64 = arith.addf %61, %63 : vector<16x64xf32>
    %65 = arith.addf %1, %64 : vector<16x64xf32>
    %c0_46 = arith.constant 0 : index
    %c0_47 = arith.constant 0 : index
    %66 = vector.load %arg7[%c0_46, %c0_47] : memref<1x64xf32, #tpu.memory_space<vmem>>, vector<1x64xf32>
    %c0_48 = arith.constant 0 : index
    %c0_49 = arith.constant 0 : index
    %67 = vector.load %arg8[%c0_48, %c0_49] : memref<1x64xf32, #tpu.memory_space<vmem>>, vector<1x64xf32>
    %cst_50 = arith.constant dense<0.000000e+00> : vector<16xf32>
    %68 = vector.multi_reduction <add>, %65, %cst_50 [1] : vector<16x64xf32> to vector<16xf32>
    %69 = vector.shape_cast %68 : vector<16xf32> to vector<16x1xf32>
    %cst_51 = arith.constant 6.400000e+01 : f32
    %70 = vector.broadcast %cst_51 : f32 to vector<16x1xf32>
    %71 = arith.divf %69, %70 : vector<16x1xf32>
    %72 = vector.broadcast %71 : vector<16x1xf32> to vector<16x64xf32>
    %73 = arith.subf %65, %72 : vector<16x64xf32>
    %74 = arith.mulf %73, %73 : vector<16x64xf32>
    %cst_52 = arith.constant dense<0.000000e+00> : vector<16xf32>
    %75 = vector.multi_reduction <add>, %74, %cst_52 [1] : vector<16x64xf32> to vector<16xf32>
    %76 = vector.shape_cast %75 : vector<16xf32> to vector<16x1xf32>
    %cst_53 = arith.constant 6.400000e+01 : f32
    %77 = vector.broadcast %cst_53 : f32 to vector<16x1xf32>
    %78 = arith.divf %76, %77 : vector<16x1xf32>
    %79 = vector.broadcast %71 : vector<16x1xf32> to vector<16x64xf32>
    %80 = arith.subf %65, %79 : vector<16x64xf32>
    %cst_54 = arith.constant 9.99999974E-6 : f32
    %81 = vector.broadcast %cst_54 : f32 to vector<16x1xf32>
    %82 = arith.addf %78, %81 : vector<16x1xf32>
    %83 = math.rsqrt %82 : vector<16x1xf32>
    %84 = vector.broadcast %83 : vector<16x1xf32> to vector<16x64xf32>
    %85 = arith.mulf %80, %84 : vector<16x64xf32>
    %86 = vector.broadcast %66 : vector<1x64xf32> to vector<16x64xf32>
    %87 = arith.mulf %85, %86 : vector<16x64xf32>
    %88 = vector.broadcast %67 : vector<1x64xf32> to vector<16x64xf32>
    %89 = arith.addf %87, %88 : vector<16x64xf32>
    %c0_55 = arith.constant 0 : index
    %c0_56 = arith.constant 0 : index
    %c0_57 = arith.constant 0 : index
    %90 = vector.load %arg9[%c0_55, %c0_56, %c0_57] : memref<1x16x64xf32, #tpu.memory_space<vmem>>, vector<1x16x64xf32>
    %91 = vector.shape_cast %90 : vector<1x16x64xf32> to vector<16x64xf32>
    %92 = vector.shape_cast %89 : vector<16x64xf32> to vector<1x16x64xf32>
    tpu.vector_store %arg9[%c0_55, %c0_56, %c0_57], %92 {strides = array<i32>} : memref<1x16x64xf32, #tpu.memory_space<vmem>>, vector<1x16x64xf32>,
    return
  }
  func.func @transform_0(%arg0: i32) -> (i32, i32, i32) {
    %c0_i32 = arith.constant 0 : i32
    %c0_i32_0 = arith.constant 0 : i32
    %c0_i32_1 = arith.constant 0 : i32
    return %arg0, %c0_i32, %c0_i32_0 : i32, i32, i32
  }
  func.func @transform_1(%arg0: i32) -> (i32, i32, i32) {
    %c0_i32 = arith.constant 0 : i32
    %c0_i32_0 = arith.constant 0 : i32
    %c0_i32_1 = arith.constant 0 : i32
    return %arg0, %c0_i32, %c0_i32_0 : i32, i32, i32
  }
  func.func @transform_2(%arg0: i32) -> (i32, i32) {
    %c0_i32 = arith.constant 0 : i32
    %c0_i32_0 = arith.constant 0 : i32
    %c0_i32_1 = arith.constant 0 : i32
    return %c0_i32, %c0_i32_0 : i32, i32
  }
  func.func @transform_3(%arg0: i32) -> (i32, i32) {
    %c0_i32 = arith.constant 0 : i32
    %c0_i32_0 = arith.constant 0 : i32
    %c0_i32_1 = arith.constant 0 : i32
    return %c0_i32, %c0_i32_0 : i32, i32
  }
  func.func @transform_4(%arg0: i32) -> (i32, i32) {
    %c0_i32 = arith.constant 0 : i32
    %c0_i32_0 = arith.constant 0 : i32
    %c0_i32_1 = arith.constant 0 : i32
    return %c0_i32, %c0_i32_0 : i32, i32
  }
  func.func @transform_5(%arg0: i32) -> (i32, i32) {
    %c0_i32 = arith.constant 0 : i32
    %c0_i32_0 = arith.constant 0 : i32
    %c0_i32_1 = arith.constant 0 : i32
    return %c0_i32, %c0_i32_0 : i32, i32
  }
  func.func @transform_6(%arg0: i32) -> (i32, i32) {
    %c0_i32 = arith.constant 0 : i32
    %c0_i32_0 = arith.constant 0 : i32
    %c0_i32_1 = arith.constant 0 : i32
    return %c0_i32, %c0_i32_0 : i32, i32
  }
  func.func @transform_7(%arg0: i32) -> (i32, i32) {
    %c0_i32 = arith.constant 0 : i32
    %c0_i32_0 = arith.constant 0 : i32
    %c0_i32_1 = arith.constant 0 : i32
    return %c0_i32, %c0_i32_0 : i32, i32
  }
  func.func @transform_8(%arg0: i32) -> (i32, i32, i32) {
    %c0_i32 = arith.constant 0 : i32
    %c0_i32_0 = arith.constant 0 : i32
    %c0_i32_1 = arith.constant 0 : i32
    return %arg0, %c0_i32, %c0_i32_0 : i32, i32, i32
  }
}

module attributes {stable_mosaic.version = 11 : i64} {
  func.func @_ffn_block_kernel(%arg0: i32, %arg1: memref<32x64xf32, #tpu.memory_space<vmem>>, %arg2: memref<64x256xbf16, #tpu.memory_space<vmem>>, %arg3: memref<1x256xf32, #tpu.memory_space<vmem>>, %arg4: memref<256x64xbf16, #tpu.memory_space<vmem>>, %arg5: memref<1x64xf32, #tpu.memory_space<vmem>>, %arg6: memref<1x64xf32, #tpu.memory_space<vmem>>, %arg7: memref<1x64xf32, #tpu.memory_space<vmem>>, %arg8: memref<1x64xf32, #tpu.memory_space<vmem>>, %arg9: memref<1x64xf32, #tpu.memory_space<vmem>>, %arg10: memref<32x64xf32, #tpu.memory_space<vmem>>) attributes {dimension_semantics = [#tpu.dimension_semantics<parallel>], iteration_bounds = array<i64: 1>, scalar_prefetch = 0 : i64, scratch_operands = 0 : i64, tpu.core_type = #tpu.core_type<tc>, window_params = [{transform_indices = @transform_0, window_bounds = array<i64: 32, 64>}, {pipeline_mode = #tpu.pipeline_mode<synchronous>, transform_indices = @transform_1, window_bounds = array<i64: 64, 256>}, {pipeline_mode = #tpu.pipeline_mode<synchronous>, transform_indices = @transform_2, window_bounds = array<i64: 1, 256>}, {pipeline_mode = #tpu.pipeline_mode<synchronous>, transform_indices = @transform_3, window_bounds = array<i64: 256, 64>}, {pipeline_mode = #tpu.pipeline_mode<synchronous>, transform_indices = @transform_4, window_bounds = array<i64: 1, 64>}, {pipeline_mode = #tpu.pipeline_mode<synchronous>, transform_indices = @transform_5, window_bounds = array<i64: 1, 64>}, {pipeline_mode = #tpu.pipeline_mode<synchronous>, transform_indices = @transform_6, window_bounds = array<i64: 1, 64>}, {pipeline_mode = #tpu.pipeline_mode<synchronous>, transform_indices = @transform_7, window_bounds = array<i64: 1, 64>}, {pipeline_mode = #tpu.pipeline_mode<synchronous>, transform_indices = @transform_8, window_bounds = array<i64: 1, 64>}, {transform_indices = @transform_9, window_bounds = array<i64: 32, 64>}]} {
    %c0 = arith.constant 0 : index
    %c0_0 = arith.constant 0 : index
    %0 = vector.load %arg1[%c0, %c0_0] : memref<32x64xf32, #tpu.memory_space<vmem>>, vector<32x64xf32>
    %1 = arith.truncf %0 : vector<32x64xf32> to vector<32x64xbf16>
    %c0_1 = arith.constant 0 : index
    %c0_2 = arith.constant 0 : index
    %2 = vector.load %arg2[%c0_1, %c0_2] : memref<64x256xbf16, #tpu.memory_space<vmem>>, vector<64x256xbf16>
    %cst = arith.constant dense<0.000000e+00> : vector<32x256xf32>
    %3 = tpu.matmul %1, %2, %cst {dimension_numbers = #tpu.dot_dimension_numbers<[1], [0], [0], [1], [0, 0, 1, 1], [], []>} : vector<32x64xbf16>, vector<64x256xbf16>, vector<32x256xf32> -> vector<32x256xf32>
    %c0_3 = arith.constant 0 : index
    %c0_4 = arith.constant 0 : index
    %4 = vector.load %arg3[%c0_3, %c0_4] : memref<1x256xf32, #tpu.memory_space<vmem>>, vector<1x256xf32>
    %5 = vector.broadcast %4 : vector<1x256xf32> to vector<32x256xf32>
    %6 = arith.addf %3, %5 : vector<32x256xf32>
    %cst_5 = arith.constant 5.000000e-01 : f32
    %7 = vector.broadcast %cst_5 : f32 to vector<32x256xf32>
    %8 = arith.mulf %7, %6 : vector<32x256xf32>
    %cst_6 = arith.constant 0.707106769 : f32
    %9 = vector.broadcast %cst_6 : f32 to vector<32x256xf32>
    %10 = arith.mulf %6, %9 : vector<32x256xf32>
    %cst_7 = arith.constant 0.000000e+00 : f32
    %11 = vector.broadcast %cst_7 : f32 to vector<32x256xf32>
    %12 = arith.cmpf oge, %10, %11 : vector<32x256xf32>
    %cst_8 = arith.constant 1.000000e+00 : f32
    %cst_9 = arith.constant -1.000000e+00 : f32
    %13 = vector.broadcast %cst_8 : f32 to vector<32x256xf32>
    %14 = vector.broadcast %cst_9 : f32 to vector<32x256xf32>
    %15 = arith.select %12, %13, %14 : vector<32x256xi1>, vector<32x256xf32>
    %16 = math.absf %10 : vector<32x256xf32>
    %cst_10 = arith.constant 0.327591091 : f32
    %17 = vector.broadcast %cst_10 : f32 to vector<32x256xf32>
    %18 = arith.mulf %17, %16 : vector<32x256xf32>
    %cst_11 = arith.constant 1.000000e+00 : f32
    %19 = vector.broadcast %cst_11 : f32 to vector<32x256xf32>
    %20 = arith.addf %19, %18 : vector<32x256xf32>
    %21 = tpu.reciprocal %20 {approx = true} : vector<32x256xf32> -> vector<32x256xf32>
    %cst_12 = arith.constant 1.06140542 : f32
    %22 = vector.broadcast %cst_12 : f32 to vector<32x256xf32>
    %23 = arith.mulf %22, %21 : vector<32x256xf32>
    %cst_13 = arith.constant -1.45315206 : f32
    %24 = vector.broadcast %cst_13 : f32 to vector<32x256xf32>
    %25 = arith.addf %23, %24 : vector<32x256xf32>
    %26 = arith.mulf %25, %21 : vector<32x256xf32>
    %cst_14 = arith.constant 1.42141378 : f32
    %27 = vector.broadcast %cst_14 : f32 to vector<32x256xf32>
    %28 = arith.addf %26, %27 : vector<32x256xf32>
    %29 = arith.mulf %28, %21 : vector<32x256xf32>
    %cst_15 = arith.constant -0.284496725 : f32
    %30 = vector.broadcast %cst_15 : f32 to vector<32x256xf32>
    %31 = arith.addf %29, %30 : vector<32x256xf32>
    %32 = arith.mulf %31, %21 : vector<32x256xf32>
    %cst_16 = arith.constant 0.254829586 : f32
    %33 = vector.broadcast %cst_16 : f32 to vector<32x256xf32>
    %34 = arith.addf %32, %33 : vector<32x256xf32>
    %35 = arith.mulf %34, %21 : vector<32x256xf32>
    %cst_17 = arith.constant 0.000000e+00 : f32
    %36 = vector.broadcast %cst_17 : f32 to vector<32x256xf32>
    %37 = arith.subf %36, %16 : vector<32x256xf32>
    %38 = arith.mulf %37, %16 : vector<32x256xf32>
    %39 = math.exp %38 : vector<32x256xf32>
    %40 = arith.mulf %35, %39 : vector<32x256xf32>
    %cst_18 = arith.constant 1.000000e+00 : f32
    %41 = vector.broadcast %cst_18 : f32 to vector<32x256xf32>
    %42 = arith.subf %41, %40 : vector<32x256xf32>
    %43 = arith.mulf %15, %42 : vector<32x256xf32>
    %cst_19 = arith.constant 1.000000e+00 : f32
    %44 = vector.broadcast %cst_19 : f32 to vector<32x256xf32>
    %45 = arith.addf %44, %43 : vector<32x256xf32>
    %46 = arith.mulf %8, %45 : vector<32x256xf32>
    %47 = arith.truncf %46 : vector<32x256xf32> to vector<32x256xbf16>
    %c0_20 = arith.constant 0 : index
    %c0_21 = arith.constant 0 : index
    %48 = vector.load %arg4[%c0_20, %c0_21] : memref<256x64xbf16, #tpu.memory_space<vmem>>, vector<256x64xbf16>
    %cst_22 = arith.constant dense<0.000000e+00> : vector<32x64xf32>
    %49 = tpu.matmul %47, %48, %cst_22 {dimension_numbers = #tpu.dot_dimension_numbers<[1], [0], [0], [1], [0, 0, 1, 1], [], []>} : vector<32x256xbf16>, vector<256x64xbf16>, vector<32x64xf32> -> vector<32x64xf32>
    %c0_23 = arith.constant 0 : index
    %c0_24 = arith.constant 0 : index
    %50 = vector.load %arg5[%c0_23, %c0_24] : memref<1x64xf32, #tpu.memory_space<vmem>>, vector<1x64xf32>
    %51 = vector.broadcast %50 : vector<1x64xf32> to vector<32x64xf32>
    %52 = arith.addf %49, %51 : vector<32x64xf32>
    %53 = arith.addf %0, %52 : vector<32x64xf32>
    %c0_25 = arith.constant 0 : index
    %c0_26 = arith.constant 0 : index
    %54 = vector.load %arg6[%c0_25, %c0_26] : memref<1x64xf32, #tpu.memory_space<vmem>>, vector<1x64xf32>
    %c0_27 = arith.constant 0 : index
    %c0_28 = arith.constant 0 : index
    %55 = vector.load %arg7[%c0_27, %c0_28] : memref<1x64xf32, #tpu.memory_space<vmem>>, vector<1x64xf32>
    %cst_29 = arith.constant dense<0.000000e+00> : vector<32xf32>
    %56 = vector.multi_reduction <add>, %53, %cst_29 [1] : vector<32x64xf32> to vector<32xf32>
    %57 = vector.shape_cast %56 : vector<32xf32> to vector<32x1xf32>
    %cst_30 = arith.constant 6.400000e+01 : f32
    %58 = vector.broadcast %cst_30 : f32 to vector<32x1xf32>
    %59 = arith.divf %57, %58 : vector<32x1xf32>
    %60 = vector.broadcast %59 : vector<32x1xf32> to vector<32x64xf32>
    %61 = arith.subf %53, %60 : vector<32x64xf32>
    %62 = arith.mulf %61, %61 : vector<32x64xf32>
    %cst_31 = arith.constant dense<0.000000e+00> : vector<32xf32>
    %63 = vector.multi_reduction <add>, %62, %cst_31 [1] : vector<32x64xf32> to vector<32xf32>
    %64 = vector.shape_cast %63 : vector<32xf32> to vector<32x1xf32>
    %cst_32 = arith.constant 6.400000e+01 : f32
    %65 = vector.broadcast %cst_32 : f32 to vector<32x1xf32>
    %66 = arith.divf %64, %65 : vector<32x1xf32>
    %67 = vector.broadcast %59 : vector<32x1xf32> to vector<32x64xf32>
    %68 = arith.subf %53, %67 : vector<32x64xf32>
    %cst_33 = arith.constant 9.99999974E-6 : f32
    %69 = vector.broadcast %cst_33 : f32 to vector<32x1xf32>
    %70 = arith.addf %66, %69 : vector<32x1xf32>
    %71 = math.rsqrt %70 : vector<32x1xf32>
    %72 = vector.broadcast %71 : vector<32x1xf32> to vector<32x64xf32>
    %73 = arith.mulf %68, %72 : vector<32x64xf32>
    %74 = vector.broadcast %54 : vector<1x64xf32> to vector<32x64xf32>
    %75 = arith.mulf %73, %74 : vector<32x64xf32>
    %76 = vector.broadcast %55 : vector<1x64xf32> to vector<32x64xf32>
    %77 = arith.addf %75, %76 : vector<32x64xf32>
    %c0_34 = arith.constant 0 : index
    %c0_35 = arith.constant 0 : index
    %78 = vector.load %arg8[%c0_34, %c0_35] : memref<1x64xf32, #tpu.memory_space<vmem>>, vector<1x64xf32>
    %c0_36 = arith.constant 0 : index
    %c0_37 = arith.constant 0 : index
    %79 = vector.load %arg9[%c0_36, %c0_37] : memref<1x64xf32, #tpu.memory_space<vmem>>, vector<1x64xf32>
    %cst_38 = arith.constant dense<0.000000e+00> : vector<32xf32>
    %80 = vector.multi_reduction <add>, %77, %cst_38 [1] : vector<32x64xf32> to vector<32xf32>
    %81 = vector.shape_cast %80 : vector<32xf32> to vector<32x1xf32>
    %cst_39 = arith.constant 6.400000e+01 : f32
    %82 = vector.broadcast %cst_39 : f32 to vector<32x1xf32>
    %83 = arith.divf %81, %82 : vector<32x1xf32>
    %84 = vector.broadcast %83 : vector<32x1xf32> to vector<32x64xf32>
    %85 = arith.subf %77, %84 : vector<32x64xf32>
    %86 = arith.mulf %85, %85 : vector<32x64xf32>
    %cst_40 = arith.constant dense<0.000000e+00> : vector<32xf32>
    %87 = vector.multi_reduction <add>, %86, %cst_40 [1] : vector<32x64xf32> to vector<32xf32>
    %88 = vector.shape_cast %87 : vector<32xf32> to vector<32x1xf32>
    %cst_41 = arith.constant 6.400000e+01 : f32
    %89 = vector.broadcast %cst_41 : f32 to vector<32x1xf32>
    %90 = arith.divf %88, %89 : vector<32x1xf32>
    %91 = vector.broadcast %83 : vector<32x1xf32> to vector<32x64xf32>
    %92 = arith.subf %77, %91 : vector<32x64xf32>
    %cst_42 = arith.constant 9.99999974E-6 : f32
    %93 = vector.broadcast %cst_42 : f32 to vector<32x1xf32>
    %94 = arith.addf %90, %93 : vector<32x1xf32>
    %95 = math.rsqrt %94 : vector<32x1xf32>
    %96 = vector.broadcast %95 : vector<32x1xf32> to vector<32x64xf32>
    %97 = arith.mulf %92, %96 : vector<32x64xf32>
    %98 = vector.broadcast %78 : vector<1x64xf32> to vector<32x64xf32>
    %99 = arith.mulf %97, %98 : vector<32x64xf32>
    %100 = vector.broadcast %79 : vector<1x64xf32> to vector<32x64xf32>
    %101 = arith.addf %99, %100 : vector<32x64xf32>
    %c0_43 = arith.constant 0 : index
    %c0_44 = arith.constant 0 : index
    %102 = vector.load %arg10[%c0_43, %c0_44] : memref<32x64xf32, #tpu.memory_space<vmem>>, vector<32x64xf32>
    tpu.vector_store %arg10[%c0_43, %c0_44], %101 {strides = array<i32>} : memref<32x64xf32, #tpu.memory_space<vmem>>, vector<32x64xf32>,
    return
  }
  func.func @transform_0(%arg0: i32) -> (i32, i32) {
    %c0_i32 = arith.constant 0 : i32
    %c0_i32_0 = arith.constant 0 : i32
    return %arg0, %c0_i32 : i32, i32
  }
  func.func @transform_1(%arg0: i32) -> (i32, i32) {
    %c0_i32 = arith.constant 0 : i32
    %c0_i32_0 = arith.constant 0 : i32
    %c0_i32_1 = arith.constant 0 : i32
    return %c0_i32, %c0_i32_0 : i32, i32
  }
  func.func @transform_2(%arg0: i32) -> (i32, i32) {
    %c0_i32 = arith.constant 0 : i32
    %c0_i32_0 = arith.constant 0 : i32
    %c0_i32_1 = arith.constant 0 : i32
    return %c0_i32, %c0_i32_0 : i32, i32
  }
  func.func @transform_3(%arg0: i32) -> (i32, i32) {
    %c0_i32 = arith.constant 0 : i32
    %c0_i32_0 = arith.constant 0 : i32
    %c0_i32_1 = arith.constant 0 : i32
    return %c0_i32, %c0_i32_0 : i32, i32
  }
  func.func @transform_4(%arg0: i32) -> (i32, i32) {
    %c0_i32 = arith.constant 0 : i32
    %c0_i32_0 = arith.constant 0 : i32
    %c0_i32_1 = arith.constant 0 : i32
    return %c0_i32, %c0_i32_0 : i32, i32
  }
  func.func @transform_5(%arg0: i32) -> (i32, i32) {
    %c0_i32 = arith.constant 0 : i32
    %c0_i32_0 = arith.constant 0 : i32
    %c0_i32_1 = arith.constant 0 : i32
    return %c0_i32, %c0_i32_0 : i32, i32
  }
  func.func @transform_6(%arg0: i32) -> (i32, i32) {
    %c0_i32 = arith.constant 0 : i32
    %c0_i32_0 = arith.constant 0 : i32
    %c0_i32_1 = arith.constant 0 : i32
    return %c0_i32, %c0_i32_0 : i32, i32
  }
  func.func @transform_7(%arg0: i32) -> (i32, i32) {
    %c0_i32 = arith.constant 0 : i32
    %c0_i32_0 = arith.constant 0 : i32
    %c0_i32_1 = arith.constant 0 : i32
    return %c0_i32, %c0_i32_0 : i32, i32
  }
  func.func @transform_8(%arg0: i32) -> (i32, i32) {
    %c0_i32 = arith.constant 0 : i32
    %c0_i32_0 = arith.constant 0 : i32
    %c0_i32_1 = arith.constant 0 : i32
    return %c0_i32, %c0_i32_0 : i32, i32
  }
  func.func @transform_9(%arg0: i32) -> (i32, i32) {
    %c0_i32 = arith.constant 0 : i32
    %c0_i32_0 = arith.constant 0 : i32
    return %arg0, %c0_i32 : i32, i32
  }
}

</mosaic_0001>

<bundles_post_ra>
// kernel: tpu_custom_call.1
= control target key start
LH: loop header
LB: loop body
LE: loop exit
PB: predicated region body
PF: predicated region fallthrough
CT: control target
= control target key end

     0   :  { %6 = vsyncpa [#allocation3], 0  ;;  %s305_s0 = inlined_call_operand.hbm [shape: f32[8,128], index: 0, kind: input, shape index: {}]   ;;  %s306_s1 = inlined_call_operand.hbm [shape: f32[8,128], index: 1, kind: output, shape index: {}]  }
   0x1   :  { %7 = vsyncpa [#allocation4], 0  ;;  %s258_s6 = smov 0  }
   0x2 LB: > { %s145_s7 = sadd.s32 4294967295, %s244_s6   ;;  %p146_p0 = scmp.ge.s32.totalorder %s244_s6, 1  ;;  %s244_s6 = sphi %s258_s6, %s13_s6  }
   0x3   : > { %p60_p1 = scmp.lt.s32.totalorder %s244_s6, 3  ;;  %p270_p3 = scmp.eq.s32.totalorder %s145_s7, 0 }
   0x4   : > { %s246_s10 = smov [#allocation2]  }
   0x5   : > { %p266_p2 = pnand %p146_p0, %p60_p1  ;;  %s73_s11 = sshll.u32 %s246_s10, 4  ;;  %s74_s11 = int_to_ptr.vmem [resolvable:$true] %s73_s11 }
   0x6   : > { %s191_s12 = scalar_lea.vmem %s74_s11, 128  ;;  %p199_p10 = scmp.lt.s32.totalorder %s74_s11, %s74_s11 }
   0x7   : > { %p162_p4 = pneg %p266_p2  ;;  %p192_p7 = scmp.ne.s32.totalorder %s74_s11, %s191_s12 }
   0x8   : > { %p200_p11 = scmp.lt.s32.totalorder %s191_s12, %s191_s12 }
   0x9   : > { %p163_p5 = pnand %p270_p3, %p162_p4 }
   0xa   : > { %p201_p12 = por %p200_p11, %p199_p10 }
   0xb   : > { %p182_p6 = pneg %p163_p5 }
   0xd   : > { %p194_p8 = pnand %p192_p7, %p182_p6 }
   0xf   : > { %p195_p9 = pneg %p194_p8 }
  0x11   : > { %p202_p13 = pnand %p201_p12, %p195_p9 }
  0x13   : > { %205 = shalt.err (!%p202_p13)
}
  0x14   : > { %165 = dma.hbm_to_vmem [thread:$0]  (!%p163_p5), %s305_s0, 128, %s74_s11, [#allocation3]  }
  0x15   : > { %86 = sbr.rel (%p266_p2) target bundleno = 42 (0x2a), region = 24 }
  0x1a   : > { %235 = dma.done.wait (%p270_p3), [#allocation3], 128  }
  0x1b   : > { %237 = vsyncadd (%p270_p3), [#allocation3], 4294967168  ;;  %s247_s15 = smov [#allocation5]   ;;  %v96_v0 = vld [vmem:[#allocation2] sm:$0xff]  ;;  %p287_p0 = scmp.eq.s32.totalorder %s145_s7, 1 }
  0x1c   : > { %s106_s16 = sshll.u32 %s247_s15, 4  ;;  %v97_v1 = vadd.f32 1.0, %v96_v0  ;;  %s107_s16 = int_to_ptr.vmem [resolvable:$true] %s106_s16 }
  0x1d   : > { %s206_s18 = scalar_lea.vmem %s107_s16, 128  ;;  %p213_p5 = scmp.lt.s32.totalorder %s107_s16, %s107_s16 }
  0x1e   : > { %98 = vst [vmem:[#allocation5] sm:$0xff] %v97_v1  ;;  %p207_p1 = scmp.ne.s32.totalorder %s107_s16, %s206_s18  ;;  %p214_p6 = scmp.lt.s32.totalorder %s206_s18, %s206_s18 }
  0x20   : > { %p208_p2 = pnand %p207_p1, %p287_p0  ;;  %p215_p7 = por %p214_p6, %p213_p5 }
  0x22   : > { %p209_p4 = pneg %p208_p2 }
  0x24   : > { %p216_p3 = pnand %p215_p7, %p209_p4 }
  0x26   : > { %219 = shalt.err (!%p216_p3)
}
  0x27   : > { %159 = dma.vmem_to_hbm [thread:$0]  (%p287_p0), %s107_s16, 128, %s306_s1, [#allocation4]  }
  0x28   : > { %239 = dma.done.wait (%p287_p0), [#allocation4], 128  }
  0x29   : > { %241 = vsyncadd (%p287_p0), [#allocation4], 4294967168 }
  0x2a PF: > { %s13_s6 = sadd.s32 1, %s244_s6  }
  0x2b   : > { %p10_p8 = scmp.ge.s32.totalorder %s13_s6, 4  }
  0x2d   :  { %12 = sbr.rel (!%p10_p8) target bundleno = 2 (0x2), region = 53 }
  0x32   :  { %119 = vsyncpa [#allocation3], 1 }
  0x33   :  { %121 = vsyncpa [#allocation3 + $0x1], 1 }
  0x34   :  { %122 = vsyncpa [#allocation4], 1 }
  0x35   :  { %124 = vsyncpa [#allocation4 + $0x1], 1 }

// kernel: shallow_hubert_forward.5
= control target key start
LH: loop header
LB: loop body
LE: loop exit
PB: predicated region body
PF: predicated region fallthrough
CT: control target
= control target key end

     0   :  { %v769_v1 = vmov 0   ;;  %vm99_vm0 = vcmask 523264   ;;  %v49_v31 = vlaneseq  ;;  %s1101_s1 = inlined_call_operand.vmem [shape: bf16[64,256], index: 1, kind: input, shape index: {}]   ;;  %s1102_s7 = inlined_call_operand.vmem [shape: f32[1,64], index: 7, kind: input, shape index: {}]   ;;  %s1103_s8 = inlined_call_operand.vmem [shape: f32[1,64], index: 8, kind: input, shape index: {}]   ;;  %s1104_s0 = inlined_call_operand.vmem [shape: f32[32,64], index: 0, kind: input, shape index: {}]   ;;  %s1105_s3 = inlined_call_operand.vmem [shape: bf16[256,64], index: 3, kind: input, shape index: {}]   ;;  %s1106_s2 = inlined_call_operand.vmem [shape: f32[1,256], index: 2, kind: input, shape index: {}]   ;;  %s1107_s4 = inlined_call_operand.vmem [shape: f32[1,64], index: 4, kind: input, shape index: {}]   ;;  %s1108_s5 = inlined_call_operand.vmem [shape: f32[1,64], index: 5, kind: input, shape index: {}]   ;;  %s1109_s6 = inlined_call_operand.vmem [shape: f32[1,64], index: 6, kind: input, shape index: {}]   ;;  %s1110_s9 = inlined_call_operand.vmem [shape: f32[32,64], index: 9, kind: output, shape index: {}]  }
   0x1   :  { %v701_v0 = vld [vmem:[%s1101_s1 + $0x34] ss:$8 sps:$4 sm:$0xff]   ;;  %138 = vmatprep.mubr.bf16.mxu0 %v769_v1  ;;  %v703_v2 = vld [vmem:[%s1101_s1 + $0x30] ss:$8 sps:$4 sm:$0xff]   ;;  %v704_v3 = vld [vmem:[%s1101_s1 + $0x24] ss:$8 sps:$4 sm:$0xff]  }
   0x2   :  { %114 = vmatprep.subr.bf16.mxu0 %v701_v0  ;;  %v706_v4 = vld [vmem:[%s1101_s1 + $0x20] ss:$8 sps:$4 sm:$0xff]   ;;  %v707_v5 = vld [vmem:[%s1101_s1 + $0x14] ss:$8 sps:$4 sm:$0xff]   ;;  %v709_v6 = vld [vmem:[%s1101_s1 + $0x10] ss:$8 sps:$4 sm:$0xff]  }
   0x3   :  { %115 = vmatpush1.bf16.msra.mxu0 %v703_v2  ;;  %v710_v7 = vld [vmem:[%s1101_s1 + $0x4] ss:$8 sps:$4 sm:$0xff]   ;;  %v712_v8 = vld [vmem:[%s1101_s1] ss:$8 sps:$4 sm:$0xff]   ;;  %v861_v12 = vld [vmem:[%s1104_s0 + $0x10] sm:$0xff]  ;;  %v50_v32 = vshrl.u32 %v49_v31, 7 }
   0x4   :  { %116 = vmatprep.subr.bf16.mxu0 %v704_v3  ;;  %v848_v9 = vld [vmem:[%s1104_s0] sm:$0xff]  ;;  %v853_v10 = vld [vmem:[%s1104_s0 + $0x8] sm:$0xff]  ;;  %v866_v13 = vld [vmem:[%s1104_s0 + $0x18] sm:$0xff] }
   0x5   :  { %v37_v11 = vpack.c.bf16 %v853_v10, %v848_v9  ;;  %v38_v14 = vpack.c.bf16 %v866_v13, %v861_v12  ;;  %v713_v15 = vld [vmem:[%s1105_s3 + $0x78] sm:$0xff]   ;;  %v715_v17 = vld [vmem:[%s1105_s3 + $0x70] sm:$0xff]   ;;  %v717_v19 = vld [vmem:[%s1105_s3 + $0x68] sm:$0xff]   ;;  %v51_v33 = vsub.s32 0, %v50_v32  ;;  %v55_v35 = vsub.s32 1, %v50_v32 }
   0x6   :  { %v714_v16 = vld [vmem:[%s1105_s3 + $0x38] sm:$0xff]   ;;  %671 = vmatprep.subr.bf16.mxu1 %v713_v15  ;;  %v716_v18 = vld [vmem:[%s1105_s3 + $0x30] sm:$0xff]   ;;  %v718_v20 = vld [vmem:[%s1105_s3 + $0x28] sm:$0xff]  }
   0x7   :  { %117 = vmatpush1.bf16.msra.mxu0 %v706_v4  ;;  %672 = vmatpush3.bf16.msra.mxu1 %v714_v16  ;;  %v719_v21 = vld [vmem:[%s1105_s3 + $0x60] sm:$0xff]   ;;  %v721_v23 = vld [vmem:[%s1105_s3 + $0x58] sm:$0xff]   ;;  %v723_v25 = vld [vmem:[%s1105_s3 + $0x50] sm:$0xff]  }
   0x8   :  { %118 = vmatprep.subr.bf16.mxu0 %v707_v5  ;;  %673 = vmatprep.subr.bf16.mxu1 %v715_v17  ;;  %v720_v22 = vld [vmem:[%s1105_s3 + $0x20] sm:$0xff]   ;;  %v722_v24 = vld [vmem:[%s1105_s3 + $0x18] sm:$0xff]   ;;  %v724_v26 = vld [vmem:[%s1105_s3 + $0x10] sm:$0xff]  }
   0x9   :  { %v725_v27 = vld [vmem:[%s1105_s3 + $0x48] sm:$0xff]   ;;  %v727_v29 = vld [vmem:[%s1105_s3 + $0x40] sm:$0xff]  }
   0xa   :  { %v726_v28 = vld [vmem:[%s1105_s3 + $0x8] sm:$0xff]   ;;  %v728_v30 = vld [vmem:[%s1105_s3] sm:$0xff]  }
   0xb   :  { %119 = vmatpush1.bf16.msra.mxu0 %v709_v6  ;;  %674 = vmatpush3.bf16.msra.mxu1 %v716_v18  ;;  %v47_v34 = vld [vmem:[%s1106_s2] sm:$0x3] }
   0xc   :  { %120 = vmatprep.subr.bf16.mxu0 %v710_v7  ;;  %675 = vmatprep.subr.bf16.mxu1 %v717_v19  ;;  %v52_v36 = vrot.slane %v47_v34, %v51_v33  ;;  %v56_v37 = vrot.slane %v47_v34, %v55_v35 }
   0xf   :  { %121 = vmatpush1.bf16.msra.mxu0 %v712_v8  ;;  %676 = vmatpush3.bf16.msra.mxu1 %v718_v20 }
  0x10   :  { %677 = vmatprep.subr.bf16.mxu1 %v719_v21 }
  0x12   :  { %650 = vmatmul.mubr.msk.bf16.vlgmr.msra.gmra.mxu0 %vm99_vm0, %v37_v11 }
  0x13   :  { %148 = vmatprep.mubr.bf16.mxu0 %v769_v1  ;;  %678 = vmatpush3.bf16.msra.mxu1 %v720_v22 }
  0x14   :  { %679 = vmatprep.subr.bf16.mxu1 %v721_v23 }
  0x17   :  { %680 = vmatpush3.bf16.msra.mxu1 %v722_v24 }
  0x18   :  { %681 = vmatprep.subr.bf16.mxu1 %v723_v25 }
  0x1a   :  { %651 = vmatmul.mubr.msk.bf16.gmra.mxu0 %vm99_vm0, %v38_v14 }
  0x1b   :  { %682 = vmatpush3.bf16.msra.mxu1 %v724_v26 }
  0x1c   :  { %683 = vmatprep.subr.bf16.mxu1 %v725_v27 }
  0x1f   :  { %684 = vmatpush3.bf16.msra.mxu1 %v726_v28 }
  0x20   :  { %685 = vmatprep.subr.bf16.mxu1 %v727_v29 }
  0x23   :  { %686 = vmatpush3.bf16.msra.mxu1 %v728_v30 }
  0xd2   :  { %v140_v38 = vpop.f32.mrf.mxu0 }
  0xd3   :  { %v922_v39 = vadd.f32 %v140_v38, %v52_v36 }
  0xd4   :  { %v142_v40 = vpop.f32.mrf.mxu0 }
  0xd5   :  { %v925_v41 = vmul.f32 0.70710677, %v922_v39  ;;  %v927_v42 = vadd.f32 %v142_v40, %v56_v37 }
  0xd6   :  { %v144_v43 = vpop.f32.mrf.mxu0 }
  0xd7   :  { %v191_v44 = vand.u32 2147483647, %v925_v41  ;;  %v931_v45 = vmul.f32 0.70710677, %v927_v42  ;;  %v933_v46 = vadd.f32 %v144_v43, %v52_v36  ;;  %vm175_vm1 = vcmp.ge.f32.partialorder %v925_v41, 0.0 }
  0xd8   :  { %v146_v47 = vpop.f32.mrf.mxu0 }
  0xd9   :  { %v199_v48 = vmul.f32 0.3275911, %v191_v44  ;;  %v192_v49 = vand.u32 2147483647, %v931_v45  ;;  %v937_v50 = vmul.f32 0.70710677, %v933_v46  ;;  %v939_v51 = vadd.f32 %v146_v47, %v56_v37 }
  0xda   :  { %v150_v52 = vpop.f32.mrf.mxu0  ;;  %v295_v2 = vsub.f32 0.0, %v191_v44  ;;  %vm176_vm2 = vcmp.ge.f32.partialorder %v931_v45, 0.0 }
  0xdb   :  { %v207_v53 = vadd.f32 1.0, %v199_v48  ;;  %v200_v54 = vmul.f32 0.3275911, %v192_v49  ;;  %v193_v55 = vand.u32 2147483647, %v937_v50  ;;  %v946_v62 = vadd.f32 %v150_v52, %v52_v36 }
  0xdc   :  { %v943_v56 = vmul.f32 0.70710677, %v939_v51  ;;  %v152_v57 = vpop.f32.mrf.mxu0  ;;  %v296_v11 = vsub.f32 0.0, %v192_v49  ;;  %v303_v15 = vmul.f32 %v295_v2, %v191_v44  ;;  %vm177_vm3 = vcmp.ge.f32.partialorder %v937_v50, 0.0 }
  0xdd   :  { %729 = vrcp.f32 %v207_v53  ;;  %v208_v58 = vadd.f32 1.0, %v200_v54  ;;  %v201_v59 = vmul.f32 0.3275911, %v193_v55  ;;  %v948_v0 = vadd.f32 %v152_v57, %v56_v37 }
  0xde   :  { %v154_v60 = vpop.f32.mrf.mxu0  ;;  %v194_v61 = vand.u32 2147483647, %v943_v56  ;;  %v951_v3 = vmul.f32 0.70710677, %v946_v62  ;;  %v297_v16 = vsub.f32 0.0, %v193_v55  ;;  %v304_v22 = vmul.f32 %v296_v11, %v192_v49 }
  0xdf   :  { %731 = vrcp.f32 %v208_v58  ;;  %v209_v63 = vadd.f32 1.0, %v201_v59  ;;  %v954_v6 = vmul.f32 0.70710677, %v948_v0  ;;  %v956_v7 = vadd.f32 %v154_v60, %v52_v36 }
  0xe0   :  { %v202_v1 = vmul.f32 0.3275911, %v194_v61  ;;  %v156_v4 = vpop.f32.mrf.mxu0  ;;  %v195_v8 = vand.u32 2147483647, %v951_v3  ;;  %v311_v26 = vmul.f32 1.442695, %v303_v15  ;;  %v305_v27 = vmul.f32 %v297_v16, %v193_v55 }
  0xe1   :  { %733 = vrcp.f32 %v209_v63  ;;  %v959_v14 = vadd.f32 %v156_v4, %v56_v37  ;;  %v196_v18 = vand.u32 2147483647, %v954_v6  ;;  %v963_v19 = vmul.f32 0.70710677, %v956_v7 }
  0xe2   :  { %v210_v5 = vadd.f32 1.0, %v202_v1  ;;  %v203_v17 = vmul.f32 0.3275911, %v195_v8  ;;  %v298_v30 = vsub.f32 0.0, %v194_v61  ;;  %v299_v32 = vsub.f32 0.0, %v195_v8 }
  0xe3   :  { %v204_v21 = vmul.f32 0.3275911, %v196_v18  ;;  %v197_v23 = vand.u32 2147483647, %v963_v19  ;;  %v967_v24 = vmul.f32 0.70710677, %v959_v14 }
  0xe4   :  { %735 = vrcp.f32 %v210_v5  ;;  %v211_v20 = vadd.f32 1.0, %v203_v17  ;;  %v313_v36 = vmul.f32 1.442695, %v304_v22  ;;  %v315_v38 = vmul.f32 1.442695, %v305_v27 }
  0xe5   :  { %v212_v28 = vadd.f32 1.0, %v204_v21  ;;  %v205_v31 = vmul.f32 0.3275911, %v197_v23  ;;  %v198_v33 = vand.u32 2147483647, %v967_v24  ;;  %v306_v47 = vmul.f32 %v298_v30, %v194_v61 }
  0xe6   :  { %737 = vrcp.f32 %v211_v20  ;;  %v307_v52 = vmul.f32 %v299_v32, %v195_v8  ;;  %v300_v53 = vsub.f32 0.0, %v196_v18  ;;  %v770_v55 = vmov -1.0  }
  0xe7   :  { %739 = vrcp.f32 %v212_v28  ;;  %v213_v37 = vadd.f32 1.0, %v205_v31  ;;  %v206_v40 = vmul.f32 0.3275911, %v198_v33  ;;  %v982_v57 = vsel %vm175_vm1, 1.0, %v770_v55 }
  0xe8   :  { %741 = vpow2.f32 %v311_v26  ;;  %v301_v61 = vsub.f32 0.0, %v197_v23  ;;  %v317_v1 = vmul.f32 1.442695, %v306_v47  ;;  %v319_v8 = vmul.f32 1.442695, %v307_v52 }
  0xe9   :  { %743 = vrcp.f32 %v213_v37  ;;  %v214_v54 = vadd.f32 1.0, %v206_v40  ;;  %v308_v11 = vmul.f32 %v300_v53, %v196_v18  ;;  %v302_v22 = vsub.f32 0.0, %v198_v33 }
  0xea   :  { %v969_v25 = vpop.eup %729  ;;  %745 = vpow2.f32 %v313_v36  ;;  %v309_v21 = vmul.f32 %v301_v61, %v197_v23  ;;  %v994_v26 = vsel %vm176_vm2, 1.0, %v770_v55  ;;  %vm178_vm4 = vcmp.ge.f32.partialorder %v943_v56, 0.0 }
  0xeb   :  { %v223_v29 = vmul.f32 1.0614054, %v969_v25  ;;  %747 = vrcp.f32 %v214_v54  ;;  %v321_v31 = vmul.f32 1.442695, %v308_v11  ;;  %v159_v56 = vmul.f32 0.5, %v922_v39 }
  0xec   :  { %v973_v34 = vpop.eup %731  ;;  %749 = vpow2.f32 %v315_v38  ;;  %v323_v40 = vmul.f32 1.442695, %v309_v21  ;;  %vm179_vm5 = vcmp.ge.f32.partialorder %v951_v3, 0.0  ;;  %vm180_vm6 = vcmp.ge.f32.partialorder %v954_v6, 0.0 }
  0xed   :  { %v231_v35 = vadd.f32 -1.4531521, %v223_v29  ;;  %v224_v48 = vmul.f32 1.0614054, %v973_v34  ;;  %751 = vpow2.f32 %v317_v1  ;;  %vm181_vm7 = vcmp.ge.f32.partialorder %v963_v19, 0.0 }
  0xee   :  { %v976_v43 = vpop.eup %733  ;;  %753 = vpow2.f32 %v319_v8  ;;  %v189_v19 = vsel %vm181_vm7, 1.0, %v770_v55  ;;  %vm182_vm8 = vcmp.ge.f32.partialorder %v967_v24, 0.0  ;;  %v163_v24 = vmul.f32 0.5, %v946_v62 }
  0xef   :  { %v239_v44 = vmul.f32 %v969_v25, %v231_v35  ;;  %v225_v49 = vmul.f32 1.0614054, %v976_v43  ;;  %v232_v58 = vadd.f32 -1.4531521, %v224_v48  ;;  %755 = vpow2.f32 %v321_v31 }
  0xf0   :  { %757 = vpow2.f32 %v323_v40 }
  0xf1   :  { %v247_v41 = vadd.f32 1.4214138, %v239_v44  ;;  %v984_v59 = vpop.eup %735  ;;  %v233_v60 = vadd.f32 -1.4531521, %v225_v49  ;;  %v240_v4 = vmul.f32 %v973_v34, %v232_v58  ;;  %v310_v44 = vmul.f32 %v302_v22, %v198_v33 }
  0xf2   :  { %v226_v2 = vmul.f32 1.0614054, %v984_v59 }
  0xf3   :  { %v255_v63 = vmul.f32 %v969_v25, %v247_v41  ;;  %v241_v5 = vmul.f32 %v976_v43, %v233_v60  ;;  %v248_v17 = vadd.f32 1.4214138, %v240_v4  ;;  %v996_v27 = vpop.eup %737  ;;  %v185_v41 = vsel %vm177_vm3, 1.0, %v770_v55 }
  0xf4   :  { %v234_v16 = vadd.f32 -1.4531521, %v226_v2  ;;  %v227_v23 = vmul.f32 1.0614054, %v996_v27  ;;  %v1004_v36 = vpop.eup %739 }
  0xf5   :  { %v263_v15 = vadd.f32 -0.28449672, %v255_v63  ;;  %v249_v20 = vadd.f32 1.4214138, %v241_v5  ;;  %v256_v18 = vmul.f32 %v973_v34, %v248_v17  ;;  %v742_v47 = vpop.eup %741  ;;  %v228_v49 = vmul.f32 1.0614054, %v1004_v36 }
  0xf6   :  { %v242_v29 = vmul.f32 %v984_v59, %v234_v16  ;;  %v235_v38 = vadd.f32 -1.4531521, %v227_v23  ;;  %v1010_v54 = vpop.eup %743 }
  0xf7   :  { %v271_v28 = vmul.f32 %v969_v25, %v263_v15  ;;  %v257_v30 = vmul.f32 %v976_v43, %v249_v20  ;;  %v264_v35 = vadd.f32 -0.28449672, %v256_v18  ;;  %v229_v61 = vmul.f32 1.0614054, %v1010_v54  ;;  %v746_v1 = vpop.eup %745 }
  0xf8   :  { %v250_v45 = vadd.f32 1.4214138, %v242_v29  ;;  %v243_v60 = vmul.f32 %v996_v27, %v235_v38  ;;  %v1019_v8 = vpop.eup %747  ;;  %v325_v15 = vmul.f32 1.442695, %v310_v44 }
  0xf9   :  { %v279_v32 = vadd.f32 0.2548296, %v271_v28  ;;  %v265_v37 = vadd.f32 -0.28449672, %v257_v30  ;;  %v272_v53 = vmul.f32 %v973_v34, %v264_v35  ;;  %v237_v11 = vadd.f32 -1.4531521, %v229_v61  ;;  %v750_v28 = vpop.eup %749 }
  0xfa   :  { %v258_v52 = vmul.f32 %v984_v59, %v250_v45  ;;  %v251_v4 = vadd.f32 1.4214138, %v243_v60  ;;  %v230_v21 = vmul.f32 1.0614054, %v1019_v8  ;;  %759 = vpow2.f32 %v325_v15  ;;  %v752_v40 = vpop.eup %751 }
  0xfb   :  { %v287_v48 = vmul.f32 %v969_v25, %v279_v32  ;;  %v273_v58 = vmul.f32 %v976_v43, %v265_v37  ;;  %v236_v25 = vadd.f32 -1.4531521, %v228_v49  ;;  %v280_v5 = vadd.f32 0.2548296, %v272_v53  ;;  %v754_v60 = vpop.eup %753 }
  0xfc   :  { %v266_v63 = vadd.f32 -0.28449672, %v258_v52  ;;  %v259_v20 = vmul.f32 %v996_v27, %v251_v4  ;;  %v245_v30 = vmul.f32 %v1010_v54, %v237_v11  ;;  %v238_v45 = vadd.f32 -1.4531521, %v230_v21 }
  0xfd   :  { %v327_v33 = vmul.f32 %v742_v47, %v287_v48  ;;  %v281_v2 = vadd.f32 0.2548296, %v273_v58  ;;  %v244_v50 = vmul.f32 %v1004_v36, %v236_v25  ;;  %v288_v22 = vmul.f32 %v973_v34, %v280_v5 }
  0xfe   :  { %v274_v16 = vmul.f32 %v984_v59, %v266_v63  ;;  %v267_v32 = vadd.f32 -0.28449672, %v259_v20  ;;  %v253_v38 = vadd.f32 1.4214138, %v245_v30  ;;  %v246_v47 = vmul.f32 %v1019_v8, %v238_v45 }
  0xff   :  { %v289_v17 = vmul.f32 %v976_v43, %v281_v2  ;;  %v335_v29 = vsub.f32 1.0, %v327_v33  ;;  %v252_v18 = vadd.f32 1.4214138, %v244_v50  ;;  %v328_v35 = vmul.f32 %v746_v1, %v288_v22 }
 0x100   :  { %v282_v23 = vadd.f32 0.2548296, %v274_v16  ;;  %v275_v34 = vmul.f32 %v996_v27, %v267_v32  ;;  %v261_v53 = vmul.f32 %v1010_v54, %v253_v38  ;;  %v254_v61 = vadd.f32 1.4214138, %v246_v47 }
 0x101   :  { %v329_v31 = vmul.f32 %v750_v28, %v289_v17  ;;  %v260_v37 = vmul.f32 %v1004_v36, %v252_v18  ;;  %v336_v48 = vsub.f32 1.0, %v328_v35  ;;  %v343_v49 = vmul.f32 %v335_v29, %v982_v57 }
 0x102   :  { %v290_v43 = vmul.f32 %v984_v59, %v282_v23  ;;  %v283_v25 = vadd.f32 0.2548296, %v275_v34  ;;  %v160_v59 = vmul.f32 0.5, %v927_v42  ;;  %v269_v2 = vadd.f32 -0.28449672, %v261_v53 }
 0x103   :  { %v337_v44 = vsub.f32 1.0, %v329_v31  ;;  %v268_v52 = vadd.f32 -0.28449672, %v260_v37  ;;  %v344_v63 = vmul.f32 %v336_v48, %v994_v26  ;;  %v262_v57 = vmul.f32 %v1019_v8, %v254_v61 }
 0x104   :  { %v330_v58 = vmul.f32 %v752_v40, %v290_v43  ;;  %v291_v50 = vmul.f32 %v996_v27, %v283_v25  ;;  %v186_v11 = vsel %vm178_vm4, 1.0, %v770_v55  ;;  %v277_v16 = vmul.f32 %v1010_v54, %v269_v2 }
 0x105   :  { %v345_v33 = vmul.f32 %v337_v44, %v185_v41  ;;  %v276_v1 = vmul.f32 %v1004_v36, %v268_v52  ;;  %v756_v41 = vpop.eup %755  ;;  %v352_v17 = vadd.f32 1.0, %v344_v63  ;;  %v351_v42 = vadd.f32 1.0, %v343_v49 }
 0x106   :  { %v338_v4 = vsub.f32 1.0, %v330_v58  ;;  %v161_v20 = vmul.f32 0.5, %v933_v46  ;;  %v162_v21 = vmul.f32 0.5, %v939_v51  ;;  %v270_v22 = vadd.f32 -0.28449672, %v262_v57  ;;  %v758_v28 = vpop.eup %757 }
 0x107   :  { %v353_v5 = vadd.f32 1.0, %v345_v33  ;;  %v284_v15 = vadd.f32 0.2548296, %v276_v1  ;;  %v331_v27 = vmul.f32 %v754_v60, %v291_v50  ;;  %v285_v18 = vadd.f32 0.2548296, %v277_v16  ;;  %v760_v40 = vpop.eup %759 }
 0x108   :  { %v346_v26 = vmul.f32 %v338_v4, %v186_v11  ;;  %v278_v31 = vmul.f32 %v1019_v8, %v270_v22  ;;  %v360_v46 = vmul.f32 %v352_v17, %v160_v59  ;;  %v359_v51 = vmul.f32 %v351_v42, %v159_v56 }
 0x109   :  { %v292_v29 = vmul.f32 %v1004_v36, %v284_v15  ;;  %v361_v23 = vmul.f32 %v353_v5, %v161_v20  ;;  %v293_v45 = vmul.f32 %v1010_v54, %v285_v18  ;;  %v339_v37 = vsub.f32 1.0, %v331_v27 }
 0x10a   :  { %v354_v30 = vadd.f32 1.0, %v346_v26  ;;  %v286_v36 = vadd.f32 0.2548296, %v278_v31  ;;  %v187_v54 = vsel %vm179_vm5, 1.0, %v770_v55  ;;  %v188_v47 = vsel %vm180_vm6, 1.0, %v770_v55 }
 0x10b   :  { %v332_v32 = vmul.f32 %v756_v41, %v292_v29  ;;  %v333_v43 = vmul.f32 %v758_v28, %v293_v45  ;;  %v367_v34 = vpack.c.bf16 %v361_v23, %v359_v51  ;;  %v347_v52 = vmul.f32 %v339_v37, %v187_v54 }
 0x10c   :  { %v362_v35 = vmul.f32 %v354_v30, %v162_v21  ;;  %v294_v44 = vmul.f32 %v1019_v8, %v286_v36  ;;  %v190_v60 = vsel %vm182_vm8, 1.0, %v770_v55  ;;  %v165_v61 = vmul.f32 0.5, %v956_v7  ;;  %v652_v7 = vld [vmem:[%s1107_s4] ss:$0 sm:$0xff] }
 0x10d   :  { %v340_v38 = vsub.f32 1.0, %v332_v32  ;;  %v341_v48 = vsub.f32 1.0, %v333_v43  ;;  %v355_v25 = vadd.f32 1.0, %v347_v52  ;;  %v164_v63 = vmul.f32 0.5, %v948_v0 }
 0x10e   :  { %v368_v39 = vpack.c.bf16 %v362_v35, %v360_v46  ;;  %v334_v49 = vmul.f32 %v760_v40, %v294_v44  ;;  %v166_v59 = vmul.f32 0.5, %v959_v14 }
 0x10f   :  { %v348_v6 = vmul.f32 %v340_v38, %v188_v47  ;;  %v349_v53 = vmul.f32 %v341_v48, %v189_v19  ;;  %v363_v50 = vmul.f32 %v355_v25, %v163_v24 }
 0x110   :  { %538 = vmatprep.mubr.bf16.mxu1 %v368_v39  ;;  %v342_v58 = vsub.f32 1.0, %v334_v49 }
 0x111   :  { %539 = vmatmul.mubr.bf16.vlgmr.msra.gmra.mxu1 %v367_v34  ;;  %v357_v8 = vadd.f32 1.0, %v349_v53  ;;  %v356_v33 = vadd.f32 1.0, %v348_v6 }
 0x112   :  { %v350_v3 = vmul.f32 %v342_v58, %v190_v60 }
 0x113   :  { %v365_v2 = vmul.f32 %v357_v8, %v165_v61  ;;  %v364_v4 = vmul.f32 %v356_v33, %v164_v63 }
 0x114   :  { %v358_v1 = vadd.f32 1.0, %v350_v3 }
 0x115   :  { %v369_v11 = vpack.c.bf16 %v365_v2, %v363_v50 }
 0x116   :  { %v366_v5 = vmul.f32 %v358_v1, %v166_v59  ;;  %v669_v1 = vld [vmem:[%s1108_s5] ss:$0 sm:$0xff] }
 0x118   :  { %v370_v57 = vpack.c.bf16 %v366_v5, %v364_v4  ;;  %v670_v4 = vld [vmem:[%s1109_s6] ss:$0 sm:$0xff] }
 0x11a   :  { %546 = vmatprep.mubr.bf16.mxu1 %v370_v57 }
 0x11b   :  { %547 = vmatmul.mubr.bf16.gmra.mxu1 %v369_v11 }
 0x1d1   :  { %v687_v55 = vpop.f32.mrf.mxu1 }
 0x1d3   :  { %v688_v41 = vpop.f32.mrf.mxu1 }
 0x1d4   :  { %v689_v0 = vadd.f32 %v688_v41, %v687_v55 }
 0x1d5   :  { %v690_v15 = vpop.f32.mrf.mxu1 }
 0x1d6   :  { %v541_v14 = vadd.f32 %v689_v0, %v652_v7 }
 0x1d7   :  { %v691_v16 = vpop.f32.mrf.mxu1 }
 0x1d8   :  { %v692_v26 = vadd.f32 %v691_v16, %v690_v15  ;;  %v555_v62 = vadd.f32 %v541_v14, %v848_v9 }
 0x1da   :  { %v544_v17 = vadd.f32 %v692_v26, %v652_v7  ;;  %v561_v42 = vsel %vm99_vm0, %v555_v62, 0.0 }
 0x1db   :  { %562 = vadd.xlane.f32.xlu0 %v561_v42  ;;  %v693_v21 = vpop.f32.mrf.mxu1 }
 0x1dc   :  { %v556_v20 = vadd.f32 %v544_v17, %v853_v10 }
 0x1dd   :  { %v694_v28 = vpop.f32.mrf.mxu1 }
 0x1de   :  { %v564_v22 = vsel %vm99_vm0, %v556_v20, 0.0  ;;  %v695_v27 = vadd.f32 %v694_v28, %v693_v21 }
 0x1df   :  { %565 = vadd.xlane.f32.xlu0 %v564_v22  ;;  %v696_v29 = vpop.f32.mrf.mxu1 }
 0x1e0   :  { %v549_v18 = vadd.f32 %v695_v27, %v652_v7 }
 0x1e1   :  { %v697_v30 = vpop.f32.mrf.mxu1 }
 0x1e2   :  { %v698_v56 = vadd.f32 %v697_v30, %v696_v29  ;;  %v557_v23 = vadd.f32 %v549_v18, %v861_v12 }
 0x1e4   :  { %v552_v31 = vadd.f32 %v698_v56, %v652_v7  ;;  %v567_v9 = vsel %vm99_vm0, %v557_v23, 0.0 }
 0x1e5   :  { %568 = vadd.xlane.f32.xlu1 %v567_v9 }
 0x1e6   :  { %v558_v32 = vadd.f32 %v552_v31, %v866_v13 }
 0x1e8   :  { %v570_v10 = vsel %vm99_vm0, %v558_v32, 0.0 }
 0x1e9   :  { %571 = vadd.xlane.f32.xlu1 %v570_v10 }
 0x264   :  { %v563_v45 = vpop.xlane.xlu0 %562 }
 0x265   :  { %v574_v46 = vmul.f32 0.015625, %v563_v45 }
 0x267   :  { %v578_v35 = vsub.f32 %v555_v62, %v574_v46 }
 0x268   :  { %v566_v51 = vpop.xlane.xlu0 %565 }
 0x269   :  { %v575_v36 = vmul.f32 0.015625, %v566_v51  ;;  %v582_v37 = vmul.f32 %v578_v35, %v578_v35 }
 0x26b   :  { %v579_v38 = vsub.f32 %v556_v20, %v575_v36  ;;  %v586_v43 = vsel %vm99_vm0, %v582_v37, 0.0 }
 0x26c   :  { %587 = vadd.xlane.f32.xlu0 %v586_v43 }
 0x26d   :  { %v583_v12 = vmul.f32 %v579_v38, %v579_v38 }
 0x26e   :  { %v569_v40 = vpop.xlane.xlu1 %568 }
 0x26f   :  { %v589_v39 = vsel %vm99_vm0, %v583_v12, 0.0  ;;  %v576_v44 = vmul.f32 0.015625, %v569_v40 }
 0x270   :  { %590 = vadd.xlane.f32.xlu1 %v589_v39 }
 0x271   :  { %v580_v13 = vsub.f32 %v557_v23, %v576_v44 }
 0x272   :  { %v572_v34 = vpop.xlane.xlu1 %571 }
 0x273   :  { %v577_v54 = vmul.f32 0.015625, %v572_v34  ;;  %v584_v47 = vmul.f32 %v580_v13, %v580_v13 }
 0x275   :  { %v581_v48 = vsub.f32 %v558_v32, %v577_v54  ;;  %v592_v6 = vsel %vm99_vm0, %v584_v47, 0.0 }
 0x276   :  { %593 = vadd.xlane.f32.xlu0 %v592_v6 }
 0x277   :  { %v585_v19 = vmul.f32 %v581_v48, %v581_v48 }
 0x279   :  { %v595_v49 = vsel %vm99_vm0, %v585_v19, 0.0 }
 0x27a   :  { %596 = vadd.xlane.f32.xlu1 %v595_v49 }
 0x2f5   :  { %v588_v52 = vpop.xlane.xlu0 %587 }
 0x2f6   :  { %v598_v53 = vmul.f32 0.015625, %v588_v52 }
 0x2f8   :  { %v602_v58 = vadd.f32 1e-05, %v598_v53 }
 0x2f9   :  { %v591_v8 = vpop.xlane.xlu1 %590 }
 0x2fa   :  { %761 = vrsqrt.f32 %v602_v58  ;;  %v599_v60 = vmul.f32 0.015625, %v591_v8 }
 0x2fc   :  { %v603_v33 = vadd.f32 1e-05, %v599_v60 }
 0x2fe   :  { %763 = vrsqrt.f32 %v603_v33 }
 0x2ff   :  { %v594_v3 = vpop.xlane.xlu0 %593 }
 0x300   :  { %v600_v25 = vmul.f32 0.015625, %v594_v3 }
 0x302   :  { %v604_v61 = vadd.f32 1e-05, %v600_v25 }
 0x303   :  { %v597_v63 = vpop.xlane.xlu1 %596 }
 0x304   :  { %765 = vrsqrt.f32 %v604_v61  ;;  %v601_v24 = vmul.f32 0.015625, %v597_v63 }
 0x306   :  { %v605_v5 = vadd.f32 1e-05, %v601_v24 }
 0x307   :  { %v762_v59 = vpop.eup %761 }
 0x308   :  { %v610_v2 = vmul.f32 %v762_v59, %v578_v35  ;;  %767 = vrsqrt.f32 %v605_v5 }
 0x30a   :  { %v620_v50 = vmul.f32 %v669_v1, %v610_v2 }
 0x30b   :  { %v764_v57 = vpop.eup %763 }
 0x30c   :  { %v630_v11 = vadd.f32 %v670_v4, %v620_v50  ;;  %v611_v55 = vmul.f32 %v764_v57, %v579_v38 }
 0x30e   :  { %634 = vst.msk [vmem:[%s1110_s9] sm:$0xff] %vm99_vm0, %v630_v11  ;;  %v621_v7 = vmul.f32 %v669_v1, %v611_v55 }
 0x310   :  { %v631_v41 = vadd.f32 %v670_v4, %v621_v7 }
 0x311   :  { %v766_v0 = vpop.eup %765 }
 0x312   :  { %635 = vst.msk [vmem:[%s1110_s9 + $0x8] sm:$0xff] %vm99_vm0, %v631_v41  ;;  %v612_v15 = vmul.f32 %v766_v0, %v580_v13 }
 0x314   :  { %v622_v14 = vmul.f32 %v669_v1, %v612_v15 }
 0x315   :  { %v768_v16 = vpop.eup %767 }
 0x316   :  { %v632_v26 = vadd.f32 %v670_v4, %v622_v14  ;;  %v613_v62 = vmul.f32 %v768_v16, %v581_v48 }
 0x318   :  { %636 = vst.msk [vmem:[%s1110_s9 + $0x10] sm:$0xff] %vm99_vm0, %v632_v26  ;;  %v623_v17 = vmul.f32 %v669_v1, %v613_v62 }
 0x31a   :  { %v633_v42 = vadd.f32 %v670_v4, %v623_v17 }
 0x31c   :  { %637 = vst.msk [vmem:[%s1110_s9 + $0x18] sm:$0xff] %vm99_vm0, %v633_v42 }

// kernel: shallow_hubert_forward.4
= control target key start
LH: loop header
LB: loop body
LE: loop exit
PB: predicated region body
PF: predicated region fallthrough
CT: control target
= control target key end

     0   :  { %13 = vsyncpa [#allocation6], 0  ;;  %s1646_s0 = inlined_call_operand.hbm [shape: f32[2,16,64], index: 0, kind: input, shape index: {}]   ;;  %s1647_s1 = inlined_call_operand.vmem [shape: f32[2,1,16], index: 1, kind: input, shape index: {}]   ;;  %s1648_s2 = inlined_call_operand.hbm [shape: bf16[64,192], index: 2, kind: input, shape index: {}]   ;;  %s1649_s3 = inlined_call_operand.vmem [shape: f32[1,192], index: 3, kind: input, shape index: {}]   ;;  %s1650_s4 = inlined_call_operand.hbm [shape: bf16[64,64], index: 4, kind: input, shape index: {}]   ;;  %s1651_s5 = inlined_call_operand.vmem [shape: f32[1,64], index: 5, kind: input, shape index: {}]   ;;  %s1652_s6 = inlined_call_operand.vmem [shape: f32[1,64], index: 6, kind: input, shape index: {}]   ;;  %s1653_s7 = inlined_call_operand.vmem [shape: f32[1,64], index: 7, kind: input, shape index: {}]   ;;  %s1654_s8 = inlined_call_operand.vmem [shape: f32[2,16,64], index: 8, kind: output, shape index: {}]  }
   0x1   :  { %15 = vsyncpa [#allocation6 + $0x1], 0 }
   0x2   :  { %16 = vsyncpa [#allocation8], 0  ;;  %s1396_s27 = smov 0   ;;  %s1398_s28 = smov 0  }
   0x3   :  { %s1400_s29 = smov 0   ;;  %s1402_s30 = smov 0  }
   0x4 LB: > { %s1415_s9 = sadd.s32 4294967295, %s1320_s30   ;;  %p42_p0 = scmp.ne.s32.totalorder %s1312_s28, %s1308_s27  ;;  %s1320_s30 = sphi %s1402_s30, %s1668_s30   ;;  %s1316_s29 = sphi %s1400_s29, %s1671_s29   ;;  %s1312_s28 = sphi %s1398_s28, %s1670_s28   ;;  %s1308_s27 = sphi %s1396_s27, %s1669_s27  }
   0x5   : > { %p1655_p1 = scmp.eq.s32.totalorder %s1415_s9, 0  ;;  %p986_p2 = scmp.ge.s32.totalorder %s1320_s30, 1 }
   0x6   : > { %p231_p3 = scmp.lt.s32.totalorder %s1320_s30, 3  ;;  %s1334_s12 = smov [#allocation7]  }
   0x7   : > { %p1423_p4 = por %p1655_p1, %p42_p0  ;;  %s243_s13 = sshll.u32 %s1334_s12, 4  ;;  %s244_s13 = int_to_ptr.vmem [resolvable:$true] %s243_s13 }
   0x8   : > { %p1427_p5 = pnand %p986_p2, %p231_p3  ;;  %s1335_s15 = smov [#allocation9]  }
   0x9   : > { %s1658_s10 = scalar_select %p1423_p4, 1, 0 }
   0xa   : > { %s1659_s11 = scalar_select %p1427_p5, 1, 0 }
   0xb   : > { %p1074_p6 = pneg %p1427_p5  ;;  %s259_s16 = sshll.u32 %s1335_s15, 4  ;;  %s260_s16 = int_to_ptr.vmem [resolvable:$true] %s259_s16 }
   0xc   : > { %s1201_s17 = scalar_lea.vmem %s244_s13, 1024  ;;  %p1209_p12 = scmp.lt.s32.totalorder %s244_s13, %s244_s13 }
   0xd   : > { %p1435_p7 = pnand %p1074_p6, %p1655_p1  ;;  %p1202_p9 = scmp.ne.s32.totalorder %s244_s13, %s1201_s17 }
   0xe   : > { %p1210_p13 = scmp.lt.s32.totalorder %s1201_s17, %s1201_s17 }
   0xf   : > { %p1192_p8 = pneg %p1435_p7 }
  0x10   : > { %p1211_p0 = por %p1210_p13, %p1209_p12 }
  0x11   : > { %p1204_p10 = pnand %p1202_p9, %p1192_p8 }
  0x13   : > { %p1205_p11 = pneg %p1204_p10 }
  0x15   : > { %p1212_p2 = pnand %p1211_p0, %p1205_p11 }
  0x17   : > { %1215 = shalt.err (!%p1212_p2)
}
  0x18   : > { %s1336_s18 = smov 128   ;;  %s1337_s19 = smov 8  }
  0x19   : > { %1077 = dma.hbm_to_vmem [thread:$0]  (!%p1435_p7), %s1648_s2, 1024, %s244_s13, [#allocation8], %s1336_s18, %s1336_s18, %s1337_s19  }
  0x1a   : > { %s1227_s22 = scalar_lea.vmem %s260_s16, 512  ;;  %p1235_p10 = scmp.lt.s32.totalorder %s260_s16, %s260_s16 }
  0x1b   : > { %p1228_p3 = scmp.ne.s32.totalorder %s260_s16, %s1227_s22  ;;  %p1236_p11 = scmp.lt.s32.totalorder %s1227_s22, %s1227_s22 }
  0x1d   : > { %p1230_p6 = pnand %p1228_p3, %p1192_p8  ;;  %p1237_p12 = por %p1236_p11, %p1235_p10 }
  0x1f   : > { %p1231_p9 = pneg %p1230_p6 }
  0x21   : > { %p1238_p13 = pnand %p1237_p12, %p1231_p9 }
  0x23   : > { %1241 = shalt.err (!%p1238_p13)
}
  0x24   : > { %s1338_s23 = smov 64   ;;  %s1339_s24 = smov 4  }
  0x25   : > { %1080 = dma.hbm_to_vmem [thread:$0]  (!%p1435_p7), %s1650_s4, 512, %s260_s16, [#allocation8], %s1338_s23, %s1338_s23, %s1339_s24  }
  0x26   : > { %s1461_s27 = sadd.s32 1, %s1320_s30   ;;  %s29_s13 = sadd.s32 1, %s1316_s29 }
  0x27   : > { %s26_s12 = ssub.s32 %s1320_s30, %s1461_s27  ;;  %p36_p0 = scmp.ne.s32.totalorder %s1316_s29, %s1312_s28 }
  0x28   : > { %p27_p8 = scmp.eq.s32.totalorder %s26_s12, 0  ;;  %p37_p2 = scmp.eq.s32.totalorder %s1320_s30, 0 }
  0x29   : > { %p1087_p6 = scmp.lt.s32.totalorder %s1320_s30, 2  ;;  %s282_s17 = sand.u32 1, %s1316_s29  }
  0x2a   : > { %s1470_s15 = scalar_select %p27_p8, %s1316_s29, %s29_s13  }
  0x2b   : > { %p38_p3 = por %p37_p2, %p36_p0  ;;  %s1031_s20 = sshll.u32 %s1320_s30, 8 }
  0x2c   : > { %s990_s21 = sshll.u32 %s282_s17, 4  ;;  %s1478_s25 = scalar_lea.hbm %s1646_s0, %s1031_s20 }
  0x2d   : > { %s286_s16 = scalar_lea.vmem [#allocation5], %s990_s21  ;;  %p1480_p7 = pnand %p1087_p6, %p38_p3 }
  0x2e   : > { %s293_s23 = sshll.u32 %s286_s16, 4  ;;  %s1486_s26 = scalar_lea.sflag [#allocation6], %s282_s17  ;;  %s1484_s23 = int_to_ptr.vmem [resolvable:$true] %s293_s23 }
  0x2f   : > { %s1242_s30 = scalar_lea.hbm %s1478_s25, 256  ;;  %p1244_p10 = pneg %p1480_p7 }
  0x30   : > { %p1243_p9 = scmp.ne.s32.totalorder %s1478_s25, %s1242_s30  ;;  %s1247_s20 = scalar_lea.hbm %s1646_s0, 512 }
  0x31   : > { %p1248_p13 = scmp.lt.s32.totalorder %s1478_s25, %s1646_s0  ;;  %p1249_p8 = scmp.lt.s32.totalorder %s1247_s20, %s1242_s30 }
  0x32   : > { %p1245_p11 = pnand %p1244_p10, %p1243_p9 }
  0x33   : > { %p1250_p0 = por %p1249_p8, %p1248_p13 }
  0x34   : > { %p1246_p12 = pneg %p1245_p11 }
  0x36   : > { %p1251_p2 = pnand %p1250_p0, %p1246_p12 }
  0x38   : > { %1254 = shalt.err (!%p1251_p2)
}
  0x39   : > { %s1255_s17 = scalar_lea.vmem %s1484_s23, 256  ;;  %s1340_s22 = smov [#allocation5]  }
  0x3a   : > { %p1256_p3 = scmp.ne.s32.totalorder %s1484_s23, %s1255_s17  ;;  %s1260_s16 = sshll.u32 %s1340_s22, 4  ;;  %s1261_s16 = int_to_ptr.vmem [resolvable:$false] %s1260_s16 }
  0x3b   : > { %s1262_s12 = scalar_lea.vmem %s1261_s16, 512  ;;  %p1263_p11 = scmp.lt.s32.totalorder %s1484_s23, %s1261_s16 }
  0x3c   : > { %p1258_p6 = pnand %p1256_p3, %p1244_p10  ;;  %p1264_p1 = scmp.lt.s32.totalorder %s1262_s12, %s1255_s17 }
  0x3e   : > { %p1259_p9 = pneg %p1258_p6  ;;  %p1265_p4 = por %p1264_p1, %p1263_p11 }
  0x40   : > { %p1266_p5 = pnand %p1265_p4, %p1259_p9 }
  0x42   : > { %1269 = shalt.err (!%p1266_p5)
}
  0x43   : > { %1084 = dma.hbm_to_vmem [thread:$0]  (!%p1480_p7), %s1478_s25, 256, %s1484_s23, %s1486_s26, %s1336_s18, %s1336_s18, %s1337_s19  }
  0x44   : > { %p1662_p10 = scmp.ne.s32.totalorder %s1659_s11, 0 }
  0x45   : > { %s313_s30 = sand.u32 (!%p1662_p10), 1, %s1312_s28   ;;  %p1663_p1 = scmp.ne.s32.totalorder (!%p1662_p10), %s1658_s10, 0 }
  0x46   : > { %311 = sbr.rel (%p1662_p10) target bundleno = 1682 (0x692), region = 52  ;;  %s1513_s13 = sshll.u32 (!%p1662_p10), %s313_s30, 4 }
  0x47   : > { %s314_s20 = scalar_lea.sflag (!%p1662_p10), [#allocation6], %s313_s30  ;;  %s317_s21 = scalar_lea.vmem (!%p1662_p10), [#allocation5], %s1513_s13 }
  0x4b   : > { %1299 = dma.done.wait (%p1663_p1), %s314_s20, 256  }
  0x4c   : > { %1301 = vsyncadd (%p1663_p1), %s314_s20, 4294967040  ;;  %p1664_p4 = scmp.eq.s32.totalorder %s1415_s9, 0 }
  0x4e   : > { %1303 = dma.done.wait (%p1664_p4), [#allocation8], 1536   ;;  %p1665_p5 = pmov %p1664_p4 }
  0x4f   : > { %p361_p7 = scmp.lt.s32.totalorder %s1415_s9, 1  ;;  %v1341_v0 = vmov 0   ;;  %v1162_v2 = vld [vmem:[#allocation7 + $0x34] ss:$8 sps:$4 sm:$0xff]   ;;  %v1164_v3 = vld [vmem:[#allocation7 + $0x30] ss:$8 sps:$4 sm:$0xff]   ;;  %v383_v13 = vlaneseq }
  0x50   : > { %1305 = vsyncadd (%p1665_p5), [#allocation8], 4294965760  ;;  %469 = vmatprep.mubr.bf16.mxu0 %v1341_v0  ;;  %v1165_v4 = vld [vmem:[#allocation7 + $0x24] ss:$8 sps:$4 sm:$0xff]   ;;  %445 = vmatprep.subr.bf16.mxu0 %v1162_v2  ;;  %v1167_v5 = vld [vmem:[#allocation7 + $0x20] ss:$8 sps:$4 sm:$0xff]  }
  0x51   : > { %s1673_s9 = smov (!%p361_p7, %s1415_s9), 1  ;;  %446 = vmatpush1.bf16.msra.mxu0 %v1164_v3  ;;  %v1168_v6 = vld [vmem:[#allocation7 + $0x14] ss:$8 sps:$4 sm:$0xff]   ;;  %v1170_v7 = vld [vmem:[#allocation7 + $0x10] ss:$8 sps:$4 sm:$0xff]   ;;  %vm433_vm0 = vcmask 523264  }
  0x52   : > { %s363_s19 = scalar_lea.vmem %s1647_s1, %s1673_s9  ;;  %s1032_s25 = sshll.u32 %s1673_s9, 4  ;;  %447 = vmatprep.subr.bf16.mxu0 %v1165_v4  ;;  %v1171_v8 = vld [vmem:[#allocation7 + $0x4] ss:$8 sps:$4 sm:$0xff]   ;;  %v1173_v9 = vld [vmem:[#allocation7] ss:$8 sps:$4 sm:$0xff]   ;;  %v384_v14 = vshrl.u32 %v383_v13, 7 }
  0x53   : > { %s1532_s24 = scalar_lea.vmem %s1654_s8, %s1032_s25  ;;  %v1534_v1 = vld [vmem:[%s363_s19] ss:$0 sm:$0xff]  ;;  %v1538_v11 = vld [vmem:[%s317_s21 + $0x8] sm:$0xff]  ;;  %vm489_vm1 = vcmask 125952   ;;  %s1342_s14 = smov 112   ;;  %v1570_v52 = vmov 0.0  }
  0x54   : > { %v1536_v10 = vld [vmem:[%s317_s21] sm:$0xff]  ;;  %v385_v15 = vsub.s32 0, %v384_v14  ;;  %v389_v17 = vsub.s32 1, %v384_v14  ;;  %s1343_s17 = smov 64   ;;  %s1344_s22 = smov 48   ;;  %v1572_v53 = vmov 0.0  }
  0x55   : > { %448 = vmatpush1.bf16.msra.mxu0 %v1167_v5  ;;  %v372_v12 = vpack.c.bf16 %v1538_v11, %v1536_v10  ;;  %v381_v16 = vld [vmem:[%s1649_s3] sm:$0x3]  ;;  %s1345_s16 = smov 96   ;;  %s1346_s12 = smov 32  }
  0x56   : > { %449 = vmatprep.subr.bf16.mxu0 %v1168_v6  ;;  %v386_v18 = vrot.slane %v381_v16, %v385_v15  ;;  %v390_v19 = vrot.slane %v381_v16, %v389_v17  ;;  %s1347_s30 = smov 80   ;;  %s1348_s13 = smov 16  }
  0x57   : > { %s1574_s20 = smov 0  }
  0x59   : > { %450 = vmatpush1.bf16.msra.mxu0 %v1170_v7 }
  0x5a   : > { %451 = vmatprep.subr.bf16.mxu0 %v1171_v8 }
  0x5d   : > { %452 = vmatpush1.bf16.msra.mxu0 %v1173_v9 }
  0x60   : > { %1007 = vmatmul.mubr.msk.bf16.vlgmr.msra.gmra.mxu0 %vm433_vm0, %v372_v12 }
 0x120   : > { %v471_v20 = vpop.f32.mrf.mxu0 }
 0x121   : > { %v472_v21 = vadd.f32 %v471_v20, %v386_v18 }
 0x122   : > { %v473_v22 = vpop.f32.mrf.mxu0 }
 0x123   : > { %v1033_v23 = vpack.c.bf16 %v472_v21, %v472_v21  ;;  %v474_v24 = vadd.f32 %v473_v22, %v390_v19 }
 0x124   : > { %v475_v25 = vpop.f32.mrf.mxu0 }
 0x125   : > { %490 = vst.msk [vmem:[#allocation2] sm:$0xf] %vm489_vm1, %v1033_v23  ;;  %v1035_v26 = vpack.c.bf16 %v474_v24, %v474_v24  ;;  %v476_v27 = vadd.f32 %v475_v25, %v386_v18  ;;  %509 = vrot.lane.b32.xlu1 %v1033_v23, %s1342_s14  ;;  %492 = vrot.lane.b32.xlu0 %v1033_v23, %s1343_s17 }
 0x126   : > { %v477_v28 = vpop.f32.mrf.mxu0 }
 0x127   : > { %507 = vst.msk [vmem:[#allocation4] sm:$0xf] %vm489_vm1, %v1035_v26  ;;  %v1034_v29 = vpack.c.bf16 %v476_v27, %v476_v27  ;;  %v478_v30 = vadd.f32 %v477_v28, %v390_v19 }
 0x129   : > { %491 = vst.msk [vmem:[#allocation2 + $0x4] sm:$0xf] %vm489_vm1, %v1034_v29  ;;  %v1036_v31 = vpack.c.bf16 %v478_v30, %v478_v30  ;;  %511 = vrot.lane.b32.xlu1 %v1034_v29, %s1342_s14  ;;  %518 = vrot.lane.b32.xlu0 %v1033_v23, %s1344_s22 }
 0x12b   : > { %508 = vst.msk [vmem:[#allocation4 + $0x4] sm:$0xf] %vm489_vm1, %v1036_v31 }
 0x12d   : > { %520 = vrot.lane.b32.xlu1 %v1034_v29, %s1344_s22  ;;  %536 = vrot.lane.b32.xlu0 %v1033_v23, %s1345_s16 }
 0x131   : > { %538 = vrot.lane.b32.xlu1 %v1034_v29, %s1345_s16  ;;  %545 = vrot.lane.b32.xlu0 %v1033_v23, %s1346_s12 }
 0x135   : > { %547 = vrot.lane.b32.xlu1 %v1034_v29, %s1346_s12  ;;  %563 = vrot.lane.b32.xlu0 %v1033_v23, %s1347_s30 }
 0x139   : > { %565 = vrot.lane.b32.xlu1 %v1034_v29, %s1347_s30  ;;  %572 = vrot.lane.b32.xlu0 %v1033_v23, %s1348_s13 }
 0x13d   : > { %574 = vrot.lane.b32.xlu1 %v1034_v29, %s1348_s13  ;;  %527 = vrot.lane.b32.xlu0 %v1035_v26, %s1342_s14 }
 0x141   : > { %529 = vrot.lane.b32.xlu1 %v1036_v31, %s1342_s14  ;;  %554 = vrot.lane.b32.xlu0 %v1035_v26, %s1345_s16 }
 0x145   : > { %556 = vrot.lane.b32.xlu1 %v1036_v31, %s1345_s16  ;;  %494 = vrot.lane.b32.xlu0 %v1034_v29, %s1343_s17 }
 0x149   : > { %583 = vrot.lane.b32.xlu1 %v1036_v31, %s1347_s30  ;;  %581 = vrot.lane.b32.xlu0 %v1035_v26, %s1347_s30 }
 0x197   : > { %v510_v32 = vpop.permute.xlu1 %509  ;;  %v493_v33 = vpop.permute.xlu0 %492 }
 0x198   : > { %516 = vst.msk [vmem:[#allocation2 + $0x8] sm:$0xf] %vm489_vm1, %v510_v32  ;;  %498 = vst.msk [vmem:[#allocation3] sm:$0xf] %vm489_vm1, %v493_v33 }
 0x19b   : > { %v512_v34 = vpop.permute.xlu1 %511  ;;  %v519_v35 = vpop.permute.xlu0 %518 }
 0x19c   : > { %517 = vst.msk [vmem:[#allocation2 + $0xc] sm:$0xf] %vm489_vm1, %v512_v34  ;;  %525 = vst.msk [vmem:[#allocation3 + $0x8] sm:$0xf] %vm489_vm1, %v519_v35 }
 0x19f   : > { %v521_v36 = vpop.permute.xlu1 %520  ;;  %v537_v37 = vpop.permute.xlu0 %536 }
 0x1a0   : > { %526 = vst.msk [vmem:[#allocation3 + $0xc] sm:$0xf] %vm489_vm1, %v521_v36  ;;  %543 = vst.msk [vmem:[#allocation2 + $0x10] sm:$0xf] %vm489_vm1, %v537_v37 }
 0x1a3   : > { %v539_v38 = vpop.permute.xlu1 %538  ;;  %v546_v39 = vpop.permute.xlu0 %545 }
 0x1a4   : > { %544 = vst.msk [vmem:[#allocation2 + $0x14] sm:$0xf] %vm489_vm1, %v539_v38  ;;  %552 = vst.msk [vmem:[#allocation3 + $0x10] sm:$0xf] %vm489_vm1, %v546_v39 }
 0x1a7   : > { %v548_v40 = vpop.permute.xlu1 %547  ;;  %v564_v41 = vpop.permute.xlu0 %563 }
 0x1a8   : > { %553 = vst.msk [vmem:[#allocation3 + $0x14] sm:$0xf] %vm489_vm1, %v548_v40  ;;  %570 = vst.msk [vmem:[#allocation2 + $0x18] sm:$0xf] %vm489_vm1, %v564_v41 }
 0x1ab   : > { %v566_v42 = vpop.permute.xlu1 %565  ;;  %v573_v43 = vpop.permute.xlu0 %572 }
 0x1ac   : > { %571 = vst.msk [vmem:[#allocation2 + $0x1c] sm:$0xf] %vm489_vm1, %v566_v42  ;;  %579 = vst.msk [vmem:[#allocation3 + $0x18] sm:$0xf] %vm489_vm1, %v573_v43 }
 0x1af   : > { %v575_v44 = vpop.permute.xlu1 %574  ;;  %v528_v45 = vpop.permute.xlu0 %527 }
 0x1b0   : > { %580 = vst.msk [vmem:[#allocation3 + $0x1c] sm:$0xf] %vm489_vm1, %v575_v44  ;;  %534 = vst.msk [vmem:[#allocation4 + $0x8] sm:$0xf] %vm489_vm1, %v528_v45 }
 0x1b3   : > { %v530_v46 = vpop.permute.xlu1 %529  ;;  %v555_v47 = vpop.permute.xlu0 %554 }
 0x1b4   : > { %535 = vst.msk [vmem:[#allocation4 + $0xc] sm:$0xf] %vm489_vm1, %v530_v46  ;;  %561 = vst.msk [vmem:[#allocation4 + $0x10] sm:$0xf] %vm489_vm1, %v555_v47 }
 0x1b7   : > { %v557_v48 = vpop.permute.xlu1 %556  ;;  %v495_v49 = vpop.permute.xlu0 %494 }
 0x1b8   : > { %562 = vst.msk [vmem:[#allocation4 + $0x14] sm:$0xf] %vm489_vm1, %v557_v48  ;;  %499 = vst.msk [vmem:[#allocation3 + $0x4] sm:$0xf] %vm489_vm1, %v495_v49 }
 0x1bb   : > { %v584_v50 = vpop.permute.xlu1 %583  ;;  %v582_v51 = vpop.permute.xlu0 %581 }
 0x1bc   : > { %589 = vst.msk [vmem:[#allocation4 + $0x1c] sm:$0xf] %vm489_vm1, %v584_v50  ;;  %588 = vst.msk [vmem:[#allocation4 + $0x18] sm:$0xf] %vm489_vm1, %v582_v51 }
 0x1bd LB: >> { %v1349_v54 = vmov 0.0   ;;  %vm1350_vm2 = vmmov 0   ;;  %s1587_s21 = sshll.u32 %s1332_s20, 3  ;;  %vm622_vm3 = vcmask 130048   ;;  %s1022_s25 = sshll.u32 %s1332_s20, 4  ;;  %s1332_s20 = sphi %s1574_s20, %s596_s20   ;;  %v1328_v53 = vphi %v1572_v53, %v1667_v53   ;;  %v1324_v52 = vphi %v1570_v52, %v1666_v52  }
 0x1be   : >> { %1046 = vmatprep.subr.bf16.mxu0 %v1349_v54  ;;  %1048 = vmatprep.mubr.msk.bf16.mxu0 %vm1350_vm2, %v1349_v54  ;;  %s605_s11 = scalar_lea.vmem [#allocation3], %s1587_s21  ;;  %s601_s18 = scalar_lea.vmem [#allocation2], %s1587_s21 }
 0x1bf   : >> { %1052 = vmatprep.subr.bf16.mxu1 %v1349_v54  ;;  %1054 = vmatprep.mubr.msk.bf16.mxu1 %vm1350_vm2, %v1349_v54  ;;  %v1174_v55 = vld [vmem:[%s605_s11] sm:$0xff]   ;;  %s609_s19 = scalar_lea.vmem [#allocation4], %s1587_s21  ;;  %s754_s23 = sshra.s32 %s1022_s25, 3 }
 0x1c0   : >> { %v627_v56 = vsel %vm622_vm3, %v1174_v55, 0  ;;  %v1175_v57 = vld [vmem:[%s601_s18] sm:$0xff]   ;;  %s1023_s10 = sshll.u32 %s754_s23, 2  ;;  %s596_s20 = sadd.s32 1, %s1332_s20  }
 0x1c1   : >> { %1047 = vmatpush3.bf16.xpose.msra.mxu0 %v627_v56  ;;  %s757_s9 = scalar_lea.vmem [#allocation9], %s1023_s10  ;;  %p593_p12 = scmp.ge.s32.totalorder %s596_s20, 4  }
 0x1c2   : >> { %v1177_v24 = vld [vmem:[%s757_s9] sm:$0xff]  }
 0x1c3   : >> { %v1176_v17 = vld [vmem:[%s609_s19] sm:$0xff]  }
 0x1c4   : >> { %1053 = vmatpush3.bf16.msra.mxu1 %v1176_v17  ;;  %v1026_v37 = vld [vmem:[%s1651_s5] ss:$0 sm:$0xff] (%p593_p12) }
 0x1c5   : >> { %1058 = vmatprep.subr.bf16.mxu1 %v1349_v54 }
 0x1c8   : >> { %1049 = vmatmul.mubr.msk.bf16.vlgmr.msra.gmra.mxu0 %vm622_vm3, %v1175_v57 }
 0x288   : >> { %v663_v58 = vpop.f32.mrf.mxu0 }
 0x289   : >> { %v670_v59 = vmul.f32 0.25, %v663_v58  ;;  %v1027_v58 = vld [vmem:[%s1652_s6] ss:$0 sm:$0xff] (%p593_p12) }
 0x28a   : >> { %v1050_v60 = vpop.f32.mrf.mxu0 }
 0x28b   : >> { %v678_v61 = vadd.f32 %v1534_v1, %v670_v59  ;;  %v1028_v60 = vld [vmem:[%s1653_s7] ss:$0 sm:$0xff] (%p593_p12) }
 0x28c   : >> { %v666_v62 = vpop.f32.mrf.mxu0 }
 0x28d   : >> { %v671_v63 = vmul.f32 0.25, %v666_v62  ;;  %v680_v0 = vsel %vm622_vm3, %v678_v61, -inf }
 0x28e   : >> { %681 = vmax.xlane.f32.xlu0 %v680_v0  ;;  %v1051_v2 = vpop.f32.mrf.mxu0 }
 0x28f   : >> { %v679_v3 = vadd.f32 %v1534_v1, %v671_v63 }
 0x291   : >> { %v683_v4 = vsel %vm622_vm3, %v679_v3, -inf }
 0x292   : >> { %684 = vmax.xlane.f32.xlu0 %v683_v4 }
 0x317   : >> { %v682_v5 = vpop.xlane.xlu0 %681 }
 0x318   : >> { %v686_v6 = vsub.f32 %v678_v61, %v682_v5 }
 0x31a   : >> { %v688_v7 = vmul.f32 1.442695, %v686_v6 }
 0x31b   : >> { %v685_v8 = vpop.xlane.xlu0 %684 }
 0x31c   : >> { %1178 = vpow2.f32 %v688_v7  ;;  %v687_v9 = vsub.f32 %v679_v3, %v685_v8 }
 0x31e   : >> { %v690_v12 = vmul.f32 1.442695, %v687_v9 }
 0x320   : >> { %1180 = vpow2.f32 %v690_v12 }
 0x329   : >> { %v1179_v13 = vpop.eup %1178 }
 0x32a   : >> { %v692_v14 = vsel %vm622_vm3, %v1179_v13, 0.0 }
 0x32b   : >> { %693 = vadd.xlane.f32.xlu1 %v692_v14 }
 0x32d   : >> { %v1181_v15 = vpop.eup %1180 }
 0x32e   : >> { %v695_v16 = vsel %vm622_vm3, %v1181_v15, 0.0 }
 0x32f   : >> { %696 = vadd.xlane.f32.xlu1 %v695_v16 }
 0x3b4   : >> { %v694_v18 = vpop.xlane.xlu1 %693 }
 0x3b5   : >> { %1182 = vrcp.f32 %v694_v18 }
 0x3b8   : >> { %v697_v19 = vpop.xlane.xlu1 %696 }
 0x3b9   : >> { %1184 = vrcp.f32 %v697_v19 }
 0x3c2   : >> { %v1183_v20 = vpop.eup %1182 }
 0x3c3   : >> { %v700_v22 = vmul.f32 %v1183_v20, %v1179_v13 }
 0x3c6   : >> { %v1185_v21 = vpop.eup %1184 }
 0x3c7   : >> { %v701_v23 = vmul.f32 %v1185_v21, %v1181_v15 }
 0x3c9   : >> { %v702_v25 = vpack.c.bf16 %v701_v23, %v700_v22 }
 0x3cb   : >> { %1055 = vmatmul.mubr.msk.bf16.vlgmr.msra.gmra.mxu1 %vm622_vm3, %v702_v25 }
 0x3cc   : >> { %1059 = vmatpush3.bf16.msra.mxu1 %v1177_v24  ;;  %1060 = vmatprep.mubr.msk.bf16.mxu1 %vm1350_vm2, %v1349_v54 }
 0x48b   : >> { %v746_v26 = vpop.f32.mrf.mxu1 }
 0x48d   : >> { %v1056_v27 = vpop.f32.mrf.mxu1 }
 0x48f   : >> { %v749_v28 = vpop.f32.mrf.mxu1 }
 0x490   : >> { %v760_v29 = vpack.c.bf16 %v749_v28, %v746_v26 }
 0x491   : >> { %v1057_v30 = vpop.f32.mrf.mxu1 }
 0x492   : >> { %1061 = vmatmul.mubr.msk.bf16.vlgmr.msra.gmra.mxu1 %vm622_vm3, %v760_v29 }
 0x552   : >> { %v804_v31 = vpop.f32.mrf.mxu1 }
 0x553   : >> { %v811_v32 = vadd.f32 %v1328_v53, %v804_v31  }
 0x554   : >> { %v1062_v33 = vpop.f32.mrf.mxu1 }
 0x555   : >> { %v1667_v53 = vmov %v811_v32  ;;  %595 = sbr.rel (!%p593_p12) target bundleno = 445 (0x1bd), region = 123  ;;  %v820_v38 = vadd.f32 (%p593_p12), %v1026_v37, %v811_v32 }
 0x556   : >> { %v807_v34 = vpop.f32.mrf.mxu1 }
 0x557   : >> { %v812_v35 = vadd.f32 %v1324_v52, %v807_v34   ;;  %v822_v40 = vadd.f32 (%p593_p12), %v820_v38, %v1536_v10 }
 0x558   : >> { %v1063_v36 = vpop.f32.mrf.mxu1 }
 0x559   : >> { %v1666_v52 = vmov %v812_v35  ;;  %v821_v39 = vadd.f32 (%p593_p12), %v1026_v37, %v812_v35  ;;  %v826_v42 = vsel (%p593_p12), %vm433_vm0, %v822_v40, 0.0 }
 0x55a   : > { %827 = vadd.xlane.f32.xlu0 %v826_v42 }
 0x55b   : > { %v823_v41 = vadd.f32 %v821_v39, %v1538_v11 }
 0x55d   : > { %v829_v43 = vsel %vm433_vm0, %v823_v41, 0.0 }
 0x55e   : > { %830 = vadd.xlane.f32.xlu0 %v829_v43 }
 0x5e3   : > { %v828_v44 = vpop.xlane.xlu0 %827 }
 0x5e4   : > { %v833_v45 = vmul.f32 0.015625, %v828_v44 }
 0x5e6   : > { %v835_v46 = vsub.f32 %v822_v40, %v833_v45 }
 0x5e7   : > { %v831_v47 = vpop.xlane.xlu0 %830 }
 0x5e8   : > { %v834_v1 = vmul.f32 0.015625, %v831_v47  ;;  %v837_v48 = vmul.f32 %v835_v46, %v835_v46 }
 0x5ea   : > { %v836_v49 = vsub.f32 %v823_v41, %v834_v1  ;;  %v839_v50 = vsel %vm433_vm0, %v837_v48, 0.0 }
 0x5eb   : > { %840 = vadd.xlane.f32.xlu1 %v839_v50 }
 0x5ec   : > { %v838_v51 = vmul.f32 %v836_v49, %v836_v49 }
 0x5ee   : > { %v842_v10 = vsel %vm433_vm0, %v838_v51, 0.0 }
 0x5ef   : > { %843 = vadd.xlane.f32.xlu1 %v842_v10 }
 0x674   : > { %v841_v11 = vpop.xlane.xlu1 %840 }
 0x675   : > { %v845_v52 = vmul.f32 0.015625, %v841_v11 }
 0x677   : > { %v847_v53 = vadd.f32 1e-05, %v845_v52 }
 0x678   : > { %v844_v54 = vpop.xlane.xlu1 %843 }
 0x679   : > { %1186 = vrsqrt.f32 %v847_v53  ;;  %v846_v55 = vmul.f32 0.015625, %v844_v54 }
 0x67b   : > { %v848_v56 = vadd.f32 1e-05, %v846_v55 }
 0x67d   : > { %1188 = vrsqrt.f32 %v848_v56 }
 0x686   : > { %v1187_v57 = vpop.eup %1186 }
 0x687   : > { %v851_v59 = vmul.f32 %v1187_v57, %v835_v46 }
 0x689   : > { %v859_v61 = vmul.f32 %v1027_v58, %v851_v59 }
 0x68a   : > { %v1189_v62 = vpop.eup %1188 }
 0x68b   : > { %v867_v63 = vadd.f32 %v1028_v60, %v859_v61  ;;  %v852_v0 = vmul.f32 %v1189_v62, %v836_v49 }
 0x68d   : > { %869 = vst.msk [vmem:[%s1532_s24] sm:$0xff] %vm433_vm0, %v867_v63  ;;  %v860_v2 = vmul.f32 %v1027_v58, %v852_v0 }
 0x68f   : > { %v868_v3 = vadd.f32 %v1028_v60, %v860_v2 }
 0x691   : > { %870 = vst.msk [vmem:[%s1532_s24 + $0x8] sm:$0xff] %vm433_vm0, %v868_v3 }
 0x692 PF: > { %s1668_s30 = smov %s1461_s27  ;;  %p19_p13 = scmp.ge.s32.totalorder %s1461_s27, 4  }
 0x693   : > { %s1669_s27 = smov %s1312_s28  ;;  %s1670_s28 = smov %s1316_s29 }
 0x694   : > { %s1671_s29 = smov %s1470_s15  ;;  %21 = sbr.rel (!%p19_p13) target bundleno = 4 (0x4), region = 134 }
 0x699   :  { %892 = vsyncpa [#allocation6], 1 }
 0x69a   :  { %894 = vsyncpa [#allocation6 + $0x1], 1 }
 0x69b   :  { %895 = vsyncpa [#allocation8], 1 }

// kernel: shallow_hubert_forward.6
= control target key start
LH: loop header
LB: loop body
LE: loop exit
PB: predicated region body
PF: predicated region fallthrough
CT: control target
= control target key end

     0   :  { %s1136_s27 = smov 0   ;;  %s1284_s0 = inlined_call_operand.vmem [shape: f32[2,16,64], index: 0, kind: input, shape index: {}]   ;;  %s1285_s1 = inlined_call_operand.vmem [shape: f32[2,1,16], index: 1, kind: input, shape index: {}]   ;;  %s1286_s2 = inlined_call_operand.vmem [shape: bf16[64,192], index: 2, kind: input, shape index: {}]   ;;  %s1287_s3 = inlined_call_operand.vmem [shape: f32[1,192], index: 3, kind: input, shape index: {}]   ;;  %s1288_s4 = inlined_call_operand.vmem [shape: bf16[64,64], index: 4, kind: input, shape index: {}]   ;;  %s1289_s5 = inlined_call_operand.vmem [shape: f32[1,64], index: 5, kind: input, shape index: {}]   ;;  %s1290_s6 = inlined_call_operand.vmem [shape: f32[1,64], index: 6, kind: input, shape index: {}]   ;;  %s1291_s7 = inlined_call_operand.vmem [shape: f32[1,64], index: 7, kind: input, shape index: {}]   ;;  %s1292_s8 = inlined_call_operand.vmem [shape: f32[2,16,64], index: 8, kind: output, shape index: {}]  }
   0x1 LB: > { %s905_s28 = sadd.s32 4294967295, %s1067_s27   ;;  %p909_p0 = scmp.ge.s32.totalorder %s1067_s27, 1  ;;  %s1067_s27 = sphi %s1136_s27, %s18_s27  }
   0x2   : > { %p270_p1 = scmp.lt.s32.totalorder %s1067_s27, 3 }
   0x4   : > { %p271_p2 = pnand %p909_p0, %p270_p1 }
   0x5   : > { %p307_p3 = scmp.lt.s32.totalorder (!%p271_p2), %s905_s28, 1  ;;  %s1082_s14 = smov (!%p271_p2), 112  }
   0x6   : > { %274 = sbr.rel (%p271_p2) target bundleno = 1614 (0x64e), region = 52  ;;  %s1083_s15 = smov (!%p271_p2), 64  }
   0x7   : > { %s1084_s16 = smov (!%p271_p2), 48   ;;  %s1086_s18 = smov (!%p271_p2), 32  }
   0x8   : > { %s1087_s19 = smov (!%p271_p2), 80   ;;  %s1219_s21 = smov (!%p271_p2), 0  }
   0xb   : > { %v1021_v0 = vld [vmem:[%s1286_s2 + $0x34] ss:$8 sps:$4 sm:$0xff]   ;;  %v1023_v1 = vld [vmem:[%s1286_s2 + $0x30] ss:$8 sps:$4 sm:$0xff]   ;;  %v1081_v2 = vmov 0   ;;  %s1296_s28 = smov (!%p307_p3, %s905_s28), 1  ;;  %v334_v13 = vlaneseq }
   0xc   : > { %420 = vmatprep.mubr.bf16.mxu0 %v1081_v2  ;;  %396 = vmatprep.subr.bf16.mxu0 %v1021_v0  ;;  %v1024_v3 = vld [vmem:[%s1286_s2 + $0x24] ss:$8 sps:$4 sm:$0xff]   ;;  %v1026_v4 = vld [vmem:[%s1286_s2 + $0x20] ss:$8 sps:$4 sm:$0xff]   ;;  %v1027_v5 = vld [vmem:[%s1286_s2 + $0x14] ss:$8 sps:$4 sm:$0xff]   ;;  %s314_s20 = scalar_lea.vmem %s1285_s1, %s1296_s28 }
   0xd   : > { %397 = vmatpush1.bf16.msra.mxu0 %v1023_v1  ;;  %s946_s17 = sshll.u32 %s1296_s28, 4  ;;  %v1167_v6 = vld [vmem:[%s314_s20] ss:$0 sm:$0xff]  ;;  %v1029_v7 = vld [vmem:[%s1286_s2 + $0x10] ss:$8 sps:$4 sm:$0xff]   ;;  %vm384_vm0 = vcmask 523264  }
   0xe   : > { %398 = vmatprep.subr.bf16.mxu0 %v1024_v3  ;;  %s1165_s23 = scalar_lea.vmem %s1292_s8, %s946_s17  ;;  %v1030_v8 = vld [vmem:[%s1286_s2 + $0x4] ss:$8 sps:$4 sm:$0xff]   ;;  %s311_s28 = scalar_lea.vmem %s1284_s0, %s946_s17  ;;  %v1032_v9 = vld [vmem:[%s1286_s2] ss:$8 sps:$4 sm:$0xff]   ;;  %v335_v14 = vshrl.u32 %v334_v13, 7  ;;  %vm440_vm1 = vcmask 125952  }
   0xf   : > { %v1181_v10 = vld [vmem:[%s311_s28] sm:$0xff]  ;;  %v1183_v11 = vld [vmem:[%s311_s28 + $0x8] sm:$0xff]  ;;  %s1085_s17 = smov 96   ;;  %s1088_s20 = smov 16   ;;  %v1215_v52 = vmov 0.0   ;;  %v1217_v53 = vmov 0.0  }
  0x10   : > { %v323_v12 = vpack.c.bf16 %v1183_v11, %v1181_v10  ;;  %v336_v15 = vsub.s32 0, %v335_v14  ;;  %v332_v16 = vld [vmem:[%s1287_s3] sm:$0x3]  ;;  %v340_v17 = vsub.s32 1, %v335_v14 }
  0x11   : > { %399 = vmatpush1.bf16.msra.mxu0 %v1026_v4 }
  0x12   : > { %400 = vmatprep.subr.bf16.mxu0 %v1027_v5  ;;  %v337_v18 = vrot.slane %v332_v16, %v336_v15  ;;  %v341_v19 = vrot.slane %v332_v16, %v340_v17 }
  0x15   : > { %401 = vmatpush1.bf16.msra.mxu0 %v1029_v7 }
  0x16   : > { %402 = vmatprep.subr.bf16.mxu0 %v1030_v8 }
  0x19   : > { %403 = vmatpush1.bf16.msra.mxu0 %v1032_v9 }
  0x1c   : > { %922 = vmatmul.mubr.msk.bf16.vlgmr.msra.gmra.mxu0 %vm384_vm0, %v323_v12 }
  0xdc   : > { %v422_v20 = vpop.f32.mrf.mxu0 }
  0xdd   : > { %v423_v21 = vadd.f32 %v422_v20, %v337_v18 }
  0xde   : > { %v424_v22 = vpop.f32.mrf.mxu0 }
  0xdf   : > { %v948_v23 = vpack.c.bf16 %v423_v21, %v423_v21  ;;  %v425_v24 = vadd.f32 %v424_v22, %v341_v19 }
  0xe0   : > { %v426_v25 = vpop.f32.mrf.mxu0 }
  0xe1   : > { %441 = vst.msk [vmem:[#allocation2] sm:$0xf] %vm440_vm1, %v948_v23  ;;  %v950_v26 = vpack.c.bf16 %v425_v24, %v425_v24  ;;  %v427_v27 = vadd.f32 %v426_v25, %v337_v18  ;;  %460 = vrot.lane.b32.xlu1 %v948_v23, %s1082_s14  ;;  %443 = vrot.lane.b32.xlu0 %v948_v23, %s1083_s15 }
  0xe2   : > { %v428_v28 = vpop.f32.mrf.mxu0 }
  0xe3   : > { %458 = vst.msk [vmem:[#allocation4] sm:$0xf] %vm440_vm1, %v950_v26  ;;  %v949_v29 = vpack.c.bf16 %v427_v27, %v427_v27  ;;  %v429_v30 = vadd.f32 %v428_v28, %v341_v19 }
  0xe5   : > { %442 = vst.msk [vmem:[#allocation2 + $0x4] sm:$0xf] %vm440_vm1, %v949_v29  ;;  %v951_v31 = vpack.c.bf16 %v429_v30, %v429_v30  ;;  %462 = vrot.lane.b32.xlu1 %v949_v29, %s1082_s14  ;;  %469 = vrot.lane.b32.xlu0 %v948_v23, %s1084_s16 }
  0xe7   : > { %459 = vst.msk [vmem:[#allocation4 + $0x4] sm:$0xf] %vm440_vm1, %v951_v31 }
  0xe9   : > { %471 = vrot.lane.b32.xlu1 %v949_v29, %s1084_s16  ;;  %487 = vrot.lane.b32.xlu0 %v948_v23, %s1085_s17 }
  0xed   : > { %489 = vrot.lane.b32.xlu1 %v949_v29, %s1085_s17  ;;  %496 = vrot.lane.b32.xlu0 %v948_v23, %s1086_s18 }
  0xf1   : > { %498 = vrot.lane.b32.xlu1 %v949_v29, %s1086_s18  ;;  %514 = vrot.lane.b32.xlu0 %v948_v23, %s1087_s19 }
  0xf5   : > { %516 = vrot.lane.b32.xlu1 %v949_v29, %s1087_s19  ;;  %523 = vrot.lane.b32.xlu0 %v948_v23, %s1088_s20 }
  0xf9   : > { %525 = vrot.lane.b32.xlu1 %v949_v29, %s1088_s20  ;;  %478 = vrot.lane.b32.xlu0 %v950_v26, %s1082_s14 }
  0xfd   : > { %480 = vrot.lane.b32.xlu1 %v951_v31, %s1082_s14  ;;  %505 = vrot.lane.b32.xlu0 %v950_v26, %s1085_s17 }
 0x101   : > { %507 = vrot.lane.b32.xlu1 %v951_v31, %s1085_s17  ;;  %445 = vrot.lane.b32.xlu0 %v949_v29, %s1083_s15 }
 0x105   : > { %534 = vrot.lane.b32.xlu1 %v951_v31, %s1087_s19  ;;  %532 = vrot.lane.b32.xlu0 %v950_v26, %s1087_s19 }
 0x153   : > { %v461_v32 = vpop.permute.xlu1 %460  ;;  %v444_v33 = vpop.permute.xlu0 %443 }
 0x154   : > { %467 = vst.msk [vmem:[#allocation2 + $0x8] sm:$0xf] %vm440_vm1, %v461_v32  ;;  %449 = vst.msk [vmem:[#allocation3] sm:$0xf] %vm440_vm1, %v444_v33 }
 0x157   : > { %v463_v34 = vpop.permute.xlu1 %462  ;;  %v470_v35 = vpop.permute.xlu0 %469 }
 0x158   : > { %468 = vst.msk [vmem:[#allocation2 + $0xc] sm:$0xf] %vm440_vm1, %v463_v34  ;;  %476 = vst.msk [vmem:[#allocation3 + $0x8] sm:$0xf] %vm440_vm1, %v470_v35 }
 0x15b   : > { %v472_v36 = vpop.permute.xlu1 %471  ;;  %v488_v37 = vpop.permute.xlu0 %487 }
 0x15c   : > { %477 = vst.msk [vmem:[#allocation3 + $0xc] sm:$0xf] %vm440_vm1, %v472_v36  ;;  %494 = vst.msk [vmem:[#allocation2 + $0x10] sm:$0xf] %vm440_vm1, %v488_v37 }
 0x15f   : > { %v490_v38 = vpop.permute.xlu1 %489  ;;  %v497_v39 = vpop.permute.xlu0 %496 }
 0x160   : > { %495 = vst.msk [vmem:[#allocation2 + $0x14] sm:$0xf] %vm440_vm1, %v490_v38  ;;  %503 = vst.msk [vmem:[#allocation3 + $0x10] sm:$0xf] %vm440_vm1, %v497_v39 }
 0x163   : > { %v499_v40 = vpop.permute.xlu1 %498  ;;  %v515_v41 = vpop.permute.xlu0 %514 }
 0x164   : > { %504 = vst.msk [vmem:[#allocation3 + $0x14] sm:$0xf] %vm440_vm1, %v499_v40  ;;  %521 = vst.msk [vmem:[#allocation2 + $0x18] sm:$0xf] %vm440_vm1, %v515_v41 }
 0x167   : > { %v517_v42 = vpop.permute.xlu1 %516  ;;  %v524_v43 = vpop.permute.xlu0 %523 }
 0x168   : > { %522 = vst.msk [vmem:[#allocation2 + $0x1c] sm:$0xf] %vm440_vm1, %v517_v42  ;;  %530 = vst.msk [vmem:[#allocation3 + $0x18] sm:$0xf] %vm440_vm1, %v524_v43 }
 0x16b   : > { %v526_v44 = vpop.permute.xlu1 %525  ;;  %v479_v45 = vpop.permute.xlu0 %478 }
 0x16c   : > { %531 = vst.msk [vmem:[#allocation3 + $0x1c] sm:$0xf] %vm440_vm1, %v526_v44  ;;  %485 = vst.msk [vmem:[#allocation4 + $0x8] sm:$0xf] %vm440_vm1, %v479_v45 }
 0x16f   : > { %v481_v46 = vpop.permute.xlu1 %480  ;;  %v506_v47 = vpop.permute.xlu0 %505 }
 0x170   : > { %486 = vst.msk [vmem:[#allocation4 + $0xc] sm:$0xf] %vm440_vm1, %v481_v46  ;;  %512 = vst.msk [vmem:[#allocation4 + $0x10] sm:$0xf] %vm440_vm1, %v506_v47 }
 0x173   : > { %v508_v48 = vpop.permute.xlu1 %507  ;;  %v446_v49 = vpop.permute.xlu0 %445 }
 0x174   : > { %513 = vst.msk [vmem:[#allocation4 + $0x14] sm:$0xf] %vm440_vm1, %v508_v48  ;;  %450 = vst.msk [vmem:[#allocation3 + $0x4] sm:$0xf] %vm440_vm1, %v446_v49 }
 0x177   : > { %v535_v50 = vpop.permute.xlu1 %534  ;;  %v533_v51 = vpop.permute.xlu0 %532 }
 0x178   : > { %540 = vst.msk [vmem:[#allocation4 + $0x1c] sm:$0xf] %vm440_vm1, %v535_v50  ;;  %539 = vst.msk [vmem:[#allocation4 + $0x18] sm:$0xf] %vm440_vm1, %v533_v51 }
 0x179 LB: >> { %v1089_v54 = vmov 0.0   ;;  %vm1090_vm2 = vmmov 0   ;;  %s1232_s22 = sshll.u32 %s1079_s21, 3  ;;  %vm573_vm3 = vcmask 130048   ;;  %s937_s29 = sshll.u32 %s1079_s21, 4  ;;  %s1079_s21 = sphi %s1219_s21, %s547_s21   ;;  %v1075_v53 = vphi %v1217_v53, %v1294_v53   ;;  %v1071_v52 = vphi %v1215_v52, %v1293_v52  }
 0x17a   : >> { %961 = vmatprep.subr.bf16.mxu0 %v1089_v54  ;;  %963 = vmatprep.mubr.msk.bf16.mxu0 %vm1090_vm2, %v1089_v54  ;;  %s556_s24 = scalar_lea.vmem [#allocation3], %s1232_s22  ;;  %s552_s25 = scalar_lea.vmem [#allocation2], %s1232_s22 }
 0x17b   : >> { %967 = vmatprep.subr.bf16.mxu1 %v1089_v54  ;;  %969 = vmatprep.mubr.msk.bf16.mxu1 %vm1090_vm2, %v1089_v54  ;;  %v1033_v55 = vld [vmem:[%s556_s24] sm:$0xff]   ;;  %s560_s26 = scalar_lea.vmem [#allocation4], %s1232_s22  ;;  %s705_s30 = sshra.s32 %s937_s29, 3 }
 0x17c   : >> { %v578_v56 = vsel %vm573_vm3, %v1033_v55, 0  ;;  %v1034_v57 = vld [vmem:[%s552_s25] sm:$0xff]   ;;  %s938_s9 = sshll.u32 %s705_s30, 2  ;;  %s547_s21 = sadd.s32 1, %s1079_s21  }
 0x17d   : >> { %962 = vmatpush3.bf16.xpose.msra.mxu0 %v578_v56  ;;  %s708_s11 = scalar_lea.vmem %s1288_s4, %s938_s9  ;;  %p544_p4 = scmp.ge.s32.totalorder %s547_s21, 4  }
 0x17e   : >> { %v1036_v24 = vld [vmem:[%s708_s11] sm:$0xff]  }
 0x17f   : >> { %v1035_v17 = vld [vmem:[%s560_s26] sm:$0xff]  }
 0x180   : >> { %968 = vmatpush3.bf16.msra.mxu1 %v1035_v17  ;;  %v941_v37 = vld [vmem:[%s1289_s5] ss:$0 sm:$0xff] (%p544_p4) }
 0x181   : >> { %973 = vmatprep.subr.bf16.mxu1 %v1089_v54 }
 0x184   : >> { %964 = vmatmul.mubr.msk.bf16.vlgmr.msra.gmra.mxu0 %vm573_vm3, %v1034_v57 }
 0x244   : >> { %v614_v58 = vpop.f32.mrf.mxu0 }
 0x245   : >> { %v621_v59 = vmul.f32 0.25, %v614_v58  ;;  %v942_v58 = vld [vmem:[%s1290_s6] ss:$0 sm:$0xff] (%p544_p4) }
 0x246   : >> { %v965_v60 = vpop.f32.mrf.mxu0 }
 0x247   : >> { %v629_v61 = vadd.f32 %v1167_v6, %v621_v59  ;;  %v943_v60 = vld [vmem:[%s1291_s7] ss:$0 sm:$0xff] (%p544_p4) }
 0x248   : >> { %v617_v62 = vpop.f32.mrf.mxu0 }
 0x249   : >> { %v622_v63 = vmul.f32 0.25, %v617_v62  ;;  %v631_v0 = vsel %vm573_vm3, %v629_v61, -inf }
 0x24a   : >> { %632 = vmax.xlane.f32.xlu0 %v631_v0  ;;  %v966_v1 = vpop.f32.mrf.mxu0 }
 0x24b   : >> { %v630_v2 = vadd.f32 %v1167_v6, %v622_v63 }
 0x24d   : >> { %v634_v3 = vsel %vm573_vm3, %v630_v2, -inf }
 0x24e   : >> { %635 = vmax.xlane.f32.xlu0 %v634_v3 }
 0x2d3   : >> { %v633_v4 = vpop.xlane.xlu0 %632 }
 0x2d4   : >> { %v637_v5 = vsub.f32 %v629_v61, %v633_v4 }
 0x2d6   : >> { %v639_v7 = vmul.f32 1.442695, %v637_v5 }
 0x2d7   : >> { %v636_v8 = vpop.xlane.xlu0 %635 }
 0x2d8   : >> { %1037 = vpow2.f32 %v639_v7  ;;  %v638_v9 = vsub.f32 %v630_v2, %v636_v8 }
 0x2da   : >> { %v641_v12 = vmul.f32 1.442695, %v638_v9 }
 0x2dc   : >> { %1039 = vpow2.f32 %v641_v12 }
 0x2e5   : >> { %v1038_v13 = vpop.eup %1037 }
 0x2e6   : >> { %v643_v14 = vsel %vm573_vm3, %v1038_v13, 0.0 }
 0x2e7   : >> { %644 = vadd.xlane.f32.xlu1 %v643_v14 }
 0x2e9   : >> { %v1040_v15 = vpop.eup %1039 }
 0x2ea   : >> { %v646_v16 = vsel %vm573_vm3, %v1040_v15, 0.0 }
 0x2eb   : >> { %647 = vadd.xlane.f32.xlu1 %v646_v16 }
 0x370   : >> { %v645_v18 = vpop.xlane.xlu1 %644 }
 0x371   : >> { %1041 = vrcp.f32 %v645_v18 }
 0x374   : >> { %v648_v19 = vpop.xlane.xlu1 %647 }
 0x375   : >> { %1043 = vrcp.f32 %v648_v19 }
 0x37e   : >> { %v1042_v20 = vpop.eup %1041 }
 0x37f   : >> { %v651_v22 = vmul.f32 %v1042_v20, %v1038_v13 }
 0x382   : >> { %v1044_v21 = vpop.eup %1043 }
 0x383   : >> { %v652_v23 = vmul.f32 %v1044_v21, %v1040_v15 }
 0x385   : >> { %v653_v25 = vpack.c.bf16 %v652_v23, %v651_v22 }
 0x387   : >> { %970 = vmatmul.mubr.msk.bf16.vlgmr.msra.gmra.mxu1 %vm573_vm3, %v653_v25 }
 0x388   : >> { %974 = vmatpush3.bf16.msra.mxu1 %v1036_v24  ;;  %975 = vmatprep.mubr.msk.bf16.mxu1 %vm1090_vm2, %v1089_v54 }
 0x447   : >> { %v697_v26 = vpop.f32.mrf.mxu1 }
 0x449   : >> { %v971_v27 = vpop.f32.mrf.mxu1 }
 0x44b   : >> { %v700_v28 = vpop.f32.mrf.mxu1 }
 0x44c   : >> { %v711_v29 = vpack.c.bf16 %v700_v28, %v697_v26 }
 0x44d   : >> { %v972_v30 = vpop.f32.mrf.mxu1 }
 0x44e   : >> { %976 = vmatmul.mubr.msk.bf16.vlgmr.msra.gmra.mxu1 %vm573_vm3, %v711_v29 }
 0x50e   : >> { %v755_v31 = vpop.f32.mrf.mxu1 }
 0x50f   : >> { %v762_v32 = vadd.f32 %v1075_v53, %v755_v31  }
 0x510   : >> { %v977_v33 = vpop.f32.mrf.mxu1 }
 0x511   : >> { %v1294_v53 = vmov %v762_v32  ;;  %546 = sbr.rel (!%p544_p4) target bundleno = 377 (0x179), region = 105  ;;  %v771_v38 = vadd.f32 (%p544_p4), %v941_v37, %v762_v32 }
 0x512   : >> { %v758_v34 = vpop.f32.mrf.mxu1 }
 0x513   : >> { %v763_v35 = vadd.f32 %v1071_v52, %v758_v34   ;;  %v773_v40 = vadd.f32 (%p544_p4), %v771_v38, %v1181_v10 }
 0x514   : >> { %v978_v36 = vpop.f32.mrf.mxu1 }
 0x515   : >> { %v1293_v52 = vmov %v763_v35  ;;  %v772_v39 = vadd.f32 (%p544_p4), %v941_v37, %v763_v35  ;;  %v777_v42 = vsel (%p544_p4), %vm384_vm0, %v773_v40, 0.0 }
 0x516   : > { %778 = vadd.xlane.f32.xlu0 %v777_v42 }
 0x517   : > { %v774_v41 = vadd.f32 %v772_v39, %v1183_v11 }
 0x519   : > { %v780_v43 = vsel %vm384_vm0, %v774_v41, 0.0 }
 0x51a   : > { %781 = vadd.xlane.f32.xlu0 %v780_v43 }
 0x59f   : > { %v779_v44 = vpop.xlane.xlu0 %778 }
 0x5a0   : > { %v784_v45 = vmul.f32 0.015625, %v779_v44 }
 0x5a2   : > { %v786_v46 = vsub.f32 %v773_v40, %v784_v45 }
 0x5a3   : > { %v782_v47 = vpop.xlane.xlu0 %781 }
 0x5a4   : > { %v785_v6 = vmul.f32 0.015625, %v782_v47  ;;  %v788_v48 = vmul.f32 %v786_v46, %v786_v46 }
 0x5a6   : > { %v787_v49 = vsub.f32 %v774_v41, %v785_v6  ;;  %v790_v50 = vsel %vm384_vm0, %v788_v48, 0.0 }
 0x5a7   : > { %791 = vadd.xlane.f32.xlu1 %v790_v50 }
 0x5a8   : > { %v789_v51 = vmul.f32 %v787_v49, %v787_v49 }
 0x5aa   : > { %v793_v10 = vsel %vm384_vm0, %v789_v51, 0.0 }
 0x5ab   : > { %794 = vadd.xlane.f32.xlu1 %v793_v10 }
 0x630   : > { %v792_v11 = vpop.xlane.xlu1 %791 }
 0x631   : > { %v796_v52 = vmul.f32 0.015625, %v792_v11 }
 0x633   : > { %v798_v53 = vadd.f32 1e-05, %v796_v52 }
 0x634   : > { %v795_v54 = vpop.xlane.xlu1 %794 }
 0x635   : > { %1045 = vrsqrt.f32 %v798_v53  ;;  %v797_v55 = vmul.f32 0.015625, %v795_v54 }
 0x637   : > { %v799_v56 = vadd.f32 1e-05, %v797_v55 }
 0x639   : > { %1047 = vrsqrt.f32 %v799_v56 }
 0x642   : > { %v1046_v57 = vpop.eup %1045 }
 0x643   : > { %v802_v59 = vmul.f32 %v1046_v57, %v786_v46 }
 0x645   : > { %v810_v61 = vmul.f32 %v942_v58, %v802_v59 }
 0x646   : > { %v1048_v62 = vpop.eup %1047 }
 0x647   : > { %v818_v63 = vadd.f32 %v943_v60, %v810_v61  ;;  %v803_v0 = vmul.f32 %v1048_v62, %v787_v49 }
 0x649   : > { %820 = vst.msk [vmem:[%s1165_s23] sm:$0xff] %vm384_vm0, %v818_v63  ;;  %v811_v1 = vmul.f32 %v942_v58, %v803_v0 }
 0x64b   : > { %v819_v2 = vadd.f32 %v943_v60, %v811_v1 }
 0x64d   : > { %821 = vst.msk [vmem:[%s1165_s23 + $0x8] sm:$0xff] %vm384_vm0, %v819_v2 }
 0x64e PF: > { %s18_s27 = sadd.s32 1, %s1067_s27  }
 0x64f   : > { %p15_p5 = scmp.ge.s32.totalorder %s18_s27, 4  }
 0x651   :  { %17 = sbr.rel (!%p15_p5) target bundleno = 1 (0x1), region = 116 }

// kernel: shallow_hubert_forward.7
= control target key start
LH: loop header
LB: loop body
LE: loop exit
PB: predicated region body
PF: predicated region fallthrough
CT: control target
= control target key end

     0   :  { %v891_v2 = vmov 0   ;;  %vm100_vm0 = vcmask 523264   ;;  %s1231_s0 = inlined_call_operand.vmem [shape: f32[32,64], index: 0, kind: input, shape index: {}]   ;;  %s1232_s1 = inlined_call_operand.vmem [shape: bf16[64,256], index: 1, kind: input, shape index: {}]   ;;  %s1233_s2 = inlined_call_operand.vmem [shape: f32[1,256], index: 2, kind: input, shape index: {}]   ;;  %s1234_s3 = inlined_call_operand.vmem [shape: bf16[256,64], index: 3, kind: input, shape index: {}]   ;;  %s1235_s4 = inlined_call_operand.vmem [shape: f32[1,64], index: 4, kind: input, shape index: {}]   ;;  %s1236_s5 = inlined_call_operand.vmem [shape: f32[1,64], index: 5, kind: input, shape index: {}]   ;;  %s1237_s6 = inlined_call_operand.vmem [shape: f32[1,64], index: 6, kind: input, shape index: {}]   ;;  %s1238_s7 = inlined_call_operand.vmem [shape: f32[1,64], index: 7, kind: input, shape index: {}]   ;;  %s1239_s8 = inlined_call_operand.vmem [shape: f32[1,64], index: 8, kind: input, shape index: {}]   ;;  %s1240_s9 = inlined_call_operand.hbm [shape: f32[32,64], index: 9, kind: output, shape index: {}]  }
   0x1   :  { %v793_v0 = vld [vmem:[%s1232_s1 + $0x34] ss:$8 sps:$4 sm:$0xff]   ;;  %v795_v1 = vld [vmem:[%s1232_s1 + $0x30] ss:$8 sps:$4 sm:$0xff]   ;;  %139 = vmatprep.mubr.bf16.mxu0 %v891_v2  ;;  %v796_v3 = vld [vmem:[%s1232_s1 + $0x24] ss:$8 sps:$4 sm:$0xff]  }
   0x2   :  { %115 = vmatprep.subr.bf16.mxu0 %v793_v0  ;;  %v798_v4 = vld [vmem:[%s1232_s1 + $0x20] ss:$8 sps:$4 sm:$0xff]   ;;  %v799_v5 = vld [vmem:[%s1232_s1 + $0x14] ss:$8 sps:$4 sm:$0xff]   ;;  %v801_v6 = vld [vmem:[%s1232_s1 + $0x10] ss:$8 sps:$4 sm:$0xff]  }
   0x3   :  { %116 = vmatpush1.bf16.msra.mxu0 %v795_v1  ;;  %v802_v7 = vld [vmem:[%s1232_s1 + $0x4] ss:$8 sps:$4 sm:$0xff]   ;;  %v804_v8 = vld [vmem:[%s1232_s1] ss:$8 sps:$4 sm:$0xff]  }
   0x4   :  { %117 = vmatprep.subr.bf16.mxu0 %v796_v3  ;;  %v973_v9 = vld [vmem:[%s1231_s0] sm:$0xff]  ;;  %v978_v10 = vld [vmem:[%s1231_s0 + $0x8] sm:$0xff] }
   0x5   :  { %v38_v11 = vpack.c.bf16 %v978_v10, %v973_v9 }
   0x7   :  { %118 = vmatpush1.bf16.msra.mxu0 %v798_v4 }
   0x8   :  { %119 = vmatprep.subr.bf16.mxu0 %v799_v5 }
   0xb   :  { %120 = vmatpush1.bf16.msra.mxu0 %v801_v6 }
   0xc   :  { %121 = vmatprep.subr.bf16.mxu0 %v802_v7 }
   0xf   :  { %122 = vmatpush1.bf16.msra.mxu0 %v804_v8 }
  0x10   :  { %14 = vsyncpa [#allocation3], 0  ;;  %v986_v12 = vld [vmem:[%s1231_s0 + $0x10] sm:$0xff]  ;;  %v991_v13 = vld [vmem:[%s1231_s0 + $0x18] sm:$0xff]  ;;  %v50_v31 = vlaneseq }
  0x11   :  { %v39_v14 = vpack.c.bf16 %v991_v13, %v986_v12  ;;  %v805_v15 = vld [vmem:[%s1234_s3 + $0x78] sm:$0xff]   ;;  %v807_v17 = vld [vmem:[%s1234_s3 + $0x70] sm:$0xff]   ;;  %v809_v19 = vld [vmem:[%s1234_s3 + $0x68] sm:$0xff]  }
  0x12   :  { %737 = vmatmul.mubr.msk.bf16.vlgmr.msra.gmra.mxu0 %vm100_vm0, %v38_v11  ;;  %v806_v16 = vld [vmem:[%s1234_s3 + $0x38] sm:$0xff]   ;;  %760 = vmatprep.subr.bf16.mxu1 %v805_v15  ;;  %v808_v18 = vld [vmem:[%s1234_s3 + $0x30] sm:$0xff]   ;;  %v810_v20 = vld [vmem:[%s1234_s3 + $0x28] sm:$0xff]   ;;  %v51_v32 = vshrl.u32 %v50_v31, 7 }
  0x13   :  { %149 = vmatprep.mubr.bf16.mxu0 %v891_v2  ;;  %761 = vmatpush3.bf16.msra.mxu1 %v806_v16  ;;  %v811_v21 = vld [vmem:[%s1234_s3 + $0x60] sm:$0xff]   ;;  %v813_v23 = vld [vmem:[%s1234_s3 + $0x58] sm:$0xff]   ;;  %v815_v25 = vld [vmem:[%s1234_s3 + $0x50] sm:$0xff]  }
  0x14   :  { %762 = vmatprep.subr.bf16.mxu1 %v807_v17  ;;  %v812_v22 = vld [vmem:[%s1234_s3 + $0x20] sm:$0xff]   ;;  %v814_v24 = vld [vmem:[%s1234_s3 + $0x18] sm:$0xff]   ;;  %v816_v26 = vld [vmem:[%s1234_s3 + $0x10] sm:$0xff]   ;;  %v52_v33 = vsub.s32 0, %v51_v32  ;;  %v56_v35 = vsub.s32 1, %v51_v32 }
  0x15   :  { %v817_v27 = vld [vmem:[%s1234_s3 + $0x48] sm:$0xff]   ;;  %v819_v29 = vld [vmem:[%s1234_s3 + $0x40] sm:$0xff]  }
  0x16   :  { %v818_v28 = vld [vmem:[%s1234_s3 + $0x8] sm:$0xff]   ;;  %v820_v30 = vld [vmem:[%s1234_s3] sm:$0xff]  }
  0x17   :  { %763 = vmatpush3.bf16.msra.mxu1 %v808_v18  ;;  %v48_v34 = vld [vmem:[%s1233_s2] sm:$0x3] }
  0x18   :  { %764 = vmatprep.subr.bf16.mxu1 %v809_v19  ;;  %v53_v36 = vrot.slane %v48_v34, %v52_v33  ;;  %v57_v37 = vrot.slane %v48_v34, %v56_v35 }
  0x1a   :  { %738 = vmatmul.mubr.msk.bf16.gmra.mxu0 %vm100_vm0, %v39_v14 }
  0x1b   :  { %765 = vmatpush3.bf16.msra.mxu1 %v810_v20 }
  0x1c   :  { %766 = vmatprep.subr.bf16.mxu1 %v811_v21 }
  0x1f   :  { %767 = vmatpush3.bf16.msra.mxu1 %v812_v22 }
  0x20   :  { %768 = vmatprep.subr.bf16.mxu1 %v813_v23 }
  0x23   :  { %769 = vmatpush3.bf16.msra.mxu1 %v814_v24 }
  0x24   :  { %770 = vmatprep.subr.bf16.mxu1 %v815_v25 }
  0x27   :  { %771 = vmatpush3.bf16.msra.mxu1 %v816_v26 }
  0x28   :  { %772 = vmatprep.subr.bf16.mxu1 %v817_v27 }
  0x2b   :  { %773 = vmatpush3.bf16.msra.mxu1 %v818_v28 }
  0x2c   :  { %774 = vmatprep.subr.bf16.mxu1 %v819_v29 }
  0x2f   :  { %775 = vmatpush3.bf16.msra.mxu1 %v820_v30 }
  0xd2   :  { %v141_v38 = vpop.f32.mrf.mxu0 }
  0xd3   :  { %v1047_v39 = vadd.f32 %v141_v38, %v53_v36 }
  0xd4   :  { %v143_v40 = vpop.f32.mrf.mxu0 }
  0xd5   :  { %v1050_v41 = vmul.f32 0.70710677, %v1047_v39  ;;  %v1052_v42 = vadd.f32 %v143_v40, %v57_v37 }
  0xd6   :  { %v145_v43 = vpop.f32.mrf.mxu0 }
  0xd7   :  { %v192_v44 = vand.u32 2147483647, %v1050_v41  ;;  %v1056_v45 = vmul.f32 0.70710677, %v1052_v42  ;;  %v1058_v46 = vadd.f32 %v145_v43, %v53_v36  ;;  %vm176_vm1 = vcmp.ge.f32.partialorder %v1050_v41, 0.0 }
  0xd8   :  { %v147_v47 = vpop.f32.mrf.mxu0 }
  0xd9   :  { %v200_v48 = vmul.f32 0.3275911, %v192_v44  ;;  %v193_v49 = vand.u32 2147483647, %v1056_v45  ;;  %v1062_v50 = vmul.f32 0.70710677, %v1058_v46  ;;  %v1064_v51 = vadd.f32 %v147_v47, %v57_v37 }
  0xda   :  { %v151_v52 = vpop.f32.mrf.mxu0  ;;  %v296_v2 = vsub.f32 0.0, %v192_v44  ;;  %vm177_vm2 = vcmp.ge.f32.partialorder %v1056_v45, 0.0 }
  0xdb   :  { %v208_v53 = vadd.f32 1.0, %v200_v48  ;;  %v201_v54 = vmul.f32 0.3275911, %v193_v49  ;;  %v194_v55 = vand.u32 2147483647, %v1062_v50  ;;  %v1071_v62 = vadd.f32 %v151_v52, %v53_v36 }
  0xdc   :  { %v1068_v56 = vmul.f32 0.70710677, %v1064_v51  ;;  %v153_v57 = vpop.f32.mrf.mxu0  ;;  %v297_v11 = vsub.f32 0.0, %v193_v49  ;;  %v304_v15 = vmul.f32 %v296_v2, %v192_v44  ;;  %vm178_vm3 = vcmp.ge.f32.partialorder %v1062_v50, 0.0 }
  0xdd   :  { %821 = vrcp.f32 %v208_v53  ;;  %v209_v58 = vadd.f32 1.0, %v201_v54  ;;  %v202_v59 = vmul.f32 0.3275911, %v194_v55  ;;  %v1073_v0 = vadd.f32 %v153_v57, %v57_v37 }
  0xde   :  { %v155_v60 = vpop.f32.mrf.mxu0  ;;  %v195_v61 = vand.u32 2147483647, %v1068_v56  ;;  %v1076_v3 = vmul.f32 0.70710677, %v1071_v62  ;;  %v298_v16 = vsub.f32 0.0, %v194_v55  ;;  %v305_v22 = vmul.f32 %v297_v11, %v193_v49 }
  0xdf   :  { %823 = vrcp.f32 %v209_v58  ;;  %v210_v63 = vadd.f32 1.0, %v202_v59  ;;  %v1079_v6 = vmul.f32 0.70710677, %v1073_v0  ;;  %v1081_v7 = vadd.f32 %v155_v60, %v53_v36 }
  0xe0   :  { %v203_v1 = vmul.f32 0.3275911, %v195_v61  ;;  %v157_v4 = vpop.f32.mrf.mxu0  ;;  %v196_v8 = vand.u32 2147483647, %v1076_v3  ;;  %v312_v26 = vmul.f32 1.442695, %v304_v15  ;;  %v306_v27 = vmul.f32 %v298_v16, %v194_v55 }
  0xe1   :  { %825 = vrcp.f32 %v210_v63  ;;  %v1084_v14 = vadd.f32 %v157_v4, %v57_v37  ;;  %v197_v18 = vand.u32 2147483647, %v1079_v6  ;;  %v1088_v19 = vmul.f32 0.70710677, %v1081_v7 }
  0xe2   :  { %v211_v5 = vadd.f32 1.0, %v203_v1  ;;  %v204_v17 = vmul.f32 0.3275911, %v196_v8  ;;  %v299_v30 = vsub.f32 0.0, %v195_v61  ;;  %v300_v32 = vsub.f32 0.0, %v196_v8 }
  0xe3   :  { %v205_v21 = vmul.f32 0.3275911, %v197_v18  ;;  %v198_v23 = vand.u32 2147483647, %v1088_v19  ;;  %v1092_v24 = vmul.f32 0.70710677, %v1084_v14 }
  0xe4   :  { %827 = vrcp.f32 %v211_v5  ;;  %v212_v20 = vadd.f32 1.0, %v204_v17  ;;  %v314_v36 = vmul.f32 1.442695, %v305_v22  ;;  %v316_v38 = vmul.f32 1.442695, %v306_v27 }
  0xe5   :  { %v213_v28 = vadd.f32 1.0, %v205_v21  ;;  %v206_v31 = vmul.f32 0.3275911, %v198_v23  ;;  %v199_v33 = vand.u32 2147483647, %v1092_v24  ;;  %v307_v47 = vmul.f32 %v299_v30, %v195_v61 }
  0xe6   :  { %829 = vrcp.f32 %v212_v20  ;;  %v308_v52 = vmul.f32 %v300_v32, %v196_v8  ;;  %v301_v53 = vsub.f32 0.0, %v197_v18  ;;  %v892_v55 = vmov -1.0  }
  0xe7   :  { %831 = vrcp.f32 %v213_v28  ;;  %v214_v37 = vadd.f32 1.0, %v206_v31  ;;  %v207_v40 = vmul.f32 0.3275911, %v199_v33  ;;  %v1107_v57 = vsel %vm176_vm1, 1.0, %v892_v55 }
  0xe8   :  { %833 = vpow2.f32 %v312_v26  ;;  %v302_v61 = vsub.f32 0.0, %v198_v23  ;;  %v318_v1 = vmul.f32 1.442695, %v307_v47  ;;  %v320_v8 = vmul.f32 1.442695, %v308_v52 }
  0xe9   :  { %835 = vrcp.f32 %v214_v37  ;;  %v215_v54 = vadd.f32 1.0, %v207_v40  ;;  %v309_v11 = vmul.f32 %v301_v53, %v197_v18  ;;  %v303_v22 = vsub.f32 0.0, %v199_v33 }
  0xea   :  { %v1094_v25 = vpop.eup %821  ;;  %837 = vpow2.f32 %v314_v36  ;;  %v310_v21 = vmul.f32 %v302_v61, %v198_v23  ;;  %v1119_v26 = vsel %vm177_vm2, 1.0, %v892_v55  ;;  %vm179_vm4 = vcmp.ge.f32.partialorder %v1068_v56, 0.0 }
  0xeb   :  { %v224_v29 = vmul.f32 1.0614054, %v1094_v25  ;;  %839 = vrcp.f32 %v215_v54  ;;  %v322_v31 = vmul.f32 1.442695, %v309_v11  ;;  %v160_v56 = vmul.f32 0.5, %v1047_v39 }
  0xec   :  { %v1098_v34 = vpop.eup %823  ;;  %841 = vpow2.f32 %v316_v38  ;;  %v324_v40 = vmul.f32 1.442695, %v310_v21  ;;  %vm180_vm5 = vcmp.ge.f32.partialorder %v1076_v3, 0.0  ;;  %vm181_vm6 = vcmp.ge.f32.partialorder %v1079_v6, 0.0 }
  0xed   :  { %v232_v35 = vadd.f32 -1.4531521, %v224_v29  ;;  %v225_v48 = vmul.f32 1.0614054, %v1098_v34  ;;  %843 = vpow2.f32 %v318_v1  ;;  %vm182_vm7 = vcmp.ge.f32.partialorder %v1088_v19, 0.0 }
  0xee   :  { %v1101_v43 = vpop.eup %825  ;;  %845 = vpow2.f32 %v320_v8  ;;  %v190_v19 = vsel %vm182_vm7, 1.0, %v892_v55  ;;  %vm183_vm8 = vcmp.ge.f32.partialorder %v1092_v24, 0.0  ;;  %v164_v24 = vmul.f32 0.5, %v1071_v62 }
  0xef   :  { %v240_v44 = vmul.f32 %v1094_v25, %v232_v35  ;;  %v226_v49 = vmul.f32 1.0614054, %v1101_v43  ;;  %v233_v58 = vadd.f32 -1.4531521, %v225_v48  ;;  %847 = vpow2.f32 %v322_v31 }
  0xf0   :  { %849 = vpow2.f32 %v324_v40 }
  0xf1   :  { %v248_v41 = vadd.f32 1.4214138, %v240_v44  ;;  %v1109_v59 = vpop.eup %827  ;;  %v234_v60 = vadd.f32 -1.4531521, %v226_v49  ;;  %v241_v4 = vmul.f32 %v1098_v34, %v233_v58  ;;  %v311_v44 = vmul.f32 %v303_v22, %v199_v33 }
  0xf2   :  { %v227_v2 = vmul.f32 1.0614054, %v1109_v59 }
  0xf3   :  { %v256_v63 = vmul.f32 %v1094_v25, %v248_v41  ;;  %v242_v5 = vmul.f32 %v1101_v43, %v234_v60  ;;  %v249_v17 = vadd.f32 1.4214138, %v241_v4  ;;  %v1121_v27 = vpop.eup %829  ;;  %v186_v41 = vsel %vm178_vm3, 1.0, %v892_v55 }
  0xf4   :  { %v235_v16 = vadd.f32 -1.4531521, %v227_v2  ;;  %v228_v23 = vmul.f32 1.0614054, %v1121_v27  ;;  %v1129_v36 = vpop.eup %831 }
  0xf5   :  { %v264_v15 = vadd.f32 -0.28449672, %v256_v63  ;;  %v250_v20 = vadd.f32 1.4214138, %v242_v5  ;;  %v257_v18 = vmul.f32 %v1098_v34, %v249_v17  ;;  %v834_v47 = vpop.eup %833  ;;  %v229_v49 = vmul.f32 1.0614054, %v1129_v36 }
  0xf6   :  { %v243_v29 = vmul.f32 %v1109_v59, %v235_v16  ;;  %v236_v38 = vadd.f32 -1.4531521, %v228_v23  ;;  %v1135_v54 = vpop.eup %835 }
  0xf7   :  { %v272_v28 = vmul.f32 %v1094_v25, %v264_v15  ;;  %v258_v30 = vmul.f32 %v1101_v43, %v250_v20  ;;  %v265_v35 = vadd.f32 -0.28449672, %v257_v18  ;;  %v230_v61 = vmul.f32 1.0614054, %v1135_v54  ;;  %v838_v1 = vpop.eup %837 }
  0xf8   :  { %v251_v45 = vadd.f32 1.4214138, %v243_v29  ;;  %v244_v60 = vmul.f32 %v1121_v27, %v236_v38  ;;  %v1144_v8 = vpop.eup %839  ;;  %v326_v15 = vmul.f32 1.442695, %v311_v44 }
  0xf9   :  { %v280_v32 = vadd.f32 0.2548296, %v272_v28  ;;  %v266_v37 = vadd.f32 -0.28449672, %v258_v30  ;;  %v273_v53 = vmul.f32 %v1098_v34, %v265_v35  ;;  %v238_v11 = vadd.f32 -1.4531521, %v230_v61  ;;  %v842_v28 = vpop.eup %841 }
  0xfa   :  { %v259_v52 = vmul.f32 %v1109_v59, %v251_v45  ;;  %v252_v4 = vadd.f32 1.4214138, %v244_v60  ;;  %v231_v21 = vmul.f32 1.0614054, %v1144_v8  ;;  %851 = vpow2.f32 %v326_v15  ;;  %v844_v40 = vpop.eup %843 }
  0xfb   :  { %v288_v48 = vmul.f32 %v1094_v25, %v280_v32  ;;  %v274_v58 = vmul.f32 %v1101_v43, %v266_v37  ;;  %v237_v25 = vadd.f32 -1.4531521, %v229_v49  ;;  %v281_v5 = vadd.f32 0.2548296, %v273_v53  ;;  %v846_v60 = vpop.eup %845 }
  0xfc   :  { %v267_v63 = vadd.f32 -0.28449672, %v259_v52  ;;  %v260_v20 = vmul.f32 %v1121_v27, %v252_v4  ;;  %v246_v30 = vmul.f32 %v1135_v54, %v238_v11  ;;  %v239_v45 = vadd.f32 -1.4531521, %v231_v21 }
  0xfd   :  { %v328_v33 = vmul.f32 %v834_v47, %v288_v48  ;;  %v282_v2 = vadd.f32 0.2548296, %v274_v58  ;;  %v245_v50 = vmul.f32 %v1129_v36, %v237_v25  ;;  %v289_v22 = vmul.f32 %v1098_v34, %v281_v5 }
  0xfe   :  { %v275_v16 = vmul.f32 %v1109_v59, %v267_v63  ;;  %v268_v32 = vadd.f32 -0.28449672, %v260_v20  ;;  %v254_v38 = vadd.f32 1.4214138, %v246_v30  ;;  %v247_v47 = vmul.f32 %v1144_v8, %v239_v45 }
  0xff   :  { %v290_v17 = vmul.f32 %v1101_v43, %v282_v2  ;;  %v336_v29 = vsub.f32 1.0, %v328_v33  ;;  %v253_v18 = vadd.f32 1.4214138, %v245_v50  ;;  %v329_v35 = vmul.f32 %v838_v1, %v289_v22 }
 0x100   :  { %v283_v23 = vadd.f32 0.2548296, %v275_v16  ;;  %v276_v34 = vmul.f32 %v1121_v27, %v268_v32  ;;  %v262_v53 = vmul.f32 %v1135_v54, %v254_v38  ;;  %v255_v61 = vadd.f32 1.4214138, %v247_v47 }
 0x101   :  { %v330_v31 = vmul.f32 %v842_v28, %v290_v17  ;;  %v261_v37 = vmul.f32 %v1129_v36, %v253_v18  ;;  %v337_v48 = vsub.f32 1.0, %v329_v35  ;;  %v344_v49 = vmul.f32 %v336_v29, %v1107_v57 }
 0x102   :  { %v291_v43 = vmul.f32 %v1109_v59, %v283_v23  ;;  %v284_v25 = vadd.f32 0.2548296, %v276_v34  ;;  %v161_v59 = vmul.f32 0.5, %v1052_v42  ;;  %v270_v2 = vadd.f32 -0.28449672, %v262_v53 }
 0x103   :  { %v338_v44 = vsub.f32 1.0, %v330_v31  ;;  %v269_v52 = vadd.f32 -0.28449672, %v261_v37  ;;  %v345_v63 = vmul.f32 %v337_v48, %v1119_v26  ;;  %v263_v57 = vmul.f32 %v1144_v8, %v255_v61 }
 0x104   :  { %v331_v58 = vmul.f32 %v844_v40, %v291_v43  ;;  %v292_v50 = vmul.f32 %v1121_v27, %v284_v25  ;;  %v187_v11 = vsel %vm179_vm4, 1.0, %v892_v55  ;;  %v278_v16 = vmul.f32 %v1135_v54, %v270_v2 }
 0x105   :  { %v346_v33 = vmul.f32 %v338_v44, %v186_v41  ;;  %v277_v1 = vmul.f32 %v1129_v36, %v269_v52  ;;  %v848_v41 = vpop.eup %847  ;;  %v353_v17 = vadd.f32 1.0, %v345_v63  ;;  %v352_v42 = vadd.f32 1.0, %v344_v49 }
 0x106   :  { %v339_v4 = vsub.f32 1.0, %v331_v58  ;;  %v162_v20 = vmul.f32 0.5, %v1058_v46  ;;  %v163_v21 = vmul.f32 0.5, %v1064_v51  ;;  %v271_v22 = vadd.f32 -0.28449672, %v263_v57  ;;  %v850_v28 = vpop.eup %849 }
 0x107   :  { %v354_v5 = vadd.f32 1.0, %v346_v33  ;;  %v285_v15 = vadd.f32 0.2548296, %v277_v1  ;;  %v332_v27 = vmul.f32 %v846_v60, %v292_v50  ;;  %v286_v18 = vadd.f32 0.2548296, %v278_v16  ;;  %v852_v40 = vpop.eup %851 }
 0x108   :  { %v347_v26 = vmul.f32 %v339_v4, %v187_v11  ;;  %v279_v31 = vmul.f32 %v1144_v8, %v271_v22  ;;  %v361_v46 = vmul.f32 %v353_v17, %v161_v59  ;;  %v360_v51 = vmul.f32 %v352_v42, %v160_v56 }
 0x109   :  { %v293_v29 = vmul.f32 %v1129_v36, %v285_v15  ;;  %v362_v23 = vmul.f32 %v354_v5, %v162_v20  ;;  %v294_v45 = vmul.f32 %v1135_v54, %v286_v18  ;;  %v340_v37 = vsub.f32 1.0, %v332_v27 }
 0x10a   :  { %v355_v30 = vadd.f32 1.0, %v347_v26  ;;  %v287_v36 = vadd.f32 0.2548296, %v279_v31  ;;  %v188_v54 = vsel %vm180_vm5, 1.0, %v892_v55  ;;  %v189_v47 = vsel %vm181_vm6, 1.0, %v892_v55 }
 0x10b   :  { %v333_v32 = vmul.f32 %v848_v41, %v293_v29  ;;  %v334_v43 = vmul.f32 %v850_v28, %v294_v45  ;;  %v368_v34 = vpack.c.bf16 %v362_v23, %v360_v51  ;;  %v348_v52 = vmul.f32 %v340_v37, %v188_v54 }
 0x10c   :  { %v363_v35 = vmul.f32 %v355_v30, %v163_v21  ;;  %v295_v44 = vmul.f32 %v1144_v8, %v287_v36  ;;  %v191_v60 = vsel %vm183_vm8, 1.0, %v892_v55  ;;  %v166_v61 = vmul.f32 0.5, %v1081_v7  ;;  %v739_v7 = vld [vmem:[%s1235_s4] ss:$0 sm:$0xff] }
 0x10d   :  { %v341_v38 = vsub.f32 1.0, %v333_v32  ;;  %v342_v48 = vsub.f32 1.0, %v334_v43  ;;  %v356_v25 = vadd.f32 1.0, %v348_v52  ;;  %v165_v63 = vmul.f32 0.5, %v1073_v0 }
 0x10e   :  { %v369_v39 = vpack.c.bf16 %v363_v35, %v361_v46  ;;  %v335_v49 = vmul.f32 %v852_v40, %v295_v44  ;;  %v167_v59 = vmul.f32 0.5, %v1084_v14 }
 0x10f   :  { %v349_v6 = vmul.f32 %v341_v38, %v189_v47  ;;  %v350_v53 = vmul.f32 %v342_v48, %v190_v19  ;;  %v364_v50 = vmul.f32 %v356_v25, %v164_v24  ;;  %v756_v24 = vld [vmem:[%s1236_s5] ss:$0 sm:$0xff] }
 0x110   :  { %539 = vmatprep.mubr.bf16.mxu1 %v369_v39  ;;  %v343_v58 = vsub.f32 1.0, %v335_v49 }
 0x111   :  { %540 = vmatmul.mubr.bf16.vlgmr.msra.gmra.mxu1 %v368_v34  ;;  %v358_v8 = vadd.f32 1.0, %v350_v53  ;;  %v357_v33 = vadd.f32 1.0, %v349_v6 }
 0x112   :  { %v351_v3 = vmul.f32 %v343_v58, %v191_v60 }
 0x113   :  { %v366_v2 = vmul.f32 %v358_v8, %v166_v61  ;;  %v365_v4 = vmul.f32 %v357_v33, %v165_v63 }
 0x114   :  { %v359_v1 = vadd.f32 1.0, %v351_v3 }
 0x115   :  { %v370_v11 = vpack.c.bf16 %v366_v2, %v364_v50 }
 0x116   :  { %v367_v5 = vmul.f32 %v359_v1, %v167_v59 }
 0x118   :  { %v371_v57 = vpack.c.bf16 %v367_v5, %v365_v4  ;;  %v757_v5 = vld [vmem:[%s1237_s6] ss:$0 sm:$0xff] }
 0x11a   :  { %547 = vmatprep.mubr.bf16.mxu1 %v371_v57 }
 0x11b   :  { %548 = vmatmul.mubr.bf16.gmra.mxu1 %v370_v11 }
 0x1d1   :  { %v776_v55 = vpop.f32.mrf.mxu1 }
 0x1d3   :  { %v777_v41 = vpop.f32.mrf.mxu1 }
 0x1d4   :  { %v778_v0 = vadd.f32 %v777_v41, %v776_v55 }
 0x1d5   :  { %v779_v15 = vpop.f32.mrf.mxu1 }
 0x1d6   :  { %v542_v14 = vadd.f32 %v778_v0, %v739_v7 }
 0x1d7   :  { %v780_v16 = vpop.f32.mrf.mxu1 }
 0x1d8   :  { %v781_v26 = vadd.f32 %v780_v16, %v779_v15  ;;  %v556_v62 = vadd.f32 %v542_v14, %v973_v9 }
 0x1da   :  { %v545_v17 = vadd.f32 %v781_v26, %v739_v7  ;;  %v562_v42 = vsel %vm100_vm0, %v556_v62, 0.0 }
 0x1db   :  { %563 = vadd.xlane.f32.xlu0 %v562_v42  ;;  %v782_v21 = vpop.f32.mrf.mxu1 }
 0x1dc   :  { %v557_v20 = vadd.f32 %v545_v17, %v978_v10 }
 0x1dd   :  { %v783_v28 = vpop.f32.mrf.mxu1 }
 0x1de   :  { %v565_v22 = vsel %vm100_vm0, %v557_v20, 0.0  ;;  %v784_v27 = vadd.f32 %v783_v28, %v782_v21 }
 0x1df   :  { %566 = vadd.xlane.f32.xlu0 %v565_v22  ;;  %v785_v29 = vpop.f32.mrf.mxu1 }
 0x1e0   :  { %v550_v18 = vadd.f32 %v784_v27, %v739_v7 }
 0x1e1   :  { %v786_v30 = vpop.f32.mrf.mxu1 }
 0x1e2   :  { %v787_v56 = vadd.f32 %v786_v30, %v785_v29  ;;  %v558_v23 = vadd.f32 %v550_v18, %v986_v12 }
 0x1e4   :  { %v553_v31 = vadd.f32 %v787_v56, %v739_v7  ;;  %v568_v9 = vsel %vm100_vm0, %v558_v23, 0.0 }
 0x1e5   :  { %569 = vadd.xlane.f32.xlu1 %v568_v9 }
 0x1e6   :  { %v559_v32 = vadd.f32 %v553_v31, %v991_v13 }
 0x1e8   :  { %v571_v10 = vsel %vm100_vm0, %v559_v32, 0.0 }
 0x1e9   :  { %572 = vadd.xlane.f32.xlu1 %v571_v10 }
 0x264   :  { %v564_v45 = vpop.xlane.xlu0 %563 }
 0x265   :  { %v575_v46 = vmul.f32 0.015625, %v564_v45 }
 0x267   :  { %v579_v35 = vsub.f32 %v556_v62, %v575_v46 }
 0x268   :  { %v567_v51 = vpop.xlane.xlu0 %566 }
 0x269   :  { %v576_v36 = vmul.f32 0.015625, %v567_v51  ;;  %v583_v37 = vmul.f32 %v579_v35, %v579_v35 }
 0x26b   :  { %v580_v38 = vsub.f32 %v557_v20, %v576_v36  ;;  %v587_v43 = vsel %vm100_vm0, %v583_v37, 0.0 }
 0x26c   :  { %588 = vadd.xlane.f32.xlu0 %v587_v43 }
 0x26d   :  { %v584_v12 = vmul.f32 %v580_v38, %v580_v38 }
 0x26e   :  { %v570_v40 = vpop.xlane.xlu1 %569 }
 0x26f   :  { %v590_v39 = vsel %vm100_vm0, %v584_v12, 0.0  ;;  %v577_v44 = vmul.f32 0.015625, %v570_v40 }
 0x270   :  { %591 = vadd.xlane.f32.xlu1 %v590_v39 }
 0x271   :  { %v581_v13 = vsub.f32 %v558_v23, %v577_v44 }
 0x272   :  { %v573_v34 = vpop.xlane.xlu1 %572 }
 0x273   :  { %v578_v54 = vmul.f32 0.015625, %v573_v34  ;;  %v585_v47 = vmul.f32 %v581_v13, %v581_v13 }
 0x275   :  { %v582_v48 = vsub.f32 %v559_v32, %v578_v54  ;;  %v593_v6 = vsel %vm100_vm0, %v585_v47, 0.0 }
 0x276   :  { %594 = vadd.xlane.f32.xlu0 %v593_v6 }
 0x277   :  { %v586_v19 = vmul.f32 %v582_v48, %v582_v48 }
 0x279   :  { %v596_v49 = vsel %vm100_vm0, %v586_v19, 0.0 }
 0x27a   :  { %597 = vadd.xlane.f32.xlu1 %v596_v49 }
 0x2f5   :  { %v589_v52 = vpop.xlane.xlu0 %588 }
 0x2f6   :  { %v599_v53 = vmul.f32 0.015625, %v589_v52 }
 0x2f8   :  { %v603_v58 = vadd.f32 1e-05, %v599_v53  ;;  %v758_v53 = vld [vmem:[%s1238_s7] ss:$0 sm:$0xff]  ;;  %s893_s7 = smov [#allocation2]  }
 0x2f9   :  { %v592_v8 = vpop.xlane.xlu1 %591  ;;  %s718_s26 = sshll.u32 %s893_s7, 4  ;;  %s719_s26 = int_to_ptr.vmem [resolvable:$true] %s718_s26 }
 0x2fa   :  { %853 = vrsqrt.f32 %v603_v58  ;;  %v600_v60 = vmul.f32 0.015625, %v592_v8  ;;  %p874_p1 = scmp.lt.s32.totalorder %s719_s26, %s719_s26 }
 0x2fc   :  { %v604_v33 = vadd.f32 1e-05, %v600_v60 }
 0x2fe   :  { %855 = vrsqrt.f32 %v604_v33  ;;  %v759_v33 = vld [vmem:[%s1239_s8] ss:$0 sm:$0xff]  ;;  %s869_s8 = scalar_lea.vmem %s719_s26, 512 }
 0x2ff   :  { %v595_v3 = vpop.xlane.xlu0 %594  ;;  %p870_p0 = scmp.ne.s32.totalorder %s719_s26, %s869_s8  ;;  %p875_p2 = scmp.lt.s32.totalorder %s869_s8, %s869_s8 }
 0x300   :  { %v601_v25 = vmul.f32 0.015625, %v595_v3 }
 0x301   :  { %p876_p3 = por %p875_p2, %p874_p1 }
 0x302   :  { %v605_v61 = vadd.f32 1e-05, %v601_v25 }
 0x303   :  { %v598_v63 = vpop.xlane.xlu1 %597  ;;  %p877_p4 = pnand %p876_p3, %p870_p0 }
 0x304   :  { %857 = vrsqrt.f32 %v605_v61  ;;  %v602_v1 = vmul.f32 0.015625, %v598_v63 }
 0x306   :  { %v606_v4 = vadd.f32 1e-05, %v602_v1 }
 0x307   :  { %v854_v59 = vpop.eup %853 }
 0x308   :  { %v611_v2 = vmul.f32 %v854_v59, %v579_v35  ;;  %859 = vrsqrt.f32 %v606_v4 }
 0x30a   :  { %v621_v50 = vmul.f32 %v756_v24, %v611_v2 }
 0x30b   :  { %v856_v57 = vpop.eup %855 }
 0x30c   :  { %v631_v11 = vadd.f32 %v757_v5, %v621_v50  ;;  %v612_v55 = vmul.f32 %v856_v57, %v580_v38 }
 0x30e   :  { %v637_v7 = vsel %vm100_vm0, %v631_v11, 0.0  ;;  %v622_v41 = vmul.f32 %v756_v24, %v612_v55 }
 0x30f   :  { %638 = vadd.xlane.f32.xlu0 %v637_v7 }
 0x310   :  { %v632_v0 = vadd.f32 %v757_v5, %v622_v41 }
 0x311   :  { %v858_v14 = vpop.eup %857 }
 0x312   :  { %v640_v15 = vsel %vm100_vm0, %v632_v0, 0.0  ;;  %v613_v16 = vmul.f32 %v858_v14, %v581_v13 }
 0x313   :  { %641 = vadd.xlane.f32.xlu1 %v640_v15 }
 0x314   :  { %v623_v26 = vmul.f32 %v756_v24, %v613_v16 }
 0x315   :  { %v860_v62 = vpop.eup %859 }
 0x316   :  { %v633_v17 = vadd.f32 %v757_v5, %v623_v26  ;;  %v614_v42 = vmul.f32 %v860_v62, %v582_v48 }
 0x318   :  { %v643_v20 = vsel %vm100_vm0, %v633_v17, 0.0  ;;  %v624_v21 = vmul.f32 %v756_v24, %v614_v42 }
 0x319   :  { %644 = vadd.xlane.f32.xlu0 %v643_v20 }
 0x31a   :  { %v634_v22 = vadd.f32 %v757_v5, %v624_v21 }
 0x31c   :  { %v646_v28 = vsel %vm100_vm0, %v634_v22, 0.0 }
 0x31d   :  { %647 = vadd.xlane.f32.xlu1 %v646_v28 }
 0x398   :  { %v639_v27 = vpop.xlane.xlu0 %638 }
 0x399   :  { %v649_v29 = vmul.f32 0.015625, %v639_v27 }
 0x39b   :  { %v653_v18 = vsub.f32 %v631_v11, %v649_v29 }
 0x39c   :  { %v642_v30 = vpop.xlane.xlu1 %641 }
 0x39d   :  { %v650_v56 = vmul.f32 0.015625, %v642_v30  ;;  %v657_v23 = vmul.f32 %v653_v18, %v653_v18 }
 0x39f   :  { %v654_v31 = vsub.f32 %v632_v0, %v650_v56  ;;  %v661_v9 = vsel %vm100_vm0, %v657_v23, 0.0 }
 0x3a0   :  { %662 = vadd.xlane.f32.xlu0 %v661_v9 }
 0x3a1   :  { %v658_v32 = vmul.f32 %v654_v31, %v654_v31 }
 0x3a2   :  { %v645_v45 = vpop.xlane.xlu0 %644 }
 0x3a3   :  { %v664_v10 = vsel %vm100_vm0, %v658_v32, 0.0  ;;  %v651_v46 = vmul.f32 0.015625, %v645_v45 }
 0x3a4   :  { %665 = vadd.xlane.f32.xlu1 %v664_v10 }
 0x3a5   :  { %v655_v35 = vsub.f32 %v633_v17, %v651_v46 }
 0x3a6   :  { %v648_v51 = vpop.xlane.xlu1 %647 }
 0x3a7   :  { %v652_v36 = vmul.f32 0.015625, %v648_v51  ;;  %v659_v37 = vmul.f32 %v655_v35, %v655_v35 }
 0x3a9   :  { %v656_v38 = vsub.f32 %v634_v22, %v652_v36  ;;  %v667_v43 = vsel %vm100_vm0, %v659_v37, 0.0 }
 0x3aa   :  { %668 = vadd.xlane.f32.xlu0 %v667_v43 }
 0x3ab   :  { %v660_v12 = vmul.f32 %v656_v38, %v656_v38 }
 0x3ad   :  { %v670_v39 = vsel %vm100_vm0, %v660_v12, 0.0 }
 0x3ae   :  { %671 = vadd.xlane.f32.xlu1 %v670_v39 }
 0x429   :  { %v663_v40 = vpop.xlane.xlu0 %662 }
 0x42a   :  { %v673_v44 = vmul.f32 0.015625, %v663_v40 }
 0x42c   :  { %v677_v13 = vadd.f32 1e-05, %v673_v44 }
 0x42d   :  { %v666_v34 = vpop.xlane.xlu1 %665 }
 0x42e   :  { %861 = vrsqrt.f32 %v677_v13  ;;  %v674_v54 = vmul.f32 0.015625, %v666_v34 }
 0x430   :  { %v678_v47 = vadd.f32 1e-05, %v674_v54 }
 0x432   :  { %863 = vrsqrt.f32 %v678_v47 }
 0x433   :  { %v669_v48 = vpop.xlane.xlu0 %668 }
 0x434   :  { %v675_v6 = vmul.f32 0.015625, %v669_v48 }
 0x436   :  { %v679_v19 = vadd.f32 1e-05, %v675_v6 }
 0x437   :  { %v672_v49 = vpop.xlane.xlu1 %671 }
 0x438   :  { %865 = vrsqrt.f32 %v679_v19  ;;  %v676_v58 = vmul.f32 0.015625, %v672_v49 }
 0x43a   :  { %v680_v60 = vadd.f32 1e-05, %v676_v58 }
 0x43b   :  { %v862_v52 = vpop.eup %861 }
 0x43c   :  { %v685_v8 = vmul.f32 %v862_v52, %v653_v18  ;;  %867 = vrsqrt.f32 %v680_v60 }
 0x43e   :  { %v695_v3 = vmul.f32 %v758_v53, %v685_v8 }
 0x43f   :  { %v864_v25 = vpop.eup %863 }
 0x440   :  { %v686_v61 = vmul.f32 %v864_v25, %v654_v31  ;;  %v705_v63 = vadd.f32 %v759_v33, %v695_v3 }
 0x442   :  { %v696_v59 = vmul.f32 %v758_v53, %v686_v61  ;;  %709 = vst.msk [vmem:[#allocation2] sm:$0xff] %vm100_vm0, %v705_v63 }
 0x444   :  { %v706_v1 = vadd.f32 %v759_v33, %v696_v59 }
 0x445   :  { %v866_v24 = vpop.eup %865 }
 0x446   :  { %710 = vst.msk [vmem:[#allocation2 + $0x8] sm:$0xff] %vm100_vm0, %v706_v1  ;;  %v687_v2 = vmul.f32 %v866_v24, %v655_v35 }
 0x448   :  { %v697_v4 = vmul.f32 %v758_v53, %v687_v2 }
 0x449   :  { %v868_v5 = vpop.eup %867 }
 0x44a   :  { %v688_v50 = vmul.f32 %v868_v5, %v656_v38  ;;  %v707_v57 = vadd.f32 %v759_v33, %v697_v4 }
 0x44c   :  { %v698_v11 = vmul.f32 %v758_v53, %v688_v50  ;;  %711 = vst.msk [vmem:[#allocation2 + $0x10] sm:$0xff] %vm100_vm0, %v707_v57 }
 0x44e   :  { %v708_v55 = vadd.f32 %v759_v33, %v698_v11 }
 0x450   :  { %712 = vst.msk [vmem:[#allocation2 + $0x18] sm:$0xff] %vm100_vm0, %v708_v55 }
 0x451   :  { %880 = shalt.err (!%p877_p4)
}
 0x452   :  { %s894_s27 = smov 128   ;;  %s895_s28 = smov 8  }
 0x453   :  { %724 = dma.vmem_to_hbm [thread:$0]  %s719_s26, 512, %s1240_s9, [#allocation3], %s894_s27, %s894_s27, %s895_s28  }
 0x454   :  { %889 = dma.done.wait [#allocation3], 512  }
 0x455   :  { %890 = vsyncadd [#allocation3], 4294966784 }
 0x456   :  { %728 = vsyncpa [#allocation3], 1 }

</bundles_post_ra>
